<compile_context>
chip_gen: v7x
topology: tpu7x:2x2x1
jax: 0.10.0
libtpu: 0.0.40
codegen_flags: <defaults>
</compile_context>

<pallas_src>
import jax
import jax.numpy as jnp
from jax.experimental import pallas as pl
from jax.experimental.pallas import tpu as pltpu


# --------------------------------------------------------------------------
# In-kernel helpers (operate on VMEM-resident values)
# --------------------------------------------------------------------------
def _conv3x3_relu(xpad_hwc, wk, b):
    """3x3 conv (halo already applied) + bias + ReLU on one VMEM-resident image.

    xpad_hwc: (H+2, W+2, Cin) value
    wk:       (9*Cin, Cout)   tap-stacked weights (row index = tap*Cin + cin)
    b:        (1, Cout)
    returns:  (H*W, Cout) float32
    """
    hp, wp, cin = xpad_hwc.shape
    h, w = hp - 2, wp - 2
    # 9 shifted views (static slices, no HBM duplication), folded into one
    # K = 9*Cin contraction.
    taps = [xpad_hwc[dy:dy + h, dx:dx + w, :] for dy in range(3) for dx in range(3)]
    win = jnp.concatenate(taps, axis=-1).reshape(h * w, 9 * cin)    # (H*W, 9*Cin)
    y = jnp.dot(win, wk, preferred_element_type=jnp.float32) + b    # single matmul
    return jnp.maximum(y, 0.0)


def _make_unit_kernel(h, w, pooling):
    def kernel(x_ref, w1_ref, b1_ref, w2_ref, b2_ref, *out_refs):
        bp_ref = out_refs[0]
        c1 = w1_ref.shape[-1]

        # conv1 + ReLU (stays in VMEM)
        h1 = _conv3x3_relu(x_ref[0], w1_ref[...], b1_ref[...])      # (H*W, C1)

        # re-pad h1 with a zero halo for conv2 (pure VMEM value ops)
        h1_hwc = h1.reshape(h, w, c1)
        zc = jnp.zeros((h, 1, c1), h1.dtype)
        zr = jnp.zeros((1, w + 2, c1), h1.dtype)
        h1p = jnp.concatenate(
            [zr, jnp.concatenate([zc, h1_hwc, zc], axis=1), zr], axis=0)

        # conv2 + ReLU
        before = _conv3x3_relu(h1p, w2_ref[...], b2_ref[...])       # (H*W, C1)

        # channel-major, lane-dense store: (C1, H*W) == NCHW row-major
        bp_ref[0] = pltpu.einshape("sc->cs", before).astype(bp_ref.dtype)

        if pooling:
            ap_ref = out_refs[1]
            ho, wo = h // 2, w // 2
            rows = before.reshape(ho, 2, w, c1)
            rows = jnp.maximum(rows[:, 0], rows[:, 1])              # pool H pairs
            cols = rows.reshape(ho, wo, 2, c1)
            pooled = jnp.maximum(cols[:, :, 0, :], cols[:, :, 1, :])  # pool W pairs
            pooled = pooled.reshape(ho * wo, c1)
            ap_ref[0] = pltpu.einshape("sc->cs", pooled).astype(ap_ref.dtype)

    return kernel


# --------------------------------------------------------------------------
# pallas_call wrapper (one grid step per batch element)
# --------------------------------------------------------------------------
def _fused_unit_call(xpad, w1k, b1, w2k, b2, h, w, pooling):
    n, hp, wp, cin = xpad.shape
    c1 = w1k.shape[-1]
    hw = h * w

    out_shape = [jax.ShapeDtypeStruct((n, c1, hw), xpad.dtype)]
    out_specs = [pl.BlockSpec((1, c1, hw), lambda i: (i, 0, 0))]
    if pooling:
        pw = (h // 2) * (w // 2)
        out_shape.append(jax.ShapeDtypeStruct((n, c1, pw), xpad.dtype))
        out_specs.append(pl.BlockSpec((1, c1, pw), lambda i: (i, 0, 0)))

    # TODO(synk): for production UNet sizes add a halo-overlapped spatial grid
    # axis (sized to double-buffer in scoped VMEM; ~half the v6e tile on v7x),
    # mark it "parallel" for megacore, and cast activations/weights to bf16 at
    # this boundary (f32 accumulation stays in-kernel).
    return pl.pallas_call(
        _make_unit_kernel(h, w, pooling),
        out_shape=tuple(out_shape),
        grid=(n,),
        in_specs=[
            pl.BlockSpec((1, hp, wp, cin), lambda i: (i, 0, 0, 0)),  # padded halo block
            pl.BlockSpec((9 * cin, c1), lambda i: (0, 0)),           # tap-stacked w1
            pl.BlockSpec((1, c1), lambda i: (0, 0)),
            pl.BlockSpec((9 * c1, c1), lambda i: (0, 0)),            # tap-stacked w2
            pl.BlockSpec((1, c1), lambda i: (0, 0)),
        ],
        out_specs=tuple(out_specs),
        compiler_params=pltpu.CompilerParams(dimension_semantics=("parallel",)),
    )(xpad, w1k, b1, w2k, b2)


# --------------------------------------------------------------------------
# ContractingUnit forward (NCHW in / NCHW out, matching the PyTorch module)
# --------------------------------------------------------------------------
def contracting_unit_forward(x_nchw, w1, b1, w2, b2, pooling=True):
    # TODO(synk): util.del_tensors([x]) is manual memory management with no JAX equivalent.
    n, cin, h, w = x_nchw.shape
    c1 = w1.shape[0]
    # Glue: NCHW -> zero-padded NHWC halo block (single +1 pad, no 9x im2col);
    # OIHW weights -> (9*Cin, Cout) so the kernel contracts all taps in one matmul.
    xpad = jnp.pad(jnp.transpose(x_nchw, (0, 2, 3, 1)),
                   ((0, 0), (1, 1), (1, 1), (0, 0)))
    w1k = jnp.transpose(w1, (2, 3, 1, 0)).reshape(9 * cin, c1)
    w2k = jnp.transpose(w2, (2, 3, 1, 0)).reshape(9 * c1, c1)

    outs = _fused_unit_call(xpad, w1k, b1.reshape(1, c1), w2k, b2.reshape(1, c1),
                            h, w, pooling)
    before = outs[0].reshape(n, c1, h, w)            # free: kernel emits NCHW-flat
    after = outs[1].reshape(n, c1, h // 2, w // 2) if pooling else None
    return before, after


# --------------------------------------------------------------------------
# Pure-JAX reference (for correctness check only)
# --------------------------------------------------------------------------
def reference_forward(x, w1, b1, w2, b2):
    def conv(xi, w, b):
        y = jax.lax.conv_general_dilated(
            xi, w, window_strides=(1, 1), padding=((1, 1), (1, 1)),
            dimension_numbers=("NCHW", "OIHW", "NCHW"))
        return jax.nn.relu(y + b[None, :, None, None])

    bp = conv(conv(x, w1, b1), w2, b2)
    ap = jax.lax.reduce_window(bp, -jnp.inf, jax.lax.max,
                               (1, 1, 2, 2), (1, 1, 2, 2), "VALID")
    return bp, ap


if __name__ == "__main__":
    key = jax.random.PRNGKey(0)
    N, Cin, Cout, H, W = 2, 4, 8, 16, 16

    k_x, k_w1, k_b1, k_w2, k_b2 = jax.random.split(key, 5)
    x = jax.random.normal(k_x, (N, Cin, H, W), dtype=jnp.float32)

    # Deterministic PyTorch-like uniform init: U(-1/sqrt(fan_in), 1/sqrt(fan_in))
    bound1 = 1.0 / (Cin * 9) ** 0.5
    w1 = jax.random.uniform(k_w1, (Cout, Cin, 3, 3), jnp.float32, -bound1, bound1)
    b1 = jax.random.uniform(k_b1, (Cout,), jnp.float32, -bound1, bound1)
    bound2 = 1.0 / (Cout * 9) ** 0.5
    w2 = jax.random.uniform(k_w2, (Cout, Cout, 3, 3), jnp.float32, -bound2, bound2)
    b2 = jax.random.uniform(k_b2, (Cout,), jnp.float32, -bound2, bound2)

    before, after = jax.jit(contracting_unit_forward, static_argnames=("pooling",))(
        x, w1, b1, w2, b2, pooling=True)
    before = jax.block_until_ready(before)
    after = jax.block_until_ready(after)

    bp_ref, ap_ref = reference_forward(x, w1, b1, w2, b2)

    assert before.shape == (N, Cout, H, W)
    assert after.shape == (N, Cout, H // 2, W // 2)
    assert jnp.allclose(before, bp_ref, atol=1e-4, rtol=1e-4), "before_pooling mismatch"
    assert jnp.allclose(after, ap_ref, atol=1e-4, rtol=1e-4), "after_pooling mismatch"

    print("KERNEL_OK")
</pallas_src>

<mosaic_0001>
module attributes {stable_mosaic.version = 11 : i64} {
  func.func @kernel(%arg0: i32, %arg1: memref<1x18x18x4xf32, #tpu.memory_space<vmem>>, %arg2: memref<36x8xf32, #tpu.memory_space<vmem>>, %arg3: memref<1x8xf32, #tpu.memory_space<vmem>>, %arg4: memref<72x8xf32, #tpu.memory_space<vmem>>, %arg5: memref<1x8xf32, #tpu.memory_space<vmem>>, %arg6: memref<1x8x256xf32, #tpu.memory_space<vmem>>, %arg7: memref<1x8x64xf32, #tpu.memory_space<vmem>>) attributes {dimension_semantics = [#tpu.dimension_semantics<parallel>], iteration_bounds = array<i64: 2>, scalar_prefetch = 0 : i64, scratch_operands = 0 : i64, tpu.core_type = #tpu.core_type<tc>, window_params = [{transform_indices = @transform_0, window_bounds = array<i64: 1, 18, 18, 4>}, {pipeline_mode = #tpu.pipeline_mode<synchronous>, transform_indices = @transform_1, window_bounds = array<i64: 36, 8>}, {pipeline_mode = #tpu.pipeline_mode<synchronous>, transform_indices = @transform_2, window_bounds = array<i64: 1, 8>}, {pipeline_mode = #tpu.pipeline_mode<synchronous>, transform_indices = @transform_3, window_bounds = array<i64: 72, 8>}, {pipeline_mode = #tpu.pipeline_mode<synchronous>, transform_indices = @transform_4, window_bounds = array<i64: 1, 8>}, {transform_indices = @transform_5, window_bounds = array<i64: 1, 8, 256>}, {transform_indices = @transform_6, window_bounds = array<i64: 1, 8, 64>}]} {
    %c0 = arith.constant 0 : index
    %c0_0 = arith.constant 0 : index
    %c0_1 = arith.constant 0 : index
    %c0_2 = arith.constant 0 : index
    %0 = vector.load %arg1[%c0, %c0_0, %c0_1, %c0_2] : memref<1x18x18x4xf32, #tpu.memory_space<vmem>>, vector<1x18x18x4xf32>
    %1 = vector.shape_cast %0 : vector<1x18x18x4xf32> to vector<18x18x4xf32>
    %c0_3 = arith.constant 0 : index
    %c0_4 = arith.constant 0 : index
    %2 = vector.load %arg2[%c0_3, %c0_4] : memref<36x8xf32, #tpu.memory_space<vmem>>, vector<36x8xf32>
    %c0_5 = arith.constant 0 : index
    %c0_6 = arith.constant 0 : index
    %3 = vector.load %arg3[%c0_5, %c0_6] : memref<1x8xf32, #tpu.memory_space<vmem>>, vector<1x8xf32>
    %4 = vector.extract_strided_slice %1 {offsets = [0, 0, 0], sizes = [16, 16, 4], strides = [1, 1, 1]} : vector<18x18x4xf32> to vector<16x16x4xf32>
    %5 = vector.extract_strided_slice %1 {offsets = [0, 1, 0], sizes = [16, 16, 4], strides = [1, 1, 1]} : vector<18x18x4xf32> to vector<16x16x4xf32>
    %6 = vector.extract_strided_slice %1 {offsets = [0, 2, 0], sizes = [16, 16, 4], strides = [1, 1, 1]} : vector<18x18x4xf32> to vector<16x16x4xf32>
    %7 = vector.extract_strided_slice %1 {offsets = [1, 0, 0], sizes = [16, 16, 4], strides = [1, 1, 1]} : vector<18x18x4xf32> to vector<16x16x4xf32>
    %8 = vector.extract_strided_slice %1 {offsets = [1, 1, 0], sizes = [16, 16, 4], strides = [1, 1, 1]} : vector<18x18x4xf32> to vector<16x16x4xf32>
    %9 = vector.extract_strided_slice %1 {offsets = [1, 2, 0], sizes = [16, 16, 4], strides = [1, 1, 1]} : vector<18x18x4xf32> to vector<16x16x4xf32>
    %10 = vector.extract_strided_slice %1 {offsets = [2, 0, 0], sizes = [16, 16, 4], strides = [1, 1, 1]} : vector<18x18x4xf32> to vector<16x16x4xf32>
    %11 = vector.extract_strided_slice %1 {offsets = [2, 1, 0], sizes = [16, 16, 4], strides = [1, 1, 1]} : vector<18x18x4xf32> to vector<16x16x4xf32>
    %12 = vector.extract_strided_slice %1 {offsets = [2, 2, 0], sizes = [16, 16, 4], strides = [1, 1, 1]} : vector<18x18x4xf32> to vector<16x16x4xf32>
    %13 = tpu.concatenate %4, %5, %6, %7, %8, %9, %10, %11, %12 in 2 : vector<16x16x4xf32>, vector<16x16x4xf32>, vector<16x16x4xf32>, vector<16x16x4xf32>, vector<16x16x4xf32>, vector<16x16x4xf32>, vector<16x16x4xf32>, vector<16x16x4xf32>, vector<16x16x4xf32> -> vector<16x16x36xf32>
    %14 = vector.shape_cast %13 : vector<16x16x36xf32> to vector<256x36xf32>
    %cst = arith.constant dense<0.000000e+00> : vector<256x8xf32>
    %15 = tpu.matmul %14, %2, %cst {dimension_numbers = #tpu.dot_dimension_numbers<[1], [0], [0], [1], [0, 0, 1, 1], [], []>} : vector<256x36xf32>, vector<36x8xf32>, vector<256x8xf32> -> vector<256x8xf32>
    %16 = vector.broadcast %3 : vector<1x8xf32> to vector<256x8xf32>
    %17 = arith.addf %15, %16 : vector<256x8xf32>
    %cst_7 = arith.constant 0.000000e+00 : f32
    %18 = vector.broadcast %cst_7 : f32 to vector<256x8xf32>
    %19 = arith.maximumf %17, %18 : vector<256x8xf32>
    %20 = vector.shape_cast %19 : vector<256x8xf32> to vector<16x16x8xf32>
    %cst_8 = arith.constant 0.000000e+00 : f32
    %21 = vector.broadcast %cst_8 : f32 to vector<16x1x8xf32>
    %cst_9 = arith.constant 0.000000e+00 : f32
    %22 = vector.broadcast %cst_9 : f32 to vector<1x18x8xf32>
    %23 = tpu.concatenate %21, %20, %21 in 1 : vector<16x1x8xf32>, vector<16x16x8xf32>, vector<16x1x8xf32> -> vector<16x18x8xf32>
    %24 = tpu.concatenate %22, %23, %22 in 0 : vector<1x18x8xf32>, vector<16x18x8xf32>, vector<1x18x8xf32> -> vector<18x18x8xf32>
    %c0_10 = arith.constant 0 : index
    %c0_11 = arith.constant 0 : index
    %25 = vector.load %arg4[%c0_10, %c0_11] : memref<72x8xf32, #tpu.memory_space<vmem>>, vector<72x8xf32>
    %c0_12 = arith.constant 0 : index
    %c0_13 = arith.constant 0 : index
    %26 = vector.load %arg5[%c0_12, %c0_13] : memref<1x8xf32, #tpu.memory_space<vmem>>, vector<1x8xf32>
    %27 = vector.extract_strided_slice %24 {offsets = [0, 0, 0], sizes = [16, 16, 8], strides = [1, 1, 1]} : vector<18x18x8xf32> to vector<16x16x8xf32>
    %28 = vector.extract_strided_slice %24 {offsets = [0, 1, 0], sizes = [16, 16, 8], strides = [1, 1, 1]} : vector<18x18x8xf32> to vector<16x16x8xf32>
    %29 = vector.extract_strided_slice %24 {offsets = [0, 2, 0], sizes = [16, 16, 8], strides = [1, 1, 1]} : vector<18x18x8xf32> to vector<16x16x8xf32>
    %30 = vector.extract_strided_slice %24 {offsets = [1, 0, 0], sizes = [16, 16, 8], strides = [1, 1, 1]} : vector<18x18x8xf32> to vector<16x16x8xf32>
    %31 = vector.extract_strided_slice %24 {offsets = [1, 1, 0], sizes = [16, 16, 8], strides = [1, 1, 1]} : vector<18x18x8xf32> to vector<16x16x8xf32>
    %32 = vector.extract_strided_slice %24 {offsets = [1, 2, 0], sizes = [16, 16, 8], strides = [1, 1, 1]} : vector<18x18x8xf32> to vector<16x16x8xf32>
    %33 = vector.extract_strided_slice %24 {offsets = [2, 0, 0], sizes = [16, 16, 8], strides = [1, 1, 1]} : vector<18x18x8xf32> to vector<16x16x8xf32>
    %34 = vector.extract_strided_slice %24 {offsets = [2, 1, 0], sizes = [16, 16, 8], strides = [1, 1, 1]} : vector<18x18x8xf32> to vector<16x16x8xf32>
    %35 = vector.extract_strided_slice %24 {offsets = [2, 2, 0], sizes = [16, 16, 8], strides = [1, 1, 1]} : vector<18x18x8xf32> to vector<16x16x8xf32>
    %36 = tpu.concatenate %27, %28, %29, %30, %31, %32, %33, %34, %35 in 2 : vector<16x16x8xf32>, vector<16x16x8xf32>, vector<16x16x8xf32>, vector<16x16x8xf32>, vector<16x16x8xf32>, vector<16x16x8xf32>, vector<16x16x8xf32>, vector<16x16x8xf32>, vector<16x16x8xf32> -> vector<16x16x72xf32>
    %37 = vector.shape_cast %36 : vector<16x16x72xf32> to vector<256x72xf32>
    %cst_14 = arith.constant dense<0.000000e+00> : vector<256x8xf32>
    %38 = tpu.matmul %37, %25, %cst_14 {dimension_numbers = #tpu.dot_dimension_numbers<[1], [0], [0], [1], [0, 0, 1, 1], [], []>} : vector<256x72xf32>, vector<72x8xf32>, vector<256x8xf32> -> vector<256x8xf32>
    %39 = vector.broadcast %26 : vector<1x8xf32> to vector<256x8xf32>
    %40 = arith.addf %38, %39 : vector<256x8xf32>
    %cst_15 = arith.constant 0.000000e+00 : f32
    %41 = vector.broadcast %cst_15 : f32 to vector<256x8xf32>
    %42 = arith.maximumf %40, %41 : vector<256x8xf32>
    %43 = tpu.transpose %42, [1, 0] : vector<256x8xf32> -> vector<8x256xf32>
    %c0_16 = arith.constant 0 : index
    %c0_17 = arith.constant 0 : index
    %c0_18 = arith.constant 0 : index
    %44 = vector.load %arg6[%c0_16, %c0_17, %c0_18] : memref<1x8x256xf32, #tpu.memory_space<vmem>>, vector<1x8x256xf32>
    %45 = vector.shape_cast %44 : vector<1x8x256xf32> to vector<8x256xf32>
    %46 = vector.shape_cast %43 : vector<8x256xf32> to vector<1x8x256xf32>
    tpu.vector_store %arg6[%c0_16, %c0_17, %c0_18], %46 {strides = array<i32>} : memref<1x8x256xf32, #tpu.memory_space<vmem>>, vector<1x8x256xf32>,
    %47 = vector.shape_cast %42 : vector<256x8xf32> to vector<8x2x16x8xf32>
    %48 = vector.extract_strided_slice %47 {offsets = [0, 0, 0, 0], sizes = [8, 1, 16, 8], strides = [1, 1, 1, 1]} : vector<8x2x16x8xf32> to vector<8x1x16x8xf32>
    %49 = vector.shape_cast %48 : vector<8x1x16x8xf32> to vector<8x16x8xf32>
    %50 = vector.extract_strided_slice %47 {offsets = [0, 1, 0, 0], sizes = [8, 1, 16, 8], strides = [1, 1, 1, 1]} : vector<8x2x16x8xf32> to vector<8x1x16x8xf32>
    %51 = vector.shape_cast %50 : vector<8x1x16x8xf32> to vector<8x16x8xf32>
    %52 = arith.maximumf %49, %51 : vector<8x16x8xf32>
    %53 = vector.shape_cast %52 : vector<8x16x8xf32> to vector<8x8x2x8xf32>
    %54 = vector.extract_strided_slice %53 {offsets = [0, 0, 0, 0], sizes = [8, 8, 1, 8], strides = [1, 1, 1, 1]} : vector<8x8x2x8xf32> to vector<8x8x1x8xf32>
    %55 = vector.shape_cast %54 : vector<8x8x1x8xf32> to vector<8x8x8xf32>
    %56 = vector.extract_strided_slice %53 {offsets = [0, 0, 1, 0], sizes = [8, 8, 1, 8], strides = [1, 1, 1, 1]} : vector<8x8x2x8xf32> to vector<8x8x1x8xf32>
    %57 = vector.shape_cast %56 : vector<8x8x1x8xf32> to vector<8x8x8xf32>
    %58 = arith.maximumf %55, %57 : vector<8x8x8xf32>
    %59 = vector.shape_cast %58 : vector<8x8x8xf32> to vector<64x8xf32>
    %60 = tpu.transpose %59, [1, 0] : vector<64x8xf32> -> vector<8x64xf32>
    %c0_19 = arith.constant 0 : index
    %c0_20 = arith.constant 0 : index
    %c0_21 = arith.constant 0 : index
    %61 = vector.load %arg7[%c0_19, %c0_20, %c0_21] : memref<1x8x64xf32, #tpu.memory_space<vmem>>, vector<1x8x64xf32>
    %62 = vector.shape_cast %61 : vector<1x8x64xf32> to vector<8x64xf32>
    %63 = vector.shape_cast %60 : vector<8x64xf32> to vector<1x8x64xf32>
    tpu.vector_store %arg7[%c0_19, %c0_20, %c0_21], %63 {strides = array<i32>} : memref<1x8x64xf32, #tpu.memory_space<vmem>>, vector<1x8x64xf32>,
    return
  }
  func.func @transform_0(%arg0: i32) -> (i32, i32, i32, i32) {
    %c0_i32 = arith.constant 0 : i32
    %c0_i32_0 = arith.constant 0 : i32
    %c0_i32_1 = arith.constant 0 : i32
    %c0_i32_2 = arith.constant 0 : i32
    return %arg0, %c0_i32, %c0_i32_0, %c0_i32_1 : i32, i32, i32, i32
  }
  func.func @transform_1(%arg0: i32) -> (i32, i32) {
    %c0_i32 = arith.constant 0 : i32
    %c0_i32_0 = arith.constant 0 : i32
    %c0_i32_1 = arith.constant 0 : i32
    return %c0_i32, %c0_i32_0 : i32, i32
  }
  func.func @transform_2(%arg0: i32) -> (i32, i32) {
    %c0_i32 = arith.constant 0 : i32
    %c0_i32_0 = arith.constant 0 : i32
    %c0_i32_1 = arith.constant 0 : i32
    return %c0_i32, %c0_i32_0 : i32, i32
  }
  func.func @transform_3(%arg0: i32) -> (i32, i32) {
    %c0_i32 = arith.constant 0 : i32
    %c0_i32_0 = arith.constant 0 : i32
    %c0_i32_1 = arith.constant 0 : i32
    return %c0_i32, %c0_i32_0 : i32, i32
  }
  func.func @transform_4(%arg0: i32) -> (i32, i32) {
    %c0_i32 = arith.constant 0 : i32
    %c0_i32_0 = arith.constant 0 : i32
    %c0_i32_1 = arith.constant 0 : i32
    return %c0_i32, %c0_i32_0 : i32, i32
  }
  func.func @transform_5(%arg0: i32) -> (i32, i32, i32) {
    %c0_i32 = arith.constant 0 : i32
    %c0_i32_0 = arith.constant 0 : i32
    %c0_i32_1 = arith.constant 0 : i32
    return %arg0, %c0_i32, %c0_i32_0 : i32, i32, i32
  }
  func.func @transform_6(%arg0: i32) -> (i32, i32, i32) {
    %c0_i32 = arith.constant 0 : i32
    %c0_i32_0 = arith.constant 0 : i32
    %c0_i32_1 = arith.constant 0 : i32
    return %arg0, %c0_i32, %c0_i32_0 : i32, i32, i32
  }
}

</mosaic_0001>

<bundles_post_ra>
// kernel: contracting_unit_forward.1
= control target key start
LH: loop header
LB: loop body
LE: loop exit
PB: predicated region body
PF: predicated region fallthrough
CT: control target
= control target key end

     0   :  { %s5378_s21 = smov 0   ;;  %s9278_s0 = inlined_call_operand.vmem [shape: f32[2,18,18,4], index: 0, kind: input, shape index: {}]   ;;  %s9279_s1 = inlined_call_operand.vmem [shape: f32[36,8], index: 1, kind: input, shape index: {}]   ;;  %s9280_s2 = inlined_call_operand.vmem [shape: f32[1,8], index: 2, kind: input, shape index: {}]   ;;  %s9281_s3 = inlined_call_operand.vmem [shape: f32[72,8], index: 3, kind: input, shape index: {}]   ;;  %s9282_s4 = inlined_call_operand.vmem [shape: f32[1,8], index: 4, kind: input, shape index: {}]   ;;  %s9283_s5 = inlined_call_operand.vmem [shape: f32[2,8,256], index: 5, kind: output, shape index: {0}]   ;;  %s9284_s6 = inlined_call_operand.vmem [shape: f32[2,8,64], index: 6, kind: output, shape index: {1}]  }
   0x1 LB: > { %s4893_s22 = sadd.s32 4294967295, %s5327_s21   ;;  %p4897_p0 = scmp.ge.s32.totalorder %s5327_s21, 1  ;;  %s5327_s21 = sphi %s5378_s21, %s17_s21  }
   0x2   : > { %p215_p1 = scmp.lt.s32.totalorder %s5327_s21, 3 }
   0x4   : > { %p216_p2 = pnand %p4897_p0, %p215_p1 }
   0x6   : > { %219 = sbr.rel (%p216_p2) target bundleno = 1777 (0x6f1), region = 40 }
   0xd   : > { %p249_p3 = scmp.lt.s32.totalorder %s4893_s22, 1  ;;  %vm371_vm0 = vcmask 1046528   ;;  %s5329_s27 = smov 4   ;;  %vm548_vm1 = vcmask 1045504   ;;  %vm1327_vm2 = vcmask 31744   ;;  %vm1360_vm3 = vcmask 64512  }
   0xe   : > { %s5330_s28 = smov 8   ;;  %s5331_s29 = smov 12   ;;  %vm1393_vm4 = vcmask 97280   ;;  %vm1694_vm5 = vcmask 1043456   ;;  %vm1426_vm6 = vcmask 130048   ;;  %vm1459_vm7 = vcmask 162816  }
   0xf   : > { %s10175_s22 = smov (!%p249_p3, %s4893_s22), 1  ;;  %s5332_s30 = smov 16   ;;  %vm1492_vm8 = vcmask 195584   ;;  %vm1525_vm9 = vcmask 228352   ;;  %vm1558_vm10 = vcmask 261120   ;;  %vm1597_vm11 = vcmask 293888  }
  0x10   : > { %s5272_s23 = smul.u32 432, %s10175_s22  ;;  %s5333_s7 = smov 20   ;;  %vm1987_vm12 = vcmask 1040384   ;;  %vm3201_vm13 = vcmask 326656   ;;  %vm3234_vm14 = vcmask 392192   ;;  %vm3267_vm15 = vcmask 457728  }
  0x11   : > { %s5334_s8 = smov 24   ;;  %s5335_s9 = smov 28  }
  0x12   : > { %s5392_s26 = scalar_lea.vmem %s9278_s0, %s5272_s23  ;;  %s5336_s20 = smov 32  }
  0x13   : > { %v5395_v0 = vld [vmem:[%s5392_s26 + $0x18] sm:$0xff]  ;;  %v5398_v1 = vld [vmem:[%s5392_s26 + $0x20] sm:$0xff]  ;;  %v5406_v5 = vld [vmem:[%s5392_s26 + $0x8] sm:$0xff]  ;;  %s5338_s17 = smov 40   ;;  %s5339_s23 = smov 48  }
  0x14   : > { %v5401_v2 = vld [vmem:[%s5392_s26] sm:$0xff]  ;;  %v377_v3 = vrot.slane %v5395_v0, 1  ;;  %v378_v4 = vrot.slane %v5398_v1, 1  ;;  %v5410_v7 = vld [vmem:[%s5392_s26 + $0x28] sm:$0x3]  ;;  %v373_v8 = vrot.slane %v5406_v5, 1 }
  0x15   : > { %v372_v6 = vrot.slane %v5401_v2, 1  ;;  %v380_v9 = vrot.slane %v5410_v7, 1  ;;  %v5415_v10 = vld [vmem:[%s5392_s26 + $0x10] sm:$0x3]  ;;  %v5418_v11 = vld [vmem:[%s5392_s26 + $0x38] sm:$0xff]  ;;  %v5448_v24 = vld [vmem:[%s5392_s26 + $0x48] sm:$0xff] }
  0x16   : > { %v5421_v12 = vsel %vm371_vm0, %v377_v3, %v378_v4  ;;  %v375_v13 = vrot.slane %v5415_v10, 1  ;;  %v5425_v14 = vld [vmem:[%s5392_s26 + $0x40] sm:$0x3]  ;;  %v5428_v15 = vld [vmem:[%s5392_s26 + $0x30] sm:$0xff]  ;;  %v383_v18 = vrot.slane %v5418_v11, 1  ;;  %v387_v29 = vrot.slane %v5448_v24, 1 }
  0x17   : > { %456 = vrot.lane.b32.xlu1 %v5421_v12, %s5329_s27  ;;  %v374_v16 = vsel %vm371_vm0, %v372_v6, %v373_v8  ;;  %v5435_v17 = vsel %vm371_vm0, %v378_v4, %v380_v9  ;;  %v385_v19 = vrot.slane %v5425_v14, 1  ;;  %v382_v21 = vrot.slane %v5428_v15, 1  ;;  %v5442_v22 = vld [vmem:[%s5392_s26 + $0x50] sm:$0xff]  ;;  %v5445_v23 = vld [vmem:[%s5392_s26 + $0x58] sm:$0x3]  ;;  %v5463_v30 = vld [vmem:[%s5392_s26 + $0x68] sm:$0xff] }
  0x18   : > { %452 = vrot.lane.b32.xlu0 %v374_v16, %s5329_s27  ;;  %v376_v20 = vsel %vm371_vm0, %v373_v8, %v375_v13  ;;  %v388_v26 = vrot.slane %v5442_v22, 1  ;;  %v390_v27 = vrot.slane %v5445_v23, 1  ;;  %v5466_v31 = vld [vmem:[%s5392_s26 + $0x70] sm:$0x3]  ;;  %v5469_v32 = vld [vmem:[%s5392_s26 + $0x60] sm:$0xff]  ;;  %v393_v34 = vrot.slane %v5463_v30, 1 }
  0x19   : > { %v5454_v25 = vsel %vm371_vm0, %v383_v18, %v385_v19  ;;  %v5459_v28 = vsel %vm371_vm0, %v382_v21, %v383_v18  ;;  %v395_v35 = vrot.slane %v5466_v31, 1  ;;  %v392_v37 = vrot.slane %v5469_v32, 1  ;;  %v5485_v38 = vld [vmem:[%s5392_s26 + $0x80] sm:$0xff]  ;;  %v5488_v39 = vld [vmem:[%s5392_s26 + $0x88] sm:$0x3]  ;;  %v5491_v40 = vld [vmem:[%s5392_s26 + $0x78] sm:$0xff] }
  0x1a   : > { %9492 = vst [vmem:[#allocation2_spill] sm:$0xff] %v5454_v25  ;;  %9493 = vst [vmem:[#allocation3_spill] sm:$0xff] %v5459_v28  ;;  %v5476_v33 = vsel %vm371_vm0, %v388_v26, %v390_v27  ;;  %v5481_v36 = vsel %vm371_vm0, %v387_v29, %v388_v26  ;;  %v398_v42 = vrot.slane %v5485_v38, 1  ;;  %v400_v43 = vrot.slane %v5488_v39, 1  ;;  %v5507_v46 = vld [vmem:[%s5392_s26 + $0x98] sm:$0xff]  ;;  %v5513_v48 = vld [vmem:[%s5392_s26 + $0x90] sm:$0xff] }
  0x1b   : > { %458 = vrot.lane.b32.xlu1 %v5435_v17, %s5329_s27  ;;  %9494 = vst [vmem:[#allocation4_spill] sm:$0xff] %v5476_v33  ;;  %9495 = vst [vmem:[#allocation5_spill] sm:$0xff] %v5481_v36  ;;  %v5498_v41 = vsel %vm371_vm0, %v393_v34, %v395_v35  ;;  %v5503_v44 = vsel %vm371_vm0, %v392_v37, %v393_v34  ;;  %v397_v45 = vrot.slane %v5491_v40, 1  ;;  %v5510_v47 = vld [vmem:[%s5392_s26 + $0xa0] sm:$0x3]  ;;  %v403_v50 = vrot.slane %v5507_v46, 1 }
  0x1c   : > { %454 = vrot.lane.b32.xlu0 %v376_v20, %s5329_s27  ;;  %9496 = vst [vmem:[#allocation6_spill] sm:$0xff] %v5498_v41  ;;  %9497 = vst [vmem:[#allocation7_spill] sm:$0xff] %v5503_v44  ;;  %v5520_v49 = vsel %vm371_vm0, %v398_v42, %v400_v43  ;;  %v405_v51 = vrot.slane %v5510_v47, 1  ;;  %v402_v53 = vrot.slane %v5513_v48, 1  ;;  %v5529_v54 = vld [vmem:[%s5392_s26 + $0xb0] sm:$0xff]  ;;  %v5535_v56 = vld [vmem:[%s5392_s26 + $0xa8] sm:$0xff] }
  0x1d   : > { %9498 = vst [vmem:[#allocation8_spill] sm:$0xff] %v5520_v49  ;;  %v5525_v52 = vsel %vm371_vm0, %v397_v45, %v398_v42  ;;  %v5532_v55 = vld [vmem:[%s5392_s26 + $0xb8] sm:$0x3]  ;;  %v408_v58 = vrot.slane %v5529_v54, 1  ;;  %v407_v61 = vrot.slane %v5535_v56, 1  ;;  %v5551_v62 = vld [vmem:[%s5392_s26 + $0xc8] sm:$0xff] }
  0x1e   : > { %9499 = vst [vmem:[#allocation9_spill] sm:$0xff] %v5525_v52  ;;  %v5542_v57 = vsel %vm371_vm0, %v403_v50, %v405_v51  ;;  %v410_v59 = vrot.slane %v5532_v55, 1  ;;  %v5547_v60 = vsel %vm371_vm0, %v402_v53, %v403_v50  ;;  %v5554_v63 = vld [vmem:[%s5392_s26 + $0xd0] sm:$0x3]  ;;  %v5557_v3 = vld [vmem:[%s5392_s26 + $0xc0] sm:$0xff]  ;;  %v413_v6 = vrot.slane %v5551_v62, 1 }
  0x1f   : > { %462 = vrot.lane.b32.xlu1 %v5454_v25, %s5329_s27  ;;  %9500 = vst [vmem:[#allocation10_spill] sm:$0xff] %v5542_v57  ;;  %9501 = vst [vmem:[#allocation11_spill] sm:$0xff] %v5547_v60  ;;  %v415_v8 = vrot.slane %v5554_v63, 1  ;;  %v5569_v9 = vsel %vm371_vm0, %v407_v61, %v408_v58  ;;  %v412_v13 = vrot.slane %v5557_v3, 1  ;;  %v5573_v16 = vld [vmem:[%s5392_s26 + $0xe0] sm:$0xff]  ;;  %v5579_v19 = vld [vmem:[%s5392_s26 + $0xd8] sm:$0xff] }
  0x20   : > { %460 = vrot.lane.b32.xlu0 %v5459_v28, %s5329_s27  ;;  %v5564_v4 = vsel %vm371_vm0, %v408_v58, %v410_v59  ;;  %9503 = vst [vmem:[#allocation13_spill] sm:$0xff] %v5569_v9  ;;  %9504 = vst [vmem:[#allocation14_spill] sm:$0xff] %v5573_v16  ;;  %v5576_v18 = vld [vmem:[%s5392_s26 + $0xe8] sm:$0x3]  ;;  %v418_v21 = vrot.slane %v5573_v16, 1  ;;  %v417_v29 = vrot.slane %v5579_v19, 1 }
  0x21   : > { %9502 = vst [vmem:[#allocation12_spill] sm:$0xff] %v5564_v4  ;;  %9505 = vst [vmem:[#allocation15_spill] sm:$0xff] %v5579_v19  ;;  %v5586_v20 = vsel %vm371_vm0, %v413_v6, %v415_v8  ;;  %v420_v26 = vrot.slane %v5576_v18, 1  ;;  %v5591_v27 = vsel %vm371_vm0, %v412_v13, %v413_v6  ;;  %v5595_v34 = vld [vmem:[%s5392_s26 + $0xf8] sm:$0xff]  ;;  %v5598_v35 = vld [vmem:[%s5392_s26 + $0x100] sm:$0x3] }
  0x22   : > { %9506 = vst [vmem:[#allocation16_spill] sm:$0xff] %v5586_v20  ;;  %9507 = vst [vmem:[#allocation17_spill] sm:$0xff] %v5591_v27  ;;  %v5601_v37 = vld [vmem:[%s5392_s26 + $0xf0] sm:$0xff]  ;;  %v423_v43 = vrot.slane %v5595_v34, 1  ;;  %v425_v45 = vrot.slane %v5598_v35, 1  ;;  %v5613_v50 = vsel %vm371_vm0, %v417_v29, %v418_v21  ;;  %v5623_v59 = vld [vmem:[%s5392_s26 + $0x108] sm:$0xff] }
  0x23   : > { %466 = vrot.lane.b32.xlu1 %v5476_v33, %s5329_s27  ;;  %9508 = vst [vmem:[#allocation18_spill] sm:$0xff] %v5595_v34  ;;  %9509 = vst [vmem:[#allocation19_spill] sm:$0xff] %v5601_v37  ;;  %v5608_v42 = vsel %vm371_vm0, %v418_v21, %v420_v26  ;;  %v422_v51 = vrot.slane %v5601_v37, 1  ;;  %v5617_v53 = vld [vmem:[%s5392_s26 + $0x110] sm:$0xff]  ;;  %v5620_v58 = vld [vmem:[%s5392_s26 + $0x118] sm:$0x3] }
  0x24   : > { %464 = vrot.lane.b32.xlu0 %v5481_v36, %s5329_s27  ;;  %9510 = vst [vmem:[#allocation20_spill] sm:$0xff] %v5608_v42  ;;  %9511 = vst [vmem:[#allocation21_spill] sm:$0xff] %v5613_v50  ;;  %v5630_v61 = vsel %vm371_vm0, %v423_v43, %v425_v45  ;;  %v428_v6 = vrot.slane %v5617_v53, 1  ;;  %v430_v8 = vrot.slane %v5620_v58, 1  ;;  %v427_v21 = vrot.slane %v5623_v59, 1  ;;  %v5639_v26 = vld [vmem:[%s5392_s26 + $0x128] sm:$0xff] }
  0x25   : > { %9512 = vst [vmem:[#allocation22_spill] sm:$0xff] %v5617_v53  ;;  %9513 = vst [vmem:[#allocation23_spill] sm:$0xff] %v5623_v59  ;;  %v5635_v13 = vsel %vm371_vm0, %v422_v51, %v423_v43  ;;  %v5642_v29 = vld [vmem:[%s5392_s26 + $0x130] sm:$0x3]  ;;  %v433_v43 = vrot.slane %v5639_v26, 1  ;;  %s5340_s24 = smov 56  }
  0x26   : > { %9514 = vst [vmem:[#allocation24_spill] sm:$0xff] %v5630_v61  ;;  %9515 = vst [vmem:[#allocation25_spill] sm:$0xff] %v5635_v13  ;;  %v5652_v45 = vsel %vm371_vm0, %v428_v6, %v430_v8  ;;  %v435_v51 = vrot.slane %v5642_v29, 1  ;;  %s5341_s25 = smov 64  }
  0x27   : > { %470 = vrot.lane.b32.xlu1 %v5498_v41, %s5329_s27  ;;  %9516 = vst [vmem:[#allocation26_spill] sm:$0xff] %v5639_v26  ;;  %9518 = vst [vmem:[#allocation28_spill] sm:$0xff] %v5652_v45 }
  0x28   : > { %468 = vrot.lane.b32.xlu0 %v5503_v44, %s5329_s27  ;;  %v5674_v8 = vsel %vm371_vm0, %v433_v43, %v435_v51  ;;  %v5708_v44 = vld [vmem:[%s5392_s26 + $0x178] sm:$0x3] }
  0x29   : > { %9520 = vst [vmem:[#allocation30_spill] sm:$0xff] %v5674_v8 }
  0x2b   : > { %474 = vrot.lane.b32.xlu1 %v5520_v49, %s5329_s27  ;;  %v5705_v49 = vld [vmem:[%s5392_s26 + $0x170] sm:$0xff] }
  0x2c   : > { %472 = vrot.lane.b32.xlu0 %v5525_v52, %s5329_s27 }
  0x2f   : > { %478 = vrot.lane.b32.xlu1 %v5542_v57, %s5329_s27 }
  0x30   : > { %476 = vrot.lane.b32.xlu0 %v5547_v60, %s5329_s27  ;;  %v5683_v60 = vld [vmem:[%s5392_s26 + $0x158] sm:$0xff] }
  0x33   : > { %482 = vrot.lane.b32.xlu1 %v5564_v4, %s5329_s27 }
  0x34   : > { %480 = vrot.lane.b32.xlu0 %v5569_v9, %s5329_s27 }
  0x37   : > { %486 = vrot.lane.b32.xlu1 %v5586_v20, %s5329_s27  ;;  %v5661_v20 = vld [vmem:[%s5392_s26 + $0x140] sm:$0xff] }
  0x38   : > { %484 = vrot.lane.b32.xlu0 %v5591_v27, %s5329_s27 }
  0x3b   : > { %490 = vrot.lane.b32.xlu1 %v5608_v42, %s5329_s27  ;;  %v5657_v42 = vsel %vm371_vm0, %v427_v21, %v428_v6  ;;  %v438_v6 = vrot.slane %v5661_v20, 1 }
  0x3c   : > { %488 = vrot.lane.b32.xlu0 %v5613_v50, %s5329_s27  ;;  %v5645_v50 = vld [vmem:[%s5392_s26 + $0x120] sm:$0xff]  ;;  %9519 = vst [vmem:[#allocation29_spill] sm:$0xff] %v5657_v42 }
  0x3d   : > { %9517 = vst [vmem:[#allocation27_spill] sm:$0xff] %v5645_v50  ;;  %v432_v27 = vrot.slane %v5645_v50, 1 }
  0x3f   : > { %494 = vrot.lane.b32.xlu1 %v5630_v61, %s5329_s27  ;;  %v5664_v61 = vld [vmem:[%s5392_s26 + $0x148] sm:$0x3]  ;;  %v5679_v9 = vsel %vm371_vm0, %v432_v27, %v433_v43  ;;  %v443_v27 = vrot.slane %v5683_v60, 1 }
  0x40   : > { %492 = vrot.lane.b32.xlu0 %v5635_v13, %s5329_s27  ;;  %v5667_v13 = vld [vmem:[%s5392_s26 + $0x138] sm:$0xff]  ;;  %v440_v21 = vrot.slane %v5664_v61, 1  ;;  %9521 = vst [vmem:[#allocation31_spill] sm:$0xff] %v5679_v9 }
  0x41   : > { %v437_v4 = vrot.slane %v5667_v13, 1 }
  0x42   : > { %v5696_v51 = vsel %vm371_vm0, %v438_v6, %v440_v21 }
  0x43   : > { %498 = vrot.lane.b32.xlu1 %v5652_v45, %s5329_s27  ;;  %v5686_v45 = vld [vmem:[%s5392_s26 + $0x160] sm:$0x3]  ;;  %9522 = vst [vmem:[#allocation32_spill] sm:$0xff] %v5696_v51  ;;  %v5701_v57 = vsel %vm371_vm0, %v437_v4, %v438_v6  ;;  %v448_v4 = vrot.slane %v5705_v49, 1  ;;  %v450_v6 = vrot.slane %v5708_v44, 1 }
  0x44   : > { %496 = vrot.lane.b32.xlu0 %v5657_v42, %s5329_s27  ;;  %v5689_v42 = vld [vmem:[%s5392_s26 + $0x150] sm:$0xff]  ;;  %v445_v43 = vrot.slane %v5686_v45, 1  ;;  %9523 = vst [vmem:[#allocation33_spill] sm:$0xff] %v5701_v57 }
  0x45   : > { %v442_v52 = vrot.slane %v5689_v42, 1 }
  0x46   : > { %v5718_v21 = vsel %vm371_vm0, %v443_v27, %v445_v43  ;;  %v550_v43 = vrot.slane %v5406_v5, 2  ;;  %v557_v5 = vrot.slane %v5410_v7, 2  ;;  %v559_v7 = vrot.slane %v5428_v15, 2 }
  0x47   : > { %502 = vrot.lane.b32.xlu1 %v5674_v8, %s5329_s27  ;;  %v5711_v8 = vld [vmem:[%s5392_s26 + $0x168] sm:$0xff]  ;;  %9524 = vst [vmem:[#allocation34_spill] sm:$0xff] %v5718_v21 }
  0x48   : > { %500 = vrot.lane.b32.xlu0 %v5679_v9, %s5329_s27  ;;  %v5723_v9 = vsel %vm371_vm0, %v442_v52, %v443_v27  ;;  %v447_v41 = vrot.slane %v5711_v8, 1  ;;  %v549_v52 = vrot.slane %v5401_v2, 2 }
  0x49   : > { %9525 = vst [vmem:[#allocation35_spill] sm:$0xff] %v5723_v9 }
  0x4a   : > { %v5736_v36 = vsel %vm371_vm0, %v447_v41, %v448_v4  ;;  %v554_v41 = vrot.slane %v5395_v0, 2 }
  0x4b   : > { %506 = vrot.lane.b32.xlu1 %v5696_v51, %s5329_s27  ;;  %v552_v51 = vrot.slane %v5415_v10, 2  ;;  %9527 = vst [vmem:[#allocation37_spill] sm:$0xff] %v5736_v36  ;;  %v551_v10 = vsel %vm548_vm1, %v549_v52, %v550_v43  ;;  %v565_v52 = vrot.slane %v5442_v22, 2 }
  0x4c   : > { %504 = vrot.lane.b32.xlu0 %v5701_v57, %s5329_s27  ;;  %v5731_v57 = vsel %vm371_vm0, %v448_v4, %v450_v6  ;;  %v555_v6 = vrot.slane %v5398_v1, 2  ;;  %v560_v4 = vrot.slane %v5418_v11, 2 }
  0x4d   : > { %9526 = vst [vmem:[#allocation36_spill] sm:$0xff] %v5731_v57  ;;  %v553_v27 = vsel %vm548_vm1, %v550_v43, %v552_v51  ;;  %v562_v51 = vrot.slane %v5425_v14, 2 }
  0x4e   : > { %v5751_v2 = vsel %vm548_vm1, %v555_v6, %v557_v5  ;;  %v5769_v14 = vsel %vm548_vm1, %v559_v7, %v560_v4  ;;  %v575_v7 = vrot.slane %v5485_v38, 2 }
  0x4f   : > { %510 = vrot.lane.b32.xlu1 %v5718_v21, %s5329_s27  ;;  %v5764_v43 = vsel %vm548_vm1, %v560_v4, %v562_v51  ;;  %v569_v4 = vrot.slane %v5469_v32, 2 }
  0x50   : > { %508 = vrot.lane.b32.xlu0 %v5723_v9, %s5329_s27 }
  0x53   : > { %514 = vrot.lane.b32.xlu1 %v5731_v57, %s5329_s27 }
  0x54   : > { %512 = vrot.lane.b32.xlu0 %v5736_v36, %s5329_s27  ;;  %v5756_v36 = vsel %vm548_vm1, %v554_v41, %v555_v6  ;;  %v564_v6 = vrot.slane %v5448_v24, 2  ;;  %v572_v41 = vrot.slane %v5466_v31, 2  ;;  %s5035_s27 = sshll.u32 %s10175_s22, 4 }
  0x57   : > { %631 = vrot.lane.b32.xlu1 %v553_v27, %s5330_s28  ;;  %v567_v27 = vrot.slane %v5445_v23, 2  ;;  %v5782_v23 = vsel %vm548_vm1, %v564_v6, %v565_v52 }
  0x58   : > { %629 = vrot.lane.b32.xlu0 %v551_v10, %s5330_s28  ;;  %v570_v10 = vrot.slane %v5463_v30, 2  ;;  %9528 = vst [vmem:[#allocation38_spill] sm:$0xff] %v5782_v23 }
  0x59   : > { %v5777_v5 = vsel %vm548_vm1, %v565_v52, %v567_v27  ;;  %v577_v27 = vrot.slane %v5488_v39, 2  ;;  %v574_v52 = vrot.slane %v5491_v40, 2 }
  0x5a   : > { %v5790_v51 = vsel %vm548_vm1, %v570_v10, %v572_v41  ;;  %v5795_v31 = vsel %vm548_vm1, %v569_v4, %v570_v10  ;;  %v580_v41 = vrot.slane %v5507_v46, 2  ;;  %v579_v10 = vrot.slane %v5513_v48, 2 }
  0x5b   : > { %635 = vrot.lane.b32.xlu1 %v5751_v2, %s5330_s28  ;;  %9529 = vst [vmem:[#allocation39_spill] sm:$0xff] %v5795_v31  ;;  %v5803_v6 = vsel %vm548_vm1, %v575_v7, %v577_v27  ;;  %v5808_v39 = vsel %vm548_vm1, %v574_v52, %v575_v7  ;;  %v585_v27 = vrot.slane %v5529_v54, 2  ;;  %v584_v7 = vrot.slane %v5535_v56, 2 }
  0x5c   : > { %633 = vrot.lane.b32.xlu0 %v5756_v36, %s5330_s28  ;;  %9530 = vst [vmem:[#allocation40_spill] sm:$0xff] %v5808_v39 }
  0x5f   : > { %639 = vrot.lane.b32.xlu1 %v5764_v43, %s5330_s28 }
  0x60   : > { %637 = vrot.lane.b32.xlu0 %v5769_v14, %s5330_s28 }
  0x63   : > { %643 = vrot.lane.b32.xlu1 %v5777_v5, %s5330_s28 }
  0x64   : > { %641 = vrot.lane.b32.xlu0 %v5782_v23, %s5330_s28  ;;  %v582_v23 = vrot.slane %v5510_v47, 2  ;;  %v5821_v47 = vsel %vm548_vm1, %v579_v10, %v580_v41 }
  0x65   : > { %9531 = vst [vmem:[#allocation41_spill] sm:$0xff] %v5821_v47 }
  0x66   : > { %v5816_v4 = vsel %vm548_vm1, %v580_v41, %v582_v23  ;;  %v590_v23 = vrot.slane %v5551_v62, 2  ;;  %v589_v41 = vrot.slane %v5557_v3, 2 }
  0x67   : > { %647 = vrot.lane.b32.xlu1 %v5790_v51, %s5330_s28 }
  0x68   : > { %645 = vrot.lane.b32.xlu0 %v5795_v31, %s5330_s28  ;;  %v587_v31 = vrot.slane %v5532_v55, 2  ;;  %v5834_v55 = vsel %vm548_vm1, %v584_v7, %v585_v27 }
  0x69   : > { %9532 = vst [vmem:[#allocation42_spill] sm:$0xff] %v5834_v55 }
  0x6a   : > { %v5829_v52 = vsel %vm548_vm1, %v585_v27, %v587_v31  ;;  %v595_v31 = vrot.slane %v5573_v16, 2  ;;  %v594_v27 = vrot.slane %v5579_v19, 2 }
  0x6b   : > { %651 = vrot.lane.b32.xlu1 %v5803_v6, %s5330_s28 }
  0x6c   : > { %649 = vrot.lane.b32.xlu0 %v5808_v39, %s5330_s28  ;;  %v592_v39 = vrot.slane %v5554_v63, 2  ;;  %v5847_v63 = vsel %vm548_vm1, %v589_v41, %v590_v23 }
  0x6d   : > { %9533 = vst [vmem:[#allocation43_spill] sm:$0xff] %v5847_v63 }
  0x6e   : > { %v5842_v10 = vsel %vm548_vm1, %v590_v23, %v592_v39  ;;  %v600_v39 = vrot.slane %v5595_v34, 2  ;;  %v599_v23 = vrot.slane %v5601_v37, 2 }
  0x6f   : > { %655 = vrot.lane.b32.xlu1 %v5816_v4, %s5330_s28 }
  0x70   : > { %653 = vrot.lane.b32.xlu0 %v5821_v47, %s5330_s28  ;;  %v597_v47 = vrot.slane %v5576_v18, 2  ;;  %v5860_v18 = vsel %vm548_vm1, %v594_v27, %v595_v31 }
  0x71   : > { %9534 = vst [vmem:[#allocation44_spill] sm:$0xff] %v5860_v18 }
  0x72   : > { %v5855_v7 = vsel %vm548_vm1, %v595_v31, %v597_v47  ;;  %v605_v47 = vrot.slane %v5617_v53, 2  ;;  %v604_v31 = vrot.slane %v5623_v59, 2 }
  0x73   : > { %659 = vrot.lane.b32.xlu1 %v5829_v52, %s5330_s28 }
  0x74   : > { %657 = vrot.lane.b32.xlu0 %v5834_v55, %s5330_s28  ;;  %v602_v55 = vrot.slane %v5598_v35, 2  ;;  %v5873_v35 = vsel %vm548_vm1, %v599_v23, %v600_v39 }
  0x75   : > { %9536 = vst [vmem:[#allocation46_spill] sm:$0xff] %v5873_v35 }
  0x76   : > { %v5868_v41 = vsel %vm548_vm1, %v600_v39, %v602_v55  ;;  %v610_v55 = vrot.slane %v5639_v26, 2  ;;  %v609_v39 = vrot.slane %v5645_v50, 2 }
  0x77   : > { %663 = vrot.lane.b32.xlu1 %v5842_v10, %s5330_s28  ;;  %9535 = vst [vmem:[#allocation45_spill] sm:$0xff] %v5868_v41 }
  0x78   : > { %661 = vrot.lane.b32.xlu0 %v5847_v63, %s5330_s28  ;;  %v607_v63 = vrot.slane %v5620_v58, 2  ;;  %v5886_v58 = vsel %vm548_vm1, %v604_v31, %v605_v47 }
  0x79   : > { %9538 = vst [vmem:[#allocation48_spill] sm:$0xff] %v5886_v58 }
  0x7a   : > { %v5881_v27 = vsel %vm548_vm1, %v605_v47, %v607_v63  ;;  %v615_v63 = vrot.slane %v5661_v20, 2  ;;  %v614_v47 = vrot.slane %v5667_v13, 2 }
  0x7b   : > { %667 = vrot.lane.b32.xlu1 %v5855_v7, %s5330_s28  ;;  %9537 = vst [vmem:[#allocation47_spill] sm:$0xff] %v5881_v27 }
  0x7c   : > { %665 = vrot.lane.b32.xlu0 %v5860_v18, %s5330_s28  ;;  %v612_v18 = vrot.slane %v5642_v29, 2  ;;  %v5899_v29 = vsel %vm548_vm1, %v609_v39, %v610_v55 }
  0x7d   : > { %9539 = vst [vmem:[#allocation49_spill] sm:$0xff] %v5899_v29 }
  0x7e   : > { %v5894_v23 = vsel %vm548_vm1, %v610_v55, %v612_v18  ;;  %v620_v18 = vrot.slane %v5683_v60, 2  ;;  %v619_v55 = vrot.slane %v5689_v42, 2 }
  0x7f   : > { %671 = vrot.lane.b32.xlu1 %v5868_v41, %s5330_s28 }
  0x80   : > { %669 = vrot.lane.b32.xlu0 %v5873_v35, %s5330_s28  ;;  %v617_v35 = vrot.slane %v5664_v61, 2  ;;  %v5914_v61 = vsel %vm548_vm1, %v614_v47, %v615_v63  ;;  %v624_v47 = vrot.slane %v5711_v8, 2 }
  0x81   : > { %9541 = vst [vmem:[#allocation51_spill] sm:$0xff] %v5914_v61 }
  0x82   : > { %v5907_v31 = vsel %vm548_vm1, %v615_v63, %v617_v35  ;;  %v5931_v63 = vsel %vm548_vm1, %v619_v55, %v620_v18 }
  0x83   : > { %675 = vrot.lane.b32.xlu1 %v5881_v27, %s5330_s28 }
  0x84   : > { %673 = vrot.lane.b32.xlu0 %v5886_v58, %s5330_s28  ;;  %v622_v58 = vrot.slane %v5686_v45, 2  ;;  %v625_v45 = vrot.slane %v5705_v49, 2 }
  0x86   : > { %v5924_v35 = vsel %vm548_vm1, %v620_v18, %v622_v58 }
  0x87   : > { %679 = vrot.lane.b32.xlu1 %v5894_v23, %s5330_s28 }
  0x88   : > { %677 = vrot.lane.b32.xlu0 %v5899_v29, %s5330_s28 }
  0x89   : > { %v5911_v27 = vpop.permute.xlu1 %456 }
  0x8a   : > { %9540 = vst [vmem:[#allocation50_spill] sm:$0xff] %v5911_v27  ;;  %v5917_v39 = vpop.permute.xlu0 %452  ;;  %v627_v27 = vrot.slane %v5708_v44, 2  ;;  %v5946_v44 = vsel %vm548_vm1, %v624_v47, %v625_v45 }
  0x8b   : > { %9542 = vst [vmem:[#allocation52_spill] sm:$0xff] %v5917_v39  ;;  %683 = vrot.lane.b32.xlu1 %v5907_v31, %s5330_s28 }
  0x8c   : > { %681 = vrot.lane.b32.xlu0 %v5914_v61, %s5330_s28  ;;  %v5941_v58 = vsel %vm548_vm1, %v625_v45, %v627_v27 }
  0x8d   : > { %v5928_v29 = vpop.permute.xlu1 %458 }
  0x8e   : > { %9543 = vst [vmem:[#allocation53_spill] sm:$0xff] %v5928_v29  ;;  %v5934_v39 = vpop.permute.xlu0 %454 }
  0x8f   : > { %9544 = vst [vmem:[#allocation54_spill] sm:$0xff] %v5934_v39  ;;  %687 = vrot.lane.b32.xlu1 %v5924_v35, %s5330_s28 }
  0x90   : > { %685 = vrot.lane.b32.xlu0 %v5931_v63, %s5330_s28 }
  0x91   : > { %v5943_v61 = vpop.permute.xlu1 %462 }
  0x92   : > { %9545 = vst [vmem:[#allocation55_spill] sm:$0xff] %v5943_v61  ;;  %v5948_v18 = vpop.permute.xlu0 %460 }
  0x93   : > { %9546 = vst [vmem:[#allocation56_spill] sm:$0xff] %v5948_v18  ;;  %691 = vrot.lane.b32.xlu1 %v5941_v58, %s5330_s28 }
  0x94   : > { %689 = vrot.lane.b32.xlu0 %v5946_v44, %s5330_s28 }
  0x95   : > { %v5954_v55 = vpop.permute.xlu1 %466 }
  0x96   : > { %9547 = vst [vmem:[#allocation57_spill] sm:$0xff] %v5954_v55  ;;  %v5956_v29 = vpop.permute.xlu0 %464 }
  0x97   : > { %9548 = vst [vmem:[#allocation58_spill] sm:$0xff] %v5956_v29  ;;  %729 = vrot.lane.b32.xlu1 %v5398_v1, %s5331_s29 }
  0x98   : > { %727 = vrot.lane.b32.xlu0 %v5395_v0, %s5331_s29 }
  0x99   : > { %v5962_v27 = vpop.permute.xlu1 %470 }
  0x9a   : > { %9549 = vst [vmem:[#allocation59_spill] sm:$0xff] %v5962_v27  ;;  %v5964_v45 = vpop.permute.xlu0 %468 }
  0x9b   : > { %9550 = vst [vmem:[#allocation60_spill] sm:$0xff] %v5964_v45  ;;  %733 = vrot.lane.b32.xlu1 %v5418_v11, %s5331_s29 }
  0x9c   : > { %731 = vrot.lane.b32.xlu0 %v5428_v15, %s5331_s29 }
  0x9d   : > { %v5970_v47 = vpop.permute.xlu1 %474 }
  0x9e   : > { %9551 = vst [vmem:[#allocation61_spill] sm:$0xff] %v5970_v47  ;;  %v5972_v29 = vpop.permute.xlu0 %472 }
  0x9f   : > { %9552 = vst [vmem:[#allocation62_spill] sm:$0xff] %v5972_v29  ;;  %737 = vrot.lane.b32.xlu1 %v5442_v22, %s5331_s29 }
  0xa0   : > { %735 = vrot.lane.b32.xlu0 %v5448_v24, %s5331_s29 }
  0xa1   : > { %v5978_v0 = vpop.permute.xlu1 %478 }
  0xa2   : > { %9553 = vst [vmem:[#allocation63_spill] sm:$0xff] %v5978_v0  ;;  %v5980_v1 = vpop.permute.xlu0 %476 }
  0xa3   : > { %9554 = vst [vmem:[#allocation64_spill] sm:$0xff] %v5980_v1  ;;  %741 = vrot.lane.b32.xlu1 %v5463_v30, %s5331_s29 }
  0xa4   : > { %739 = vrot.lane.b32.xlu0 %v5469_v32, %s5331_s29 }
  0xa5   : > { %v5986_v45 = vpop.permute.xlu1 %482 }
  0xa6   : > { %9555 = vst [vmem:[#allocation65_spill] sm:$0xff] %v5986_v45  ;;  %v5988_v47 = vpop.permute.xlu0 %480 }
  0xa7   : > { %9556 = vst [vmem:[#allocation66_spill] sm:$0xff] %v5988_v47  ;;  %745 = vrot.lane.b32.xlu1 %v5485_v38, %s5331_s29 }
  0xa8   : > { %743 = vrot.lane.b32.xlu0 %v5491_v40, %s5331_s29 }
  0xa9   : > { %v5994_v29 = vpop.permute.xlu1 %486 }
  0xaa   : > { %9557 = vst [vmem:[#allocation67_spill] sm:$0xff] %v5994_v29  ;;  %v5996_v0 = vpop.permute.xlu0 %484 }
  0xab   : > { %9558 = vst [vmem:[#allocation68_spill] sm:$0xff] %v5996_v0  ;;  %749 = vrot.lane.b32.xlu1 %v5507_v46, %s5331_s29 }
  0xac   : > { %747 = vrot.lane.b32.xlu0 %v5513_v48, %s5331_s29 }
  0xad   : > { %v6002_v1 = vpop.permute.xlu1 %490 }
  0xae   : > { %9559 = vst [vmem:[#allocation69_spill] sm:$0xff] %v6002_v1  ;;  %v6004_v45 = vpop.permute.xlu0 %488 }
  0xaf   : > { %9560 = vst [vmem:[#allocation70_spill] sm:$0xff] %v6004_v45  ;;  %753 = vrot.lane.b32.xlu1 %v5529_v54, %s5331_s29 }
  0xb0   : > { %751 = vrot.lane.b32.xlu0 %v5535_v56, %s5331_s29 }
  0xb1   : > { %v6010_v47 = vpop.permute.xlu1 %494 }
  0xb2   : > { %9561 = vst [vmem:[#allocation71_spill] sm:$0xff] %v6010_v47  ;;  %v6012_v29 = vpop.permute.xlu0 %492 }
  0xb3   : > { %9562 = vst [vmem:[#allocation72_spill] sm:$0xff] %v6012_v29  ;;  %757 = vrot.lane.b32.xlu1 %v5551_v62, %s5331_s29 }
  0xb4   : > { %755 = vrot.lane.b32.xlu0 %v5557_v3, %s5331_s29 }
  0xb5   : > { %v6018_v0 = vpop.permute.xlu1 %498 }
  0xb6   : > { %9563 = vst [vmem:[#allocation73_spill] sm:$0xff] %v6018_v0  ;;  %v6020_v1 = vpop.permute.xlu0 %496 }
  0xb7   : > { %9564 = vst [vmem:[#allocation74_spill] sm:$0xff] %v6020_v1  ;;  %761 = vrot.lane.b32.xlu1 %v5573_v16, %s5331_s29 }
  0xb8   : > { %759 = vrot.lane.b32.xlu0 %v5579_v19, %s5331_s29 }
  0xb9   : > { %v6026_v45 = vpop.permute.xlu1 %502 }
  0xba   : > { %9565 = vst [vmem:[#allocation75_spill] sm:$0xff] %v6026_v45  ;;  %v6028_v47 = vpop.permute.xlu0 %500 }
  0xbb   : > { %9566 = vst [vmem:[#allocation76_spill] sm:$0xff] %v6028_v47  ;;  %765 = vrot.lane.b32.xlu1 %v5595_v34, %s5331_s29 }
  0xbc   : > { %763 = vrot.lane.b32.xlu0 %v5601_v37, %s5331_s29  ;;  %v6195_v37 = vld [vmem:[%s5392_s26 + $0x190] sm:$0x3] }
  0xbd   : > { %v6034_v29 = vpop.permute.xlu1 %506 }
  0xbe   : > { %v6036_v0 = vpop.permute.xlu0 %504 }
  0xbf   : > { %769 = vrot.lane.b32.xlu1 %v5617_v53, %s5331_s29  ;;  %v9612_v53 = vld [vmem:[#allocation32_spill] sm:$0xff] }
  0xc0   : > { %767 = vrot.lane.b32.xlu0 %v5623_v59, %s5331_s29 }
  0xc1   : > { %v6042_v1 = vpop.permute.xlu1 %510 }
  0xc2   : > { %v6044_v47 = vpop.permute.xlu0 %508 }
  0xc3   : > { %773 = vrot.lane.b32.xlu1 %v5639_v26, %s5331_s29 }
  0xc4   : > { %771 = vrot.lane.b32.xlu0 %v5645_v50, %s5331_s29  ;;  %v6075_v50 = vld [vmem:[%s5392_s26 + $0x188] sm:$0xff] }
  0xc5   : > { %v6050_v45 = vpop.permute.xlu1 %514 }
  0xc6   : > { %v6052_v27 = vpop.permute.xlu0 %512 }
  0xc7   : > { %777 = vrot.lane.b32.xlu1 %v5661_v20, %s5331_s29 }
  0xc8   : > { %775 = vrot.lane.b32.xlu0 %v5667_v13, %s5331_s29 }
  0xc9   : > { %v6058_v55 = vpop.permute.xlu1 %631 }
  0xca   : > { %9567 = vst [vmem:[#allocation77_spill] sm:$0xff] %v6058_v55  ;;  %v6060_v18 = vpop.permute.xlu0 %629 }
  0xcb   : > { %9568 = vst [vmem:[#allocation78_spill] sm:$0xff] %v6060_v18  ;;  %781 = vrot.lane.b32.xlu1 %v5683_v60, %s5331_s29  ;;  %v6080_v18 = vld [vmem:[%s5392_s26 + $0x180] sm:$0xff] }
  0xcc   : > { %779 = vrot.lane.b32.xlu0 %v5689_v42, %s5331_s29 }
  0xcd   : > { %v6066_v61 = vpop.permute.xlu1 %635 }
  0xce   : > { %9569 = vst [vmem:[#allocation79_spill] sm:$0xff] %v6066_v61  ;;  %v6068_v39 = vpop.permute.xlu0 %633 }
  0xcf   : > { %9570 = vst [vmem:[#allocation80_spill] sm:$0xff] %v6068_v39  ;;  %785 = vrot.lane.b32.xlu1 %v5705_v49, %s5331_s29 }
  0xd0   : > { %783 = vrot.lane.b32.xlu0 %v5711_v8, %s5331_s29 }
  0xd1   : > { %v6077_v55 = vpop.permute.xlu1 %639 }
  0xd2   : > { %9571 = vst [vmem:[#allocation81_spill] sm:$0xff] %v6077_v55  ;;  %v6082_v26 = vpop.permute.xlu0 %637 }
  0xd3   : > { %9572 = vst [vmem:[#allocation82_spill] sm:$0xff] %v6082_v26  ;;  %789 = vrot.lane.b32.xlu1 %v6075_v50, %s5331_s29 }
  0xd4   : > { %787 = vrot.lane.b32.xlu0 %v6080_v18, %s5331_s29 }
  0xd5   : > { %v6088_v39 = vpop.permute.xlu1 %643 }
  0xd6   : > { %9573 = vst [vmem:[#allocation83_spill] sm:$0xff] %v6088_v39  ;;  %v6090_v61 = vpop.permute.xlu0 %641 }
  0xd7   : > { %9574 = vst [vmem:[#allocation84_spill] sm:$0xff] %v6090_v61  ;;  %831 = vrot.lane.b32.xlu1 %v5435_v17, %s5332_s30  ;;  %v9579_v17 = vld [vmem:[#allocation5_spill] sm:$0xff] }
  0xd8   : > { %829 = vrot.lane.b32.xlu0 %v5421_v12, %s5332_s30 }
  0xd9   : > { %v6096_v55 = vpop.permute.xlu1 %647 }
  0xda   : > { %9575 = vst [vmem:[#allocation85_spill] sm:$0xff] %v6096_v55  ;;  %v6098_v26 = vpop.permute.xlu0 %645 }
  0xdb   : > { %9576 = vst [vmem:[#allocation86_spill] sm:$0xff] %v6098_v26  ;;  %835 = vrot.lane.b32.xlu1 %v5454_v25, %s5332_s30  ;;  %v9582_v26 = vld [vmem:[#allocation6_spill] sm:$0xff]  ;;  %v9583_v25 = vld [vmem:[#allocation7_spill] sm:$0xff] }
  0xdc   : > { %833 = vrot.lane.b32.xlu0 %v5459_v28, %s5332_s30 }
  0xdd   : > { %v6104_v39 = vpop.permute.xlu1 %651 }
  0xde   : > { %9577 = vst [vmem:[#allocation87_spill] sm:$0xff] %v6104_v39  ;;  %v6106_v61 = vpop.permute.xlu0 %649 }
  0xdf   : > { %9578 = vst [vmem:[#allocation88_spill] sm:$0xff] %v6106_v61  ;;  %839 = vrot.lane.b32.xlu1 %v5476_v33, %s5332_s30  ;;  %v9586_v61 = vld [vmem:[#allocation8_spill] sm:$0xff]  ;;  %v9587_v33 = vld [vmem:[#allocation9_spill] sm:$0xff] }
  0xe0   : > { %837 = vrot.lane.b32.xlu0 %v9579_v17, %s5332_s30 }
  0xe1   : > { %v6112_v12 = vpop.permute.xlu1 %655 }
  0xe2   : > { %9580 = vst [vmem:[#allocation89_spill] sm:$0xff] %v6112_v12  ;;  %v6114_v55 = vpop.permute.xlu0 %653 }
  0xe3   : > { %9581 = vst [vmem:[#allocation90_spill] sm:$0xff] %v6114_v55  ;;  %843 = vrot.lane.b32.xlu1 %v9582_v26, %s5332_s30  ;;  %v9590_v55 = vld [vmem:[#allocation10_spill] sm:$0xff]  ;;  %v9591_v26 = vld [vmem:[#allocation11_spill] sm:$0xff] }
  0xe4   : > { %841 = vrot.lane.b32.xlu0 %v9583_v25, %s5332_s30 }
  0xe5   : > { %v6120_v28 = vpop.permute.xlu1 %659 }
  0xe6   : > { %9584 = vst [vmem:[#allocation91_spill] sm:$0xff] %v6120_v28  ;;  %v6122_v39 = vpop.permute.xlu0 %657 }
  0xe7   : > { %9585 = vst [vmem:[#allocation92_spill] sm:$0xff] %v6122_v39  ;;  %847 = vrot.lane.b32.xlu1 %v9586_v61, %s5332_s30  ;;  %v9594_v39 = vld [vmem:[#allocation12_spill] sm:$0xff]  ;;  %v9595_v61 = vld [vmem:[#allocation13_spill] sm:$0xff] }
  0xe8   : > { %845 = vrot.lane.b32.xlu0 %v9587_v33, %s5332_s30 }
  0xe9   : > { %v6128_v17 = vpop.permute.xlu1 %663 }
  0xea   : > { %9588 = vst [vmem:[#allocation93_spill] sm:$0xff] %v6128_v17  ;;  %v6130_v12 = vpop.permute.xlu0 %661 }
  0xeb   : > { %9589 = vst [vmem:[#allocation94_spill] sm:$0xff] %v6130_v12  ;;  %851 = vrot.lane.b32.xlu1 %v9590_v55, %s5332_s30  ;;  %v9598_v12 = vld [vmem:[#allocation16_spill] sm:$0xff]  ;;  %v9599_v55 = vld [vmem:[#allocation17_spill] sm:$0xff] }
  0xec   : > { %849 = vrot.lane.b32.xlu0 %v9591_v26, %s5332_s30 }
  0xed   : > { %v6136_v25 = vpop.permute.xlu1 %667 }
  0xee   : > { %9592 = vst [vmem:[#allocation95_spill] sm:$0xff] %v6136_v25  ;;  %v6138_v28 = vpop.permute.xlu0 %665 }
  0xef   : > { %9593 = vst [vmem:[#allocation96_spill] sm:$0xff] %v6138_v28  ;;  %855 = vrot.lane.b32.xlu1 %v9594_v39, %s5332_s30  ;;  %v9602_v28 = vld [vmem:[#allocation20_spill] sm:$0xff]  ;;  %v9603_v39 = vld [vmem:[#allocation21_spill] sm:$0xff] }
  0xf0   : > { %853 = vrot.lane.b32.xlu0 %v9595_v61, %s5332_s30 }
  0xf1   : > { %v6144_v33 = vpop.permute.xlu1 %671 }
  0xf2   : > { %9596 = vst [vmem:[#allocation97_spill] sm:$0xff] %v6144_v33  ;;  %v6146_v17 = vpop.permute.xlu0 %669 }
  0xf3   : > { %9597 = vst [vmem:[#allocation98_spill] sm:$0xff] %v6146_v17  ;;  %859 = vrot.lane.b32.xlu1 %v9598_v12, %s5332_s30  ;;  %v9606_v17 = vld [vmem:[#allocation24_spill] sm:$0xff]  ;;  %v9610_v12 = vld [vmem:[#allocation30_spill] sm:$0xff] }
  0xf4   : > { %857 = vrot.lane.b32.xlu0 %v9599_v55, %s5332_s30  ;;  %v9607_v55 = vld [vmem:[#allocation25_spill] sm:$0xff] }
  0xf5   : > { %v6152_v26 = vpop.permute.xlu1 %675 }
  0xf6   : > { %9600 = vst [vmem:[#allocation99_spill] sm:$0xff] %v6152_v26  ;;  %v6154_v25 = vpop.permute.xlu0 %673 }
  0xf7   : > { %9601 = vst [vmem:[#allocation100_spill] sm:$0xff] %v6154_v25  ;;  %863 = vrot.lane.b32.xlu1 %v9602_v28, %s5332_s30  ;;  %v9608_v28 = vld [vmem:[#allocation28_spill] sm:$0xff] }
  0xf8   : > { %861 = vrot.lane.b32.xlu0 %v9603_v39, %s5332_s30  ;;  %v9609_v39 = vld [vmem:[#allocation29_spill] sm:$0xff] }
  0xf9   : > { %v6160_v61 = vpop.permute.xlu1 %679 }
  0xfa   : > { %9604 = vst [vmem:[#allocation101_spill] sm:$0xff] %v6160_v61  ;;  %v6162_v33 = vpop.permute.xlu0 %677 }
  0xfb   : > { %9605 = vst [vmem:[#allocation102_spill] sm:$0xff] %v6162_v33  ;;  %867 = vrot.lane.b32.xlu1 %v9606_v17, %s5332_s30  ;;  %v9611_v17 = vld [vmem:[#allocation31_spill] sm:$0xff] }
  0xfc   : > { %865 = vrot.lane.b32.xlu0 %v9607_v55, %s5332_s30 }
  0xfd   : > { %v6168_v26 = vpop.permute.xlu1 %683 }
  0xfe   : > { %v6170_v25 = vpop.permute.xlu0 %681 }
  0xff   : > { %871 = vrot.lane.b32.xlu1 %v9608_v28, %s5332_s30  ;;  %v9613_v28 = vld [vmem:[#allocation33_spill] sm:$0xff] }
 0x100   : > { %869 = vrot.lane.b32.xlu0 %v9609_v39, %s5332_s30 }
 0x101   : > { %v6176_v61 = vpop.permute.xlu1 %687 }
 0x102   : > { %v6178_v33 = vpop.permute.xlu0 %685 }
 0x103   : > { %875 = vrot.lane.b32.xlu1 %v9610_v12, %s5332_s30  ;;  %v827_v12 = vrot.slane %v6195_v37, 1 }
 0x104   : > { %873 = vrot.lane.b32.xlu0 %v9611_v17, %s5332_s30  ;;  %v825_v17 = vrot.slane %v6075_v50, 1 }
 0x105   : > { %v6184_v55 = vpop.permute.xlu1 %691 }
 0x106   : > { %v6186_v59 = vpop.permute.xlu0 %689 }
 0x107   : > { %879 = vrot.lane.b32.xlu1 %v9612_v53, %s5332_s30  ;;  %v824_v53 = vrot.slane %v6080_v18, 1 }
 0x108   : > { %877 = vrot.lane.b32.xlu0 %v9613_v28, %s5332_s30 }
 0x109   : > { %v6192_v39 = vpop.permute.xlu1 %729 }
 0x10a   : > { %9614 = vst [vmem:[#allocation103_spill] sm:$0xff] %v6192_v39  ;;  %v6197_v34 = vpop.permute.xlu0 %727  ;;  %v6215_v39 = vsel %vm371_vm0, %v825_v17, %v827_v12 }
 0x10b   : > { %9615 = vst [vmem:[#allocation104_spill] sm:$0xff] %v6197_v34  ;;  %883 = vrot.lane.b32.xlu1 %v5718_v21, %s5332_s30  ;;  %v9618_v34 = vld [vmem:[#allocation37_spill] sm:$0xff]  ;;  %9619 = vst [vmem:[#allocation107_spill] sm:$0xff] %v6215_v39 }
 0x10c   : > { %881 = vrot.lane.b32.xlu0 %v5723_v9, %s5332_s30  ;;  %v6220_v9 = vsel %vm371_vm0, %v824_v53, %v825_v17 }
 0x10d   : > { %v6206_v19 = vpop.permute.xlu1 %733  ;;  %9621 = vst [vmem:[#allocation109_spill] sm:$0xff] %v6220_v9 }
 0x10e   : > { %9616 = vst [vmem:[#allocation105_spill] sm:$0xff] %v6206_v19  ;;  %v6208_v28 = vpop.permute.xlu0 %731 }
 0x10f   : > { %9617 = vst [vmem:[#allocation106_spill] sm:$0xff] %v6208_v28  ;;  %887 = vrot.lane.b32.xlu1 %v5731_v57, %s5332_s30 }
 0x110   : > { %885 = vrot.lane.b32.xlu0 %v9618_v34, %s5332_s30 }
 0x111   : > { %v6217_v21 = vpop.permute.xlu1 %737 }
 0x112   : > { %9620 = vst [vmem:[#allocation108_spill] sm:$0xff] %v6217_v21  ;;  %v6222_v16 = vpop.permute.xlu0 %735 }
 0x113   : > { %9622 = vst [vmem:[#allocation110_spill] sm:$0xff] %v6222_v16  ;;  %891 = vrot.lane.b32.xlu1 %v6215_v39, %s5332_s30 }
 0x114   : > { %889 = vrot.lane.b32.xlu0 %v6220_v9, %s5332_s30 }
 0x115   : > { %v6228_v28 = vpop.permute.xlu1 %741 }
 0x116   : > { %9623 = vst [vmem:[#allocation111_spill] sm:$0xff] %v6228_v28  ;;  %v6230_v19 = vpop.permute.xlu0 %739 }
 0x117   : > { %9624 = vst [vmem:[#allocation112_spill] sm:$0xff] %v6230_v19  ;;  %932 = vrot.lane.b32.xlu1 %v5751_v2, %s5333_s7  ;;  %v9629_v2 = vld [vmem:[#allocation38_spill] sm:$0xff] }
 0x118   : > { %930 = vrot.lane.b32.xlu0 %v5756_v36, %s5333_s7 }
 0x119   : > { %v6236_v53 = vpop.permute.xlu1 %745 }
 0x11a   : > { %9625 = vst [vmem:[#allocation113_spill] sm:$0xff] %v6236_v53  ;;  %v6238_v17 = vpop.permute.xlu0 %743 }
 0x11b   : > { %9626 = vst [vmem:[#allocation114_spill] sm:$0xff] %v6238_v17  ;;  %936 = vrot.lane.b32.xlu1 %v5764_v43, %s5333_s7  ;;  %v9632_v17 = vld [vmem:[#allocation39_spill] sm:$0xff] }
 0x11c   : > { %934 = vrot.lane.b32.xlu0 %v5769_v14, %s5333_s7 }
 0x11d   : > { %v6244_v12 = vpop.permute.xlu1 %749 }
 0x11e   : > { %9627 = vst [vmem:[#allocation115_spill] sm:$0xff] %v6244_v12  ;;  %v6246_v19 = vpop.permute.xlu0 %747 }
 0x11f   : > { %9628 = vst [vmem:[#allocation116_spill] sm:$0xff] %v6246_v19  ;;  %940 = vrot.lane.b32.xlu1 %v5777_v5, %s5333_s7  ;;  %v9635_v19 = vld [vmem:[#allocation40_spill] sm:$0xff] }
 0x120   : > { %938 = vrot.lane.b32.xlu0 %v9629_v2, %s5333_s7 }
 0x121   : > { %v6252_v36 = vpop.permute.xlu1 %753 }
 0x122   : > { %9630 = vst [vmem:[#allocation38_spill] sm:$0xff] %v6252_v36  ;;  %v6254_v53 = vpop.permute.xlu0 %751 }
 0x123   : > { %9631 = vst [vmem:[#allocation117_spill] sm:$0xff] %v6254_v53  ;;  %944 = vrot.lane.b32.xlu1 %v5790_v51, %s5333_s7  ;;  %v9638_v53 = vld [vmem:[#allocation41_spill] sm:$0xff] }
 0x124   : > { %942 = vrot.lane.b32.xlu0 %v9632_v17, %s5333_s7 }
 0x125   : > { %v6260_v28 = vpop.permute.xlu1 %757 }
 0x126   : > { %9633 = vst [vmem:[#allocation39_spill] sm:$0xff] %v6260_v28  ;;  %v6262_v12 = vpop.permute.xlu0 %755 }
 0x127   : > { %9634 = vst [vmem:[#allocation118_spill] sm:$0xff] %v6262_v12  ;;  %948 = vrot.lane.b32.xlu1 %v5803_v6, %s5333_s7  ;;  %v9641_v12 = vld [vmem:[#allocation42_spill] sm:$0xff] }
 0x128   : > { %946 = vrot.lane.b32.xlu0 %v9635_v19, %s5333_s7 }
 0x129   : > { %v6268_v16 = vpop.permute.xlu1 %761 }
 0x12a   : > { %9636 = vst [vmem:[#allocation40_spill] sm:$0xff] %v6268_v16  ;;  %v6270_v36 = vpop.permute.xlu0 %759 }
 0x12b   : > { %9637 = vst [vmem:[#allocation119_spill] sm:$0xff] %v6270_v36  ;;  %952 = vrot.lane.b32.xlu1 %v5816_v4, %s5333_s7  ;;  %v9644_v36 = vld [vmem:[#allocation43_spill] sm:$0xff] }
 0x12c   : > { %950 = vrot.lane.b32.xlu0 %v9638_v53, %s5333_s7 }
 0x12d   : > { %v6276_v21 = vpop.permute.xlu1 %765 }
 0x12e   : > { %9639 = vst [vmem:[#allocation41_spill] sm:$0xff] %v6276_v21  ;;  %v6278_v28 = vpop.permute.xlu0 %763 }
 0x12f   : > { %9640 = vst [vmem:[#allocation120_spill] sm:$0xff] %v6278_v28  ;;  %956 = vrot.lane.b32.xlu1 %v5829_v52, %s5333_s7  ;;  %v9647_v28 = vld [vmem:[#allocation44_spill] sm:$0xff] }
 0x130   : > { %954 = vrot.lane.b32.xlu0 %v9641_v12, %s5333_s7 }
 0x131   : > { %v6284_v9 = vpop.permute.xlu1 %769 }
 0x132   : > { %9642 = vst [vmem:[#allocation42_spill] sm:$0xff] %v6284_v9  ;;  %v6286_v16 = vpop.permute.xlu0 %767 }
 0x133   : > { %9643 = vst [vmem:[#allocation121_spill] sm:$0xff] %v6286_v16  ;;  %960 = vrot.lane.b32.xlu1 %v5842_v10, %s5333_s7  ;;  %v1354_v16 = vsel %vm1327_vm2, %v5667_v13, %v6036_v0  ;;  %v1357_v0 = vsel %vm1327_vm2, %v5683_v60, %v6042_v1 }
 0x134   : > { %958 = vrot.lane.b32.xlu0 %v9644_v36, %s5333_s7  ;;  %v1387_v57 = vsel %vm1360_vm3, %v1354_v16, %v6170_v25  ;;  %v1356_v25 = vsel %vm1327_vm2, %v5689_v42, %v6044_v47  ;;  %v1359_v47 = vsel %vm1327_vm2, %v5705_v49, %v6050_v45 }
 0x135   : > { %v6292_v39 = vpop.permute.xlu1 %773 }
 0x136   : > { %9645 = vst [vmem:[#allocation43_spill] sm:$0xff] %v6292_v39  ;;  %v6294_v21 = vpop.permute.xlu0 %771  ;;  %v1355_v39 = vsel %vm1327_vm2, %v5661_v20, %v6034_v29 }
 0x137   : > { %9646 = vst [vmem:[#allocation122_spill] sm:$0xff] %v6294_v21  ;;  %964 = vrot.lane.b32.xlu1 %v5855_v7, %s5333_s7  ;;  %v9650_v21 = vld [vmem:[#allocation46_spill] sm:$0xff] }
 0x138   : > { %962 = vrot.lane.b32.xlu0 %v9647_v28, %s5333_s7 }
 0x139   : > { %v6300_v34 = vpop.permute.xlu1 %777 }
 0x13a   : > { %9648 = vst [vmem:[#allocation123_spill] sm:$0xff] %v6300_v34  ;;  %v6302_v9 = vpop.permute.xlu0 %775  ;;  %v1388_v34 = vsel %vm1360_vm3, %v1355_v39, %v6168_v26  ;;  %v9652_v26 = vld [vmem:[#allocation48_spill] sm:$0xff] }
 0x13b   : > { %9649 = vst [vmem:[#allocation124_spill] sm:$0xff] %v6302_v9  ;;  %968 = vrot.lane.b32.xlu1 %v5868_v41, %s5333_s7 }
 0x13c   : > { %966 = vrot.lane.b32.xlu0 %v9650_v21, %s5333_s7  ;;  %v9651_v21 = vld [vmem:[#allocation47_spill] sm:$0xff] }
 0x13d   : > { %v782_v9 = vpop.permute.xlu1 %781 }
 0x13e   : > { %v6319_v41 = vsel %vm1393_vm4, %v1388_v34, %v782_v9  ;;  %v780_v29 = vpop.permute.xlu0 %779  ;;  %v1390_v9 = vsel %vm1360_vm3, %v1357_v0, %v6176_v61  ;;  %v9653_v61 = vld [vmem:[#allocation49_spill] sm:$0xff] }
 0x13f   : > { %v6322_v28 = vsel %vm1393_vm4, %v1387_v57, %v780_v29  ;;  %972 = vrot.lane.b32.xlu1 %v9651_v21, %s5333_s7  ;;  %v1389_v57 = vsel %vm1360_vm3, %v1356_v25, %v6178_v33  ;;  %v1358_v33 = vsel %vm1327_vm2, %v5711_v8, %v6052_v27  ;;  %v1392_v29 = vsel %vm1360_vm3, %v1359_v47, %v6184_v55 }
 0x140   : > { %970 = vrot.lane.b32.xlu0 %v9652_v26, %s5333_s7  ;;  %v1391_v25 = vsel %vm1360_vm3, %v1358_v33, %v6186_v59  ;;  %v926_v59 = vrot.slane %v6075_v50, 2  ;;  %v925_v47 = vrot.slane %v6080_v18, 2 }
 0x141   : > { %v786_v16 = vpop.permute.xlu1 %785 }
 0x142   : > { %v6339_v34 = vsel %vm1393_vm4, %v1390_v9, %v786_v16  ;;  %v784_v39 = vpop.permute.xlu0 %783 }
 0x143   : > { %v6342_v1 = vsel %vm1393_vm4, %v1389_v57, %v784_v39  ;;  %976 = vrot.lane.b32.xlu1 %v5894_v23, %s5333_s7  ;;  %v9654_v57 = vld [vmem:[#allocation51_spill] sm:$0xff]  ;;  %v928_v39 = vrot.slane %v6195_v37, 2 }
 0x144   : > { %974 = vrot.lane.b32.xlu0 %v9653_v61, %s5333_s7 }
 0x145   : > { %v790_v0 = vpop.permute.xlu1 %789 }
 0x146   : > { %v6359_v9 = vsel %vm1393_vm4, %v1392_v29, %v790_v0  ;;  %v788_v16 = vpop.permute.xlu0 %787  ;;  %v6388_v0 = vsel %vm548_vm1, %v926_v59, %v928_v39 }
 0x147   : > { %v6362_v45 = vsel %vm1393_vm4, %v1391_v25, %v788_v16  ;;  %980 = vrot.lane.b32.xlu1 %v5907_v31, %s5333_s7  ;;  %v6393_v16 = vsel %vm548_vm1, %v925_v47, %v926_v59 }
 0x148   : > { %978 = vrot.lane.b32.xlu0 %v9654_v57, %s5333_s7 }
 0x149   : > { %v6368_v27 = vpop.permute.xlu1 %831 }
 0x14a   : > { %v6370_v55 = vpop.permute.xlu0 %829 }
 0x14b   : > { %984 = vrot.lane.b32.xlu1 %v5924_v35, %s5333_s7 }
 0x14c   : > { %982 = vrot.lane.b32.xlu0 %v5931_v63, %s5333_s7 }
 0x14d   : > { %v6379_v33 = vpop.permute.xlu1 %835 }
 0x14e   : > { %9655 = vst [vmem:[#allocation47_spill] sm:$0xff] %v6379_v33  ;;  %v6381_v29 = vpop.permute.xlu0 %833 }
 0x14f   : > { %9656 = vst [vmem:[#allocation48_spill] sm:$0xff] %v6381_v29  ;;  %988 = vrot.lane.b32.xlu1 %v5941_v58, %s5333_s7 }
 0x150   : > { %986 = vrot.lane.b32.xlu0 %v5946_v44, %s5333_s7 }
 0x151   : > { %v6390_v25 = vpop.permute.xlu1 %839 }
 0x152   : > { %v6395_v37 = vpop.permute.xlu0 %837 }
 0x153   : > { %992 = vrot.lane.b32.xlu1 %v6388_v0, %s5333_s7 }
 0x154   : > { %990 = vrot.lane.b32.xlu0 %v6393_v16, %s5333_s7  ;;  %s4901_s7 = sshll.u32 %s10175_s22, 3 }
 0x155   : > { %v6401_v29 = vpop.permute.xlu1 %843  ;;  %s262_s10 = scalar_lea.vmem %s9284_s6, %s4901_s7 }
 0x156   : > { %v6403_v33 = vpop.permute.xlu0 %841 }
 0x157   : > { %9657 = vst [vmem:[#allocation49_spill] sm:$0xff] %v6403_v33  ;;  %1030 = vrot.lane.b32.xlu1 %v5418_v11, %s5334_s8 }
 0x158   : > { %1028 = vrot.lane.b32.xlu0 %v5428_v15, %s5334_s8 }
 0x159   : > { %v6409_v59 = vpop.permute.xlu1 %847 }
 0x15a   : > { %9658 = vst [vmem:[#allocation51_spill] sm:$0xff] %v6409_v59  ;;  %v6411_v39 = vpop.permute.xlu0 %845  ;;  %v321_v59 = vld [vmem:[%s9279_s1 + $0x20] sm:$0xf] }
 0x15b   : > { %9659 = vst [vmem:[#allocation125_spill] sm:$0xff] %v6411_v39  ;;  %1034 = vrot.lane.b32.xlu1 %v5442_v22, %s5334_s8  ;;  %v9692_v39 = vld [vmem:[#allocation6_spill] sm:$0xff] }
 0x15c   : > { %1032 = vrot.lane.b32.xlu0 %v5448_v24, %s5334_s8 }
 0x15d   : > { %v6417_v47 = vpop.permute.xlu1 %851 }
 0x15e   : > { %9660 = vst [vmem:[#allocation126_spill] sm:$0xff] %v6417_v47  ;;  %v6419_v33 = vpop.permute.xlu0 %849 }
 0x15f   : > { %9661 = vst [vmem:[#allocation127_spill] sm:$0xff] %v6419_v33  ;;  %1038 = vrot.lane.b32.xlu1 %v5463_v30, %s5334_s8 }
 0x160   : > { %1036 = vrot.lane.b32.xlu0 %v5469_v32, %s5334_s8 }
 0x161   : > { %v6425_v11 = vpop.permute.xlu1 %855 }
 0x162   : > { %9662 = vst [vmem:[#allocation128_spill] sm:$0xff] %v6425_v11  ;;  %v6427_v15 = vpop.permute.xlu0 %853  ;;  %v9689_v11 = vld [vmem:[#allocation5_spill] sm:$0xff] }
 0x163   : > { %9663 = vst [vmem:[#allocation129_spill] sm:$0xff] %v6427_v15  ;;  %1042 = vrot.lane.b32.xlu1 %v5485_v38, %s5334_s8  ;;  %v9688_v15 = vld [vmem:[#allocation4_spill] sm:$0xff] }
 0x164   : > { %1040 = vrot.lane.b32.xlu0 %v5491_v40, %s5334_s8 }
 0x165   : > { %v6433_v22 = vpop.permute.xlu1 %859 }
 0x166   : > { %9664 = vst [vmem:[#allocation130_spill] sm:$0xff] %v6433_v22  ;;  %v6435_v24 = vpop.permute.xlu0 %857 }
 0x167   : > { %9665 = vst [vmem:[#allocation131_spill] sm:$0xff] %v6435_v24  ;;  %1046 = vrot.lane.b32.xlu1 %v5507_v46, %s5334_s8 }
 0x168   : > { %1044 = vrot.lane.b32.xlu0 %v5513_v48, %s5334_s8 }
 0x169   : > { %v6441_v30 = vpop.permute.xlu1 %863 }
 0x16a   : > { %9666 = vst [vmem:[#allocation132_spill] sm:$0xff] %v6441_v30  ;;  %v6443_v32 = vpop.permute.xlu0 %861  ;;  %v9685_v30 = vld [vmem:[#allocation3_spill] sm:$0xff] }
 0x16b   : > { %9667 = vst [vmem:[#allocation133_spill] sm:$0xff] %v6443_v32  ;;  %1050 = vrot.lane.b32.xlu1 %v5529_v54, %s5334_s8  ;;  %v9672_v32 = vld [vmem:[#allocation14_spill] sm:$0xff]  ;;  %v9673_v54 = vld [vmem:[#allocation15_spill] sm:$0xff] }
 0x16c   : > { %1048 = vrot.lane.b32.xlu0 %v5535_v56, %s5334_s8 }
 0x16d   : > { %v6449_v38 = vpop.permute.xlu1 %867 }
 0x16e   : > { %9668 = vst [vmem:[#allocation134_spill] sm:$0xff] %v6449_v38  ;;  %v6451_v40 = vpop.permute.xlu0 %865 }
 0x16f   : > { %9669 = vst [vmem:[#allocation135_spill] sm:$0xff] %v6451_v40  ;;  %1054 = vrot.lane.b32.xlu1 %v5551_v62, %s5334_s8  ;;  %v9676_v40 = vld [vmem:[#allocation18_spill] sm:$0xff]  ;;  %v9677_v62 = vld [vmem:[#allocation19_spill] sm:$0xff] }
 0x170   : > { %1052 = vrot.lane.b32.xlu0 %v5557_v3, %s5334_s8 }
 0x171   : > { %v6457_v46 = vpop.permute.xlu1 %871 }
 0x172   : > { %9670 = vst [vmem:[#allocation136_spill] sm:$0xff] %v6457_v46  ;;  %v6459_v48 = vpop.permute.xlu0 %869 }
 0x173   : > { %9671 = vst [vmem:[#allocation137_spill] sm:$0xff] %v6459_v48  ;;  %1058 = vrot.lane.b32.xlu1 %v9672_v32, %s5334_s8  ;;  %v9680_v48 = vld [vmem:[#allocation22_spill] sm:$0xff]  ;;  %v9681_v32 = vld [vmem:[#allocation23_spill] sm:$0xff] }
 0x174   : > { %1056 = vrot.lane.b32.xlu0 %v9673_v54, %s5334_s8 }
 0x175   : > { %v6465_v56 = vpop.permute.xlu1 %875 }
 0x176   : > { %9674 = vst [vmem:[#allocation14_spill] sm:$0xff] %v6465_v56  ;;  %v6467_v38 = vpop.permute.xlu0 %873 }
 0x177   : > { %9675 = vst [vmem:[#allocation15_spill] sm:$0xff] %v6467_v38  ;;  %1062 = vrot.lane.b32.xlu1 %v9676_v40, %s5334_s8  ;;  %v9682_v38 = vld [vmem:[#allocation26_spill] sm:$0xff]  ;;  %v9683_v40 = vld [vmem:[#allocation27_spill] sm:$0xff] }
 0x178   : > { %1060 = vrot.lane.b32.xlu0 %v9677_v62, %s5334_s8 }
 0x179   : > { %v6473_v3 = vpop.permute.xlu1 %879 }
 0x17a   : > { %9678 = vst [vmem:[#allocation18_spill] sm:$0xff] %v6473_v3  ;;  %v6475_v46 = vpop.permute.xlu0 %877  ;;  %v6527_v3 = vld [vmem:[%s5392_s26 + $0x198] sm:$0xff] }
 0x17b   : > { %9679 = vst [vmem:[#allocation19_spill] sm:$0xff] %v6475_v46  ;;  %1066 = vrot.lane.b32.xlu1 %v9680_v48, %s5334_s8 }
 0x17c   : > { %1064 = vrot.lane.b32.xlu0 %v9681_v32, %s5334_s8 }
 0x17d   : > { %v6481_v54 = vpop.permute.xlu1 %883 }
 0x17e   : > { %v6483_v56 = vpop.permute.xlu0 %881 }
 0x17f   : > { %1070 = vrot.lane.b32.xlu1 %v9682_v38, %s5334_s8 }
 0x180   : > { %1068 = vrot.lane.b32.xlu0 %v9683_v40, %s5334_s8 }
 0x181   : > { %v6489_v62 = vpop.permute.xlu1 %887 }
 0x182   : > { %v6491_v46 = vpop.permute.xlu0 %885 }
 0x183   : > { %1074 = vrot.lane.b32.xlu1 %v5661_v20, %s5334_s8 }
 0x184   : > { %1072 = vrot.lane.b32.xlu0 %v5667_v13, %s5334_s8 }
 0x185   : > { %v6497_v48 = vpop.permute.xlu1 %891 }
 0x186   : > { %v6499_v32 = vpop.permute.xlu0 %889 }
 0x187   : > { %1078 = vrot.lane.b32.xlu1 %v5683_v60, %s5334_s8  ;;  %v6522_v60 = vld [vmem:[%s5392_s26 + $0x1a0] sm:$0xff] }
 0x188   : > { %1076 = vrot.lane.b32.xlu0 %v5689_v42, %s5334_s8 }
 0x189   : > { %v6505_v38 = vpop.permute.xlu1 %932 }
 0x18a   : > { %v6507_v40 = vpop.permute.xlu0 %930 }
 0x18b   : > { %1082 = vrot.lane.b32.xlu1 %v5705_v49, %s5334_s8 }
 0x18c   : > { %1080 = vrot.lane.b32.xlu0 %v5711_v8, %s5334_s8 }
 0x18d   : > { %v6513_v20 = vpop.permute.xlu1 %936 }
 0x18e   : > { %v6515_v13 = vpop.permute.xlu0 %934 }
 0x18f   : > { %1086 = vrot.lane.b32.xlu1 %v6075_v50, %s5334_s8 }
 0x190   : > { %1084 = vrot.lane.b32.xlu0 %v6080_v18, %s5334_s8  ;;  %v9684_v18 = vld [vmem:[#allocation2_spill] sm:$0xff] }
 0x191   : > { %v6524_v42 = vpop.permute.xlu1 %940 }
 0x192   : > { %v6529_v49 = vpop.permute.xlu0 %938 }
 0x193   : > { %1090 = vrot.lane.b32.xlu1 %v6522_v60, %s5334_s8 }
 0x194   : > { %1088 = vrot.lane.b32.xlu0 %v6527_v3, %s5334_s8 }
 0x195   : > { %v6535_v8 = vpop.permute.xlu1 %944 }
 0x196   : > { %v6537_v50 = vpop.permute.xlu0 %942 }
 0x197   : > { %1132 = vrot.lane.b32.xlu1 %v9684_v18, %s5335_s9  ;;  %v9693_v18 = vld [vmem:[#allocation7_spill] sm:$0xff] }
 0x198   : > { %1130 = vrot.lane.b32.xlu0 %v9685_v30, %s5335_s9 }
 0x199   : > { %v6543_v24 = vpop.permute.xlu1 %948 }
 0x19a   : > { %9686 = vst [vmem:[#allocation22_spill] sm:$0xff] %v6543_v24  ;;  %v6545_v22 = vpop.permute.xlu0 %946 }
 0x19b   : > { %9687 = vst [vmem:[#allocation23_spill] sm:$0xff] %v6545_v22  ;;  %1136 = vrot.lane.b32.xlu1 %v9688_v15, %s5335_s9  ;;  %v9696_v22 = vld [vmem:[#allocation8_spill] sm:$0xff]  ;;  %v9697_v15 = vld [vmem:[#allocation9_spill] sm:$0xff] }
 0x19c   : > { %1134 = vrot.lane.b32.xlu0 %v9689_v11, %s5335_s9 }
 0x19d   : > { %v6551_v33 = vpop.permute.xlu1 %952 }
 0x19e   : > { %9690 = vst [vmem:[#allocation26_spill] sm:$0xff] %v6551_v33  ;;  %v6553_v47 = vpop.permute.xlu0 %950 }
 0x19f   : > { %9691 = vst [vmem:[#allocation27_spill] sm:$0xff] %v6553_v47  ;;  %1140 = vrot.lane.b32.xlu1 %v9692_v39, %s5335_s9  ;;  %v9700_v47 = vld [vmem:[#allocation10_spill] sm:$0xff]  ;;  %v9701_v39 = vld [vmem:[#allocation11_spill] sm:$0xff] }
 0x1a0   : > { %1138 = vrot.lane.b32.xlu0 %v9693_v18, %s5335_s9 }
 0x1a1   : > { %v6559_v30 = vpop.permute.xlu1 %956 }
 0x1a2   : > { %9694 = vst [vmem:[#allocation2_spill] sm:$0xff] %v6559_v30  ;;  %v6561_v24 = vpop.permute.xlu0 %954 }
 0x1a3   : > { %9695 = vst [vmem:[#allocation3_spill] sm:$0xff] %v6561_v24  ;;  %1144 = vrot.lane.b32.xlu1 %v9696_v22, %s5335_s9  ;;  %v9704_v24 = vld [vmem:[#allocation12_spill] sm:$0xff]  ;;  %v9705_v22 = vld [vmem:[#allocation13_spill] sm:$0xff] }
 0x1a4   : > { %1142 = vrot.lane.b32.xlu0 %v9697_v15, %s5335_s9  ;;  %v317_v15 = vld [vmem:[%s9279_s1] sm:$0xff] }
 0x1a5   : > { %v6567_v11 = vpop.permute.xlu1 %960 }
 0x1a6   : > { %9698 = vst [vmem:[#allocation4_spill] sm:$0xff] %v6567_v11  ;;  %v6569_v33 = vpop.permute.xlu0 %958  ;;  %v320_v11 = vld [vmem:[%s9279_s1 + $0x18] sm:$0xff] }
 0x1a7   : > { %9699 = vst [vmem:[#allocation5_spill] sm:$0xff] %v6569_v33  ;;  %1148 = vrot.lane.b32.xlu1 %v9700_v47, %s5335_s9  ;;  %v318_v47 = vld [vmem:[%s9279_s1 + $0x8] sm:$0xff] }
 0x1a8   : > { %1146 = vrot.lane.b32.xlu0 %v9701_v39, %s5335_s9  ;;  %v5238_v39 = vpack.c.bf16 %v318_v47, %v317_v15 }
 0x1a9   : > { %v6575_v18 = vpop.permute.xlu1 %964 }
 0x1aa   : > { %9702 = vst [vmem:[#allocation6_spill] sm:$0xff] %v6575_v18  ;;  %v6577_v30 = vpop.permute.xlu0 %962  ;;  %5239 = vmatprep.subr.bf16.mxu0 %v5238_v39 }
 0x1ab   : > { %9703 = vst [vmem:[#allocation7_spill] sm:$0xff] %v6577_v30  ;;  %1152 = vrot.lane.b32.xlu1 %v9704_v24, %s5335_s9  ;;  %v9708_v30 = vld [vmem:[#allocation16_spill] sm:$0xff]  ;;  %v9709_v24 = vld [vmem:[#allocation17_spill] sm:$0xff]  ;;  %5241 = vmatpush3.bf16.msra.mxu0 %v5238_v39 }
 0x1ac   : > { %1150 = vrot.lane.b32.xlu0 %v9705_v22, %s5335_s9  ;;  %v319_v22 = vld [vmem:[%s9279_s1 + $0x10] sm:$0xff] }
 0x1ad   : > { %v6589_v33 = vpop.permute.xlu1 %968  ;;  %v5242_v15 = vpack.c.bf16 %v320_v11, %v319_v22  ;;  %v9716_v11 = vld [vmem:[#allocation24_spill] sm:$0xff]  ;;  %v9717_v22 = vld [vmem:[#allocation25_spill] sm:$0xff] }
 0x1ae   : > { %9706 = vst [vmem:[#allocation8_spill] sm:$0xff] %v6589_v33  ;;  %v6591_v18 = vpop.permute.xlu0 %966 }
 0x1af   : > { %9707 = vst [vmem:[#allocation9_spill] sm:$0xff] %v6591_v18  ;;  %1156 = vrot.lane.b32.xlu1 %v9708_v30, %s5335_s9  ;;  %v9712_v30 = vld [vmem:[#allocation20_spill] sm:$0xff]  ;;  %5243 = vmatprep.subr.bf16.mxu0 %v5242_v15 }
 0x1b0   : > { %1154 = vrot.lane.b32.xlu0 %v9709_v24, %s5335_s9  ;;  %v9713_v24 = vld [vmem:[#allocation21_spill] sm:$0xff]  ;;  %5245 = vmatpush3.bf16.msra.mxu0 %v5242_v15 }
 0x1b1   : > { %v6603_v33 = vpop.permute.xlu1 %972  ;;  %5122 = vmatprep.subr.msk.mxu0 %vm1694_vm5, %v321_v59 }
 0x1b2   : > { %9710 = vst [vmem:[#allocation10_spill] sm:$0xff] %v6603_v33  ;;  %v6605_v47 = vpop.permute.xlu0 %970  ;;  %v9762_v33 = vld [vmem:[#allocation103_spill] sm:$0xff] }
 0x1b3   : > { %9711 = vst [vmem:[#allocation11_spill] sm:$0xff] %v6605_v47  ;;  %1160 = vrot.lane.b32.xlu1 %v9712_v30, %s5335_s9 }
 0x1b4   : > { %1158 = vrot.lane.b32.xlu0 %v9713_v24, %s5335_s9  ;;  %5123 = vmatpush3.msk.msra.mxu0 %vm1694_vm5, %v321_v59  ;;  %v9720_v24 = vld [vmem:[#allocation28_spill] sm:$0xff]  ;;  %v1453_v59 = vsel %vm1426_vm6, %v6322_v28, %v6483_v56  ;;  %v1455_v28 = vsel %vm1426_vm6, %v6342_v1, %v6491_v46  ;;  %v1457_v1 = vsel %vm1426_vm6, %v6362_v45, %v6499_v32  ;;  %v9731_v32 = vld [vmem:[#allocation45_spill] sm:$0xff]  ;;  %vm4707_vm5 = vcmask 1043459  }
 0x1b5   : > { %v6611_v39 = vpop.permute.xlu1 %976 }
 0x1b6   : > { %9714 = vst [vmem:[#allocation12_spill] sm:$0xff] %v6611_v39  ;;  %v6613_v18 = vpop.permute.xlu0 %974 }
 0x1b7   : > { %9715 = vst [vmem:[#allocation13_spill] sm:$0xff] %v6613_v18  ;;  %1164 = vrot.lane.b32.xlu1 %v9716_v11, %s5335_s9  ;;  %v9721_v18 = vld [vmem:[#allocation29_spill] sm:$0xff]  ;;  %v1454_v11 = vsel %vm1426_vm6, %v6319_v41, %v6481_v54  ;;  %v1456_v41 = vsel %vm1426_vm6, %v6339_v34, %v6489_v62  ;;  %v1458_v34 = vsel %vm1426_vm6, %v6359_v9, %v6497_v48 }
 0x1b8   : > { %1162 = vrot.lane.b32.xlu0 %v9717_v22, %s5335_s9 }
 0x1b9   : > { %v6622_v30 = vpop.permute.xlu1 %980 }
 0x1ba   : > { %9718 = vst [vmem:[#allocation16_spill] sm:$0xff] %v6622_v30  ;;  %v6624_v15 = vpop.permute.xlu0 %978  ;;  %v9724_v30 = vld [vmem:[#allocation30_spill] sm:$0xff] }
 0x1bb   : > { %9719 = vst [vmem:[#allocation17_spill] sm:$0xff] %v6624_v15  ;;  %1168 = vrot.lane.b32.xlu1 %v9720_v24, %s5335_s9 }
 0x1bc   : > { %1166 = vrot.lane.b32.xlu0 %v9721_v18, %s5335_s9  ;;  %v9725_v18 = vld [vmem:[#allocation31_spill] sm:$0xff] }
 0x1bd   : > { %v985_v39 = vpop.permute.xlu1 %984 }
 0x1be   : > { %v6637_v22 = vsel %vm1459_vm7, %v1454_v11, %v985_v39  ;;  %v983_v15 = vpop.permute.xlu0 %982 }
 0x1bf   : > { %9722 = vst [vmem:[#allocation20_spill] sm:$0xff] %v6637_v22  ;;  %v6640_v24 = vsel %vm1459_vm7, %v1453_v59, %v983_v15  ;;  %1172 = vrot.lane.b32.xlu1 %v9724_v30, %s5335_s9  ;;  %v9758_v22 = vld [vmem:[#allocation54_spill] sm:$0xff] }
 0x1c0   : > { %9723 = vst [vmem:[#allocation21_spill] sm:$0xff] %v6640_v24  ;;  %1170 = vrot.lane.b32.xlu0 %v9725_v18, %s5335_s9 }
 0x1c1   : > { %v989_v54 = vpop.permute.xlu1 %988 }
 0x1c2   : > { %v6653_v56 = vsel %vm1459_vm7, %v1456_v41, %v989_v54  ;;  %v987_v39 = vpop.permute.xlu0 %986 }
 0x1c3   : > { %9726 = vst [vmem:[#allocation24_spill] sm:$0xff] %v6653_v56  ;;  %v6656_v15 = vsel %vm1459_vm7, %v1455_v28, %v987_v39  ;;  %1233 = vrot.lane.b32.xlu1 %v5764_v43, %s5336_s20  ;;  %v9735_v28 = vld [vmem:[#allocation32_spill] sm:$0xff] }
 0x1c4   : > { %9727 = vst [vmem:[#allocation25_spill] sm:$0xff] %v6656_v15  ;;  %1231 = vrot.lane.b32.xlu0 %v5769_v14, %s5336_s20 }
 0x1c5   : > { %v993_v62 = vpop.permute.xlu1 %992 }
 0x1c6   : > { %v6669_v46 = vsel %vm1459_vm7, %v1458_v34, %v993_v62  ;;  %v991_v30 = vpop.permute.xlu0 %990  ;;  %v9741_v34 = vld [vmem:[#allocation34_spill] sm:$0xff]  ;;  %v9742_v62 = vld [vmem:[#allocation35_spill] sm:$0xff] }
 0x1c7   : > { %9728 = vst [vmem:[#allocation28_spill] sm:$0xff] %v6669_v46  ;;  %v6672_v11 = vsel %vm1459_vm7, %v1457_v1, %v991_v30  ;;  %1237 = vrot.lane.b32.xlu1 %v5777_v5, %s5336_s20 }
 0x1c8   : > { %9729 = vst [vmem:[#allocation29_spill] sm:$0xff] %v6672_v11  ;;  %1235 = vrot.lane.b32.xlu0 %v9629_v2, %s5336_s20  ;;  %v1125_v11 = vrot.slane %v6527_v3, 1 }
 0x1c9   : > { %v6678_v43 = vpop.permute.xlu1 %1030 }
 0x1ca   : > { %v6680_v14 = vpop.permute.xlu0 %1028 }
 0x1cb   : > { %1241 = vrot.lane.b32.xlu1 %v5790_v51, %s5336_s20 }
 0x1cc   : > { %1239 = vrot.lane.b32.xlu0 %v9632_v17, %s5336_s20 }
 0x1cd   : > { %v6686_v9 = vpop.permute.xlu1 %1034 }
 0x1ce   : > { %v6688_v45 = vpop.permute.xlu0 %1032 }
 0x1cf   : > { %1245 = vrot.lane.b32.xlu1 %v5803_v6, %s5336_s20 }
 0x1d0   : > { %1243 = vrot.lane.b32.xlu0 %v9635_v19, %s5336_s20 }
 0x1d1   : > { %v6694_v5 = vpop.permute.xlu1 %1038 }
 0x1d2   : > { %v6696_v2 = vpop.permute.xlu0 %1036 }
 0x1d3   : > { %1249 = vrot.lane.b32.xlu1 %v5816_v4, %s5336_s20 }
 0x1d4   : > { %1247 = vrot.lane.b32.xlu0 %v9638_v53, %s5336_s20 }
 0x1d5   : > { %v6702_v51 = vpop.permute.xlu1 %1042 }
 0x1d6   : > { %v6704_v17 = vpop.permute.xlu0 %1040 }
 0x1d7   : > { %1253 = vrot.lane.b32.xlu1 %v5829_v52, %s5336_s20  ;;  %v9730_v52 = vld [vmem:[#allocation44_spill] sm:$0xff] }
 0x1d8   : > { %1251 = vrot.lane.b32.xlu0 %v9641_v12, %s5336_s20 }
 0x1d9   : > { %v6710_v19 = vpop.permute.xlu1 %1046 }
 0x1da   : > { %v6712_v6 = vpop.permute.xlu0 %1044 }
 0x1db   : > { %1257 = vrot.lane.b32.xlu1 %v5842_v10, %s5336_s20  ;;  %v9732_v10 = vld [vmem:[#allocation46_spill] sm:$0xff] }
 0x1dc   : > { %1255 = vrot.lane.b32.xlu0 %v9644_v36, %s5336_s20 }
 0x1dd   : > { %v6718_v4 = vpop.permute.xlu1 %1050 }
 0x1de   : > { %v6720_v53 = vpop.permute.xlu0 %1048 }
 0x1df   : > { %1261 = vrot.lane.b32.xlu1 %v5855_v7, %s5336_s20 }
 0x1e0   : > { %1259 = vrot.lane.b32.xlu0 %v9730_v52, %s5336_s20  ;;  %v9747_v52 = vld [vmem:[#allocation36_spill] sm:$0xff] }
 0x1e1   : > { %v6726_v12 = vpop.permute.xlu1 %1054 }
 0x1e2   : > { %v6728_v48 = vpop.permute.xlu0 %1052 }
 0x1e3   : > { %1265 = vrot.lane.b32.xlu1 %v9731_v32, %s5336_s20  ;;  %v9748_v32 = vld [vmem:[#allocation37_spill] sm:$0xff] }
 0x1e4   : > { %1263 = vrot.lane.b32.xlu0 %v9732_v10, %s5336_s20 }
 0x1e5   : > { %v6734_v36 = vpop.permute.xlu1 %1058 }
 0x1e6   : > { %v6736_v59 = vpop.permute.xlu0 %1056 }
 0x1e7   : > { %1269 = vrot.lane.b32.xlu1 %v9651_v21, %s5336_s20  ;;  %v9736_v21 = vld [vmem:[#allocation33_spill] sm:$0xff] }
 0x1e8   : > { %1267 = vrot.lane.b32.xlu0 %v9652_v26, %s5336_s20 }
 0x1e9   : > { %v6742_v7 = vpop.permute.xlu1 %1062 }
 0x1ea   : > { %v6744_v18 = vpop.permute.xlu0 %1060 }
 0x1eb   : > { %1273 = vrot.lane.b32.xlu1 %v5894_v23, %s5336_s20 }
 0x1ec   : > { %1271 = vrot.lane.b32.xlu0 %v9653_v61, %s5336_s20 }
 0x1ed   : > { %v6750_v41 = vpop.permute.xlu1 %1066 }
 0x1ee   : > { %9733 = vst [vmem:[#allocation30_spill] sm:$0xff] %v6750_v41  ;;  %v6752_v54 = vpop.permute.xlu0 %1064  ;;  %v9763_v41 = vld [vmem:[#allocation50_spill] sm:$0xff] }
 0x1ef   : > { %9734 = vst [vmem:[#allocation31_spill] sm:$0xff] %v6752_v54  ;;  %1176 = vrot.lane.b32.xlu1 %v9735_v28, %s5335_s9  ;;  %v5297_v54 = vld [vmem:[%s5392_s26 + $0x18] sm:$0xff] }
 0x1f0   : > { %1174 = vrot.lane.b32.xlu0 %v9736_v21, %s5335_s9 }
 0x1f1   : > { %v6758_v26 = vpop.permute.xlu1 %1070 }
 0x1f2   : > { %9737 = vst [vmem:[#allocation44_spill] sm:$0xff] %v6758_v26  ;;  %v6760_v39 = vpop.permute.xlu0 %1068  ;;  %v9761_v26 = vld [vmem:[#allocation78_spill] sm:$0xff] }
 0x1f3   : > { %9738 = vst [vmem:[#allocation45_spill] sm:$0xff] %v6760_v39  ;;  %1277 = vrot.lane.b32.xlu1 %v5907_v31, %s5336_s20 }
 0x1f4   : > { %1275 = vrot.lane.b32.xlu0 %v9654_v57, %s5336_s20 }
 0x1f5   : > { %v6766_v23 = vpop.permute.xlu1 %1074 }
 0x1f6   : > { %9739 = vst [vmem:[#allocation46_spill] sm:$0xff] %v6766_v23  ;;  %v6768_v61 = vpop.permute.xlu0 %1072  ;;  %v9760_v23 = vld [vmem:[#allocation77_spill] sm:$0xff] }
 0x1f7   : > { %9740 = vst [vmem:[#allocation32_spill] sm:$0xff] %v6768_v61  ;;  %1180 = vrot.lane.b32.xlu1 %v9741_v34, %s5335_s9  ;;  %v9753_v34 = vld [vmem:[#allocation107_spill] sm:$0xff] }
 0x1f8   : > { %1178 = vrot.lane.b32.xlu0 %v9742_v62, %s5335_s9  ;;  %v1126_v62 = vrot.slane %v6522_v60, 1 }
 0x1f9   : > { %v6774_v1 = vpop.permute.xlu1 %1078 }
 0x1fa   : > { %9743 = vst [vmem:[#allocation33_spill] sm:$0xff] %v6774_v1  ;;  %v6776_v30 = vpop.permute.xlu0 %1076  ;;  %v1127_v15 = vsel %vm371_vm0, %v1125_v11, %v1126_v62  ;;  %v9759_v1 = vld [vmem:[#allocation52_spill] sm:$0xff] }
 0x1fb   : > { %9744 = vst [vmem:[#allocation34_spill] sm:$0xff] %v6776_v30  ;;  %1281 = vrot.lane.b32.xlu1 %v5924_v35, %s5336_s20  ;;  %v5296_v30 = vld [vmem:[%s5392_s26] sm:$0xff] }
 0x1fc   : > { %1279 = vrot.lane.b32.xlu0 %v5931_v63, %s5336_s20  ;;  %v316_v63 = vld [vmem:[%s5392_s26 + $0x1a8] sm:$0x3]  ;;  %v1328_v61 = vsel %vm1327_vm2, %v5296_v30, %v9759_v1 }
 0x1fd   : > { %v6782_v31 = vpop.permute.xlu1 %1082  ;;  %v1361_v47 = vsel %vm1360_vm3, %v1328_v61, %v9761_v26  ;;  %v5298_v26 = vld [vmem:[%s5392_s26 + $0x20] sm:$0xff]  ;;  %v9765_v61 = vld [vmem:[#allocation53_spill] sm:$0xff] }
 0x1fe   : > { %9745 = vst [vmem:[#allocation35_spill] sm:$0xff] %v6782_v31  ;;  %v6784_v57 = vpop.permute.xlu0 %1080 }
 0x1ff   : > { %9746 = vst [vmem:[#allocation138_spill] sm:$0xff] %v6784_v57  ;;  %1184 = vrot.lane.b32.xlu1 %v9747_v52, %s5335_s9  ;;  %v9754_v52 = vld [vmem:[#allocation109_spill] sm:$0xff]  ;;  %v5295_v57 = vld [vmem:[%s5392_s26 + $0x8] sm:$0xff] }
 0x200   : > { %1182 = vrot.lane.b32.xlu0 %v9748_v32, %s5335_s9  ;;  %v1128_v32 = vrot.slane %v316_v63, 1  ;;  %v1329_v31 = vsel %vm1327_vm2, %v5295_v57, %v9758_v22  ;;  %v1330_v22 = vsel %vm1327_vm2, %v5297_v54, %v9763_v41  ;;  %v9764_v57 = vld [vmem:[#allocation104_spill] sm:$0xff]  ;;  %v9766_v41 = vld [vmem:[#allocation79_spill] sm:$0xff] }
 0x201   : > { %v6790_v10 = vpop.permute.xlu1 %1086  ;;  %v1362_v39 = vsel %vm1360_vm3, %v1329_v31, %v9760_v23  ;;  %v9767_v54 = vld [vmem:[#allocation80_spill] sm:$0xff] }
 0x202   : > { %9749 = vst [vmem:[#allocation36_spill] sm:$0xff] %v6790_v10  ;;  %v6792_v28 = vpop.permute.xlu0 %1084 }
 0x203   : > { %9750 = vst [vmem:[#allocation37_spill] sm:$0xff] %v6792_v28  ;;  %1285 = vrot.lane.b32.xlu1 %v5941_v58, %s5336_s20 }
 0x204   : > { %1283 = vrot.lane.b32.xlu0 %v5946_v44, %s5336_s20  ;;  %v1227_v44 = vrot.slane %v6522_v60, 2 }
 0x205   : > { %v6798_v35 = vpop.permute.xlu1 %1090 }
 0x206   : > { %9751 = vst [vmem:[#allocation139_spill] sm:$0xff] %v6798_v35  ;;  %v6801_v21 = vpop.permute.xlu0 %1088  ;;  %v1226_v35 = vrot.slane %v6527_v3, 2 }
 0x207   : > { %9752 = vst [vmem:[#allocation140_spill] sm:$0xff] %v6801_v21  ;;  %1188 = vrot.lane.b32.xlu1 %v9753_v34, %s5335_s9  ;;  %v1129_v34 = vsel %vm371_vm0, %v1126_v62, %v1128_v32  ;;  %v1229_v21 = vrot.slane %v316_v63, 2 }
 0x208   : > { %1186 = vrot.lane.b32.xlu0 %v9754_v52, %s5335_s9 }
 0x209   : > { %v1133_v58 = vpop.permute.xlu1 %1132 }
 0x20a   : > { %v6809_v46 = vpop.permute.xlu0 %1130 }
 0x20b   : > { %1289 = vrot.lane.b32.xlu1 %v6388_v0, %s5336_s20  ;;  %v1230_v0 = vsel %vm548_vm1, %v1227_v44, %v1229_v21 }
 0x20c   : > { %1287 = vrot.lane.b32.xlu0 %v6393_v16, %s5336_s20  ;;  %v1228_v16 = vsel %vm548_vm1, %v1226_v35, %v1227_v44 }
 0x20d   : > { %v6818_v52 = vpop.permute.xlu1 %1136 }
 0x20e   : > { %v6821_v28 = vpop.permute.xlu0 %1134 }
 0x20f   : > { %1192 = vrot.lane.b32.xlu1 %v1129_v34, %s5335_s9 }
 0x210   : > { %1190 = vrot.lane.b32.xlu0 %v1127_v15, %s5335_s9 }
 0x211   : > { %v6826_v60 = vpop.permute.xlu1 %1140 }
 0x212   : > { %v6829_v32 = vpop.permute.xlu0 %1138 }
 0x213   : > { %1293 = vrot.lane.b32.xlu1 %v1230_v0, %s5336_s20 }
 0x214   : > { %1291 = vrot.lane.b32.xlu0 %v1228_v16, %s5336_s20 }
 0x215   : > { %v6833_v3 = vpop.permute.xlu1 %1144 }
 0x216   : > { %v6835_v11 = vpop.permute.xlu0 %1142 }
 0x219   : > { %v6837_v63 = vpop.permute.xlu1 %1148 }
 0x21a   : > { %v6839_v15 = vpop.permute.xlu0 %1146 }
 0x21d   : > { %v6841_v21 = vpop.permute.xlu1 %1152 }
 0x21e   : > { %v6843_v62 = vpop.permute.xlu0 %1150 }
 0x221   : > { %v6845_v35 = vpop.permute.xlu1 %1156 }
 0x222   : > { %v6847_v44 = vpop.permute.xlu0 %1154 }
 0x225   : > { %v6849_v34 = vpop.permute.xlu1 %1160 }
 0x226   : > { %v6851_v0 = vpop.permute.xlu0 %1158 }
 0x229   : > { %v6853_v16 = vpop.permute.xlu1 %1164 }
 0x22a   : > { %v6855_v56 = vpop.permute.xlu0 %1162 }
 0x22b   : > { %9755 = vst [vmem:[#allocation107_spill] sm:$0xff] %v6855_v56  ;;  %v1394_v56 = vsel %vm1393_vm4, %v1361_v47, %v9764_v57  ;;  %v9768_v57 = vld [vmem:[#allocation105_spill] sm:$0xff] }
 0x22d   : > { %v6857_v10 = vpop.permute.xlu1 %1168 }
 0x22e   : > { %9756 = vst [vmem:[#allocation109_spill] sm:$0xff] %v6857_v10  ;;  %v6859_v24 = vpop.permute.xlu0 %1166  ;;  %v1395_v10 = vsel %vm1393_vm4, %v1362_v39, %v9762_v33  ;;  %v1331_v33 = vsel %vm1327_vm2, %v5298_v26, %v9765_v61  ;;  %v1427_v39 = vsel %vm1426_vm6, %v1394_v56, %v6370_v55  ;;  %v9769_v26 = vld [vmem:[#allocation106_spill] sm:$0xff]  ;;  %v9770_v61 = vld [vmem:[#allocation47_spill] sm:$0xff] }
 0x22f   : > { %9757 = vst [vmem:[#allocation141_spill] sm:$0xff] %v6859_v24  ;;  %v1428_v1 = vsel %vm1426_vm6, %v1395_v10, %v6368_v27  ;;  %v1364_v47 = vsel %vm1360_vm3, %v1331_v33, %v9766_v41  ;;  %v1363_v27 = vsel %vm1360_vm3, %v1330_v22, %v9767_v54  ;;  %v1460_v31 = vsel %vm1459_vm7, %v1427_v39, %v6507_v40  ;;  %v9771_v41 = vld [vmem:[#allocation55_spill] sm:$0xff] }
 0x230   : > { %v1461_v30 = vsel %vm1459_vm7, %v1428_v1, %v6505_v38  ;;  %v1397_v55 = vsel %vm1393_vm4, %v1364_v47, %v9768_v57  ;;  %v1493_v38 = vsel %vm1492_vm8, %v1460_v31, %v6680_v14  ;;  %v1396_v22 = vsel %vm1393_vm4, %v1363_v27, %v9769_v26  ;;  %v9772_v47 = vld [vmem:[#allocation48_spill] sm:$0xff] }
 0x231   : > { %v6873_v24 = vpop.permute.xlu1 %1172  ;;  %v1494_v10 = vsel %vm1492_vm8, %v1461_v30, %v6678_v43  ;;  %v1430_v40 = vsel %vm1426_vm6, %v1397_v55, %v9770_v61  ;;  %v1526_v43 = vsel %vm1525_vm9, %v1493_v38, %v6809_v46  ;;  %v5299_v30 = vld [vmem:[%s5392_s26 + $0x38] sm:$0xff]  ;;  %v5300_v31 = vld [vmem:[%s5392_s26 + $0x30] sm:$0xff] }
 0x232   : > { %v6882_v23 = vpop.permute.xlu0 %1170  ;;  %v1527_v56 = vsel %vm1525_vm9, %v1494_v10, %v1133_v58  ;;  %v1333_v14 = vsel %vm1327_vm2, %v5299_v30, %v9771_v41  ;;  %v1429_v58 = vsel %vm1426_vm6, %v1396_v22, %v9772_v47  ;;  %v1463_v54 = vsel %vm1459_vm7, %v1430_v40, %v6513_v20  ;;  %v9773_v10 = vld [vmem:[#allocation56_spill] sm:$0xff]  ;;  %v9774_v46 = vld [vmem:[#allocation81_spill] sm:$0xff] }
 0x233   : > { %v1332_v57 = vsel %vm1327_vm2, %v5300_v31, %v9773_v10  ;;  %v1366_v55 = vsel %vm1360_vm3, %v1333_v14, %v9774_v46  ;;  %v1462_v38 = vsel %vm1459_vm7, %v1429_v58, %v6515_v13  ;;  %v9776_v26 = vld [vmem:[#allocation108_spill] sm:$0xff] }
 0x234   : > { %v1399_v22 = vsel %vm1393_vm4, %v1366_v55, %v9776_v26  ;;  %v1495_v61 = vsel %vm1492_vm8, %v1462_v38, %v6688_v45  ;;  %v5301_v47 = vld [vmem:[%s5392_s26 + $0x50] sm:$0xff]  ;;  %v9778_v45 = vld [vmem:[#allocation57_spill] sm:$0xff]  ;;  %v9782_v55 = vld [vmem:[#allocation111_spill] sm:$0xff] }
 0x235   : > { %v1234_v1 = vpop.permute.xlu1 %1233  ;;  %v1528_v30 = vsel %vm1525_vm9, %v1495_v61, %v6821_v28  ;;  %v1335_v58 = vsel %vm1327_vm2, %v5301_v47, %v9778_v45  ;;  %v9780_v28 = vld [vmem:[#allocation83_spill] sm:$0xff] }
 0x236   : > { %v1560_v33 = vsel %vm1558_vm10, %v1527_v56, %v1234_v1  ;;  %v1232_v39 = vpop.permute.xlu0 %1231  ;;  %v1496_v56 = vsel %vm1492_vm8, %v1463_v54, %v6686_v9  ;;  %v9775_v1 = vld [vmem:[#allocation82_spill] sm:$0xff]  ;;  %v1368_v10 = vsel %vm1360_vm3, %v1335_v58, %v9780_v28  ;;  %v9791_v28 = vld [vmem:[#allocation51_spill] sm:$0xff] }
 0x237   : > { %v1559_v27 = vsel %vm1558_vm10, %v1526_v43, %v1232_v39  ;;  %v1365_v20 = vsel %vm1360_vm3, %v1332_v57, %v9775_v1  ;;  %v1529_v40 = vsel %vm1525_vm9, %v1496_v56, %v6818_v52  ;;  %v9777_v43 = vld [vmem:[#allocation110_spill] sm:$0xff]  ;;  %v1432_v39 = vsel %vm1426_vm6, %v1399_v22, %v6390_v25 }
 0x238   : > { %5124 = vmatprep.mubr.msk.f32.mxu0 %vm1597_vm11, %v1559_v27  ;;  %v1398_v9 = vsel %vm1393_vm4, %v1365_v20, %v9777_v43  ;;  %v5302_v27 = vld [vmem:[%s5392_s26 + $0x48] sm:$0xff]  ;;  %v9779_v25 = vld [vmem:[#allocation58_spill] sm:$0xff]  ;;  %v1401_v38 = vsel %vm1393_vm4, %v1368_v10, %v9782_v55  ;;  %v9783_v20 = vld [vmem:[#allocation112_spill] sm:$0xff] }
 0x239   : > { %5125 = vmatmul.mubr.msk.f32.vlgmr.msra.gmra.mrb[0].mxu0 %vm1597_vm11, %v1560_v33  ;;  %v1238_v13 = vpop.permute.xlu1 %1237  ;;  %v1431_v52 = vsel %vm1426_vm6, %v1398_v9, %v6395_v37  ;;  %v1465_v33 = vsel %vm1459_vm7, %v1432_v39, %v6524_v42  ;;  %v1334_v31 = vsel %vm1327_vm2, %v5302_v27, %v9779_v25  ;;  %v9781_v37 = vld [vmem:[#allocation84_spill] sm:$0xff]  ;;  %v1434_v26 = vsel %vm1426_vm6, %v1401_v38, %v6401_v29 }
 0x23a   : > { %v1562_v41 = vsel %vm1558_vm10, %v1529_v40, %v1238_v13  ;;  %v1236_v14 = vpop.permute.xlu0 %1235  ;;  %v1464_v57 = vsel %vm1459_vm7, %v1431_v52, %v6529_v49  ;;  %v1498_v46 = vsel %vm1492_vm8, %v1465_v33, %v6694_v5  ;;  %v1367_v42 = vsel %vm1360_vm3, %v1334_v31, %v9781_v37  ;;  %v5303_v13 = vld [vmem:[%s5392_s26 + $0x68] sm:$0xff]  ;;  %v9786_v29 = vld [vmem:[#allocation60_spill] sm:$0xff]  ;;  %v9788_v52 = vld [vmem:[#allocation86_spill] sm:$0xff] }
 0x23b   : > { %v1561_v54 = vsel %vm1558_vm10, %v1528_v30, %v1236_v14  ;;  %v1497_v56 = vsel %vm1492_vm8, %v1464_v57, %v6696_v2  ;;  %v1531_v1 = vsel %vm1525_vm9, %v1498_v46, %v6826_v60  ;;  %v1400_v5 = vsel %vm1393_vm4, %v1367_v42, %v9783_v20  ;;  %v9784_v2 = vld [vmem:[#allocation59_spill] sm:$0xff]  ;;  %v9785_v60 = vld [vmem:[#allocation49_spill] sm:$0xff]  ;;  %v9790_v31 = vld [vmem:[#allocation114_spill] sm:$0xff] }
 0x23c   : > { %5127 = vmatprep.mubr.msk.f32.mxu0 %vm1597_vm11, %v1561_v54  ;;  %v1530_v22 = vsel %vm1525_vm9, %v1497_v56, %v6829_v32  ;;  %v1337_v43 = vsel %vm1327_vm2, %v5303_v13, %v9784_v2  ;;  %v1433_v9 = vsel %vm1426_vm6, %v1400_v5, %v9785_v60  ;;  %v1467_v39 = vsel %vm1459_vm7, %v1434_v26, %v6535_v8  ;;  %v9787_v32 = vld [vmem:[#allocation85_spill] sm:$0xff]  ;;  %v5305_v42 = vld [vmem:[%s5392_s26 + $0x80] sm:$0xff]  ;;  %v9798_v2 = vld [vmem:[#allocation88_spill] sm:$0xff] }
 0x23d   : > { %5128 = vmatmul.mubr.msk.f32.gmra.mrb[2].mxu0 %vm1597_vm11, %v1562_v41  ;;  %v1242_v49 = vpop.permute.xlu1 %1241  ;;  %v5304_v41 = vld [vmem:[%s5392_s26 + $0x60] sm:$0xff]  ;;  %v1370_v47 = vsel %vm1360_vm3, %v1337_v43, %v9787_v32  ;;  %v1466_v45 = vsel %vm1459_vm7, %v1433_v9, %v6537_v50  ;;  %v1500_v58 = vsel %vm1492_vm8, %v1467_v39, %v6702_v51  ;;  %v9789_v33 = vld [vmem:[#allocation113_spill] sm:$0xff]  ;;  %v9799_v60 = vld [vmem:[#allocation115_spill] sm:$0xff] }
 0x23e   : > { %v1564_v61 = vsel %vm1558_vm10, %v1531_v1, %v1242_v49  ;;  %v1240_v40 = vpop.permute.xlu0 %1239  ;;  %v1336_v14 = vsel %vm1327_vm2, %v5304_v41, %v9786_v29  ;;  %v1403_v54 = vsel %vm1393_vm4, %v1370_v47, %v9789_v33  ;;  %v1499_v27 = vsel %vm1492_vm8, %v1466_v45, %v6704_v17  ;;  %v9792_v17 = vld [vmem:[#allocation61_spill] sm:$0xff]  ;;  %v9794_v56 = vld [vmem:[#allocation22_spill] sm:$0xff]  ;;  %v9800_v29 = vld [vmem:[#allocation116_spill] sm:$0xff] }
 0x23f   : > { %v1563_v30 = vsel %vm1558_vm10, %v1530_v22, %v1240_v40  ;;  %v1369_v8 = vsel %vm1360_vm3, %v1336_v14, %v9788_v52  ;;  %v1533_v25 = vsel %vm1525_vm9, %v1500_v58, %v6833_v3  ;;  %v1436_v10 = vsel %vm1426_vm6, %v1403_v54, %v9791_v28  ;;  %v9793_v3 = vld [vmem:[#allocation125_spill] sm:$0xff]  ;;  %v9795_v5 = vld [vmem:[#allocation62_spill] sm:$0xff] }
 0x240   : > { %5130 = vmatprep.mubr.msk.f32.mxu0 %vm1597_vm11, %v1563_v30  ;;  %v1402_v51 = vsel %vm1393_vm4, %v1369_v8, %v9790_v31  ;;  %v1532_v57 = vsel %vm1525_vm9, %v1499_v27, %v6835_v11  ;;  %v1339_v55 = vsel %vm1327_vm2, %v5305_v42, %v9792_v17  ;;  %v1469_v1 = vsel %vm1459_vm7, %v1436_v10, %v9794_v56  ;;  %v5306_v20 = vld [vmem:[%s5392_s26 + $0x78] sm:$0xff]  ;;  %v9796_v11 = vld [vmem:[#allocation87_spill] sm:$0xff]  ;;  %v9801_v14 = vld [vmem:[#allocation126_spill] sm:$0xff] }
 0x241   : > { %5131 = vmatmul.mubr.msk.f32.gmra.mrb[4].mxu0 %vm1597_vm11, %v1564_v61  ;;  %v1246_v50 = vpop.permute.xlu1 %1245  ;;  %v1435_v38 = vsel %vm1426_vm6, %v1402_v51, %v9793_v3  ;;  %v1338_v26 = vsel %vm1327_vm2, %v5306_v20, %v9795_v5  ;;  %v1372_v22 = vsel %vm1360_vm3, %v1339_v55, %v9796_v11  ;;  %v9797_v61 = vld [vmem:[#allocation23_spill] sm:$0xff]  ;;  %v1502_v13 = vsel %vm1492_vm8, %v1469_v1, %v6710_v19  ;;  %v5307_v52 = vld [vmem:[%s5392_s26 + $0x98] sm:$0xff]  ;;  %v9804_v54 = vld [vmem:[#allocation26_spill] sm:$0xff] }
 0x242   : > { %v1566_v46 = vsel %vm1558_vm10, %v1533_v25, %v1246_v50  ;;  %v1244_v37 = vpop.permute.xlu0 %1243  ;;  %v1468_v40 = vsel %vm1459_vm7, %v1435_v38, %v9797_v61  ;;  %v1371_v43 = vsel %vm1360_vm3, %v1338_v26, %v9798_v2  ;;  %v1405_v9 = vsel %vm1393_vm4, %v1372_v22, %v9799_v60  ;;  %v5308_v50 = vld [vmem:[%s5392_s26 + $0x90] sm:$0xff]  ;;  %v9807_v10 = vld [vmem:[#allocation27_spill] sm:$0xff]  ;;  %v9809_v17 = vld [vmem:[#allocation38_spill] sm:$0xff] }
 0x243   : > { %v1565_v49 = vsel %vm1558_vm10, %v1532_v57, %v1244_v37  ;;  %v1501_v39 = vsel %vm1492_vm8, %v1468_v40, %v6712_v6  ;;  %v1535_v30 = vsel %vm1525_vm9, %v1502_v13, %v6837_v63  ;;  %v1404_v19 = vsel %vm1393_vm4, %v1371_v43, %v9800_v29  ;;  %v9802_v6 = vld [vmem:[#allocation63_spill] sm:$0xff]  ;;  %v9805_v31 = vld [vmem:[#allocation64_spill] sm:$0xff]  ;;  %v9808_v37 = vld [vmem:[#allocation90_spill] sm:$0xff] }
 0x244   : > { %5133 = vmatprep.mubr.msk.f32.mxu0 %vm1597_vm11, %v1565_v49  ;;  %v1438_v32 = vsel %vm1426_vm6, %v1405_v9, %v9801_v14  ;;  %v1534_v47 = vsel %vm1525_vm9, %v1501_v39, %v6839_v15  ;;  %v1341_v8 = vsel %vm1327_vm2, %v5307_v52, %v9802_v6  ;;  %v9803_v63 = vld [vmem:[#allocation127_spill] sm:$0xff]  ;;  %v1340_v51 = vsel %vm1327_vm2, %v5308_v50, %v9805_v31  ;;  %v9806_v15 = vld [vmem:[#allocation89_spill] sm:$0xff]  ;;  %v9811_v49 = vld [vmem:[#allocation128_spill] sm:$0xff] }
 0x245   : > { %5134 = vmatmul.mubr.msk.f32.gmra.mrb[6].mxu0 %vm1597_vm11, %v1566_v46  ;;  %v1250_v41 = vpop.permute.xlu1 %1249  ;;  %v1437_v33 = vsel %vm1426_vm6, %v1404_v19, %v9803_v63  ;;  %v1471_v27 = vsel %vm1459_vm7, %v1438_v32, %v9804_v54  ;;  %v1374_v28 = vsel %vm1360_vm3, %v1341_v8, %v9806_v15  ;;  %v1373_v42 = vsel %vm1360_vm3, %v1340_v51, %v9808_v37  ;;  %v9810_v1 = vld [vmem:[#allocation117_spill] sm:$0xff]  ;;  %v5309_v22 = vld [vmem:[%s5392_s26 + $0xb0] sm:$0xff]  ;;  %v9814_v13 = vld [vmem:[#allocation2_spill] sm:$0xff] }
 0x246   : > { %v1568_v45 = vsel %vm1558_vm10, %v1535_v30, %v1250_v41  ;;  %v1248_v58 = vpop.permute.xlu0 %1247  ;;  %v1470_v57 = vsel %vm1459_vm7, %v1437_v33, %v9807_v10  ;;  %v1504_v46 = vsel %vm1492_vm8, %v1471_v27, %v6718_v4  ;;  %v1407_v55 = vsel %vm1393_vm4, %v1374_v28, %v9809_v17  ;;  %v5310_v60 = vld [vmem:[%s5392_s26 + $0xa8] sm:$0xff]  ;;  %v9815_v9 = vld [vmem:[#allocation66_spill] sm:$0xff]  ;;  %v9818_v14 = vld [vmem:[#allocation92_spill] sm:$0xff] }
 0x247   : > { %v1567_v25 = vsel %vm1558_vm10, %v1534_v47, %v1248_v58  ;;  %v1503_v3 = vsel %vm1492_vm8, %v1470_v57, %v6720_v53  ;;  %v1537_v38 = vsel %vm1525_vm9, %v1504_v46, %v6841_v21  ;;  %v1406_v4 = vsel %vm1393_vm4, %v1373_v42, %v9810_v1  ;;  %v9812_v53 = vld [vmem:[#allocation65_spill] sm:$0xff]  ;;  %v9817_v41 = vld [vmem:[#allocation3_spill] sm:$0xff]  ;;  %v9820_v8 = vld [vmem:[#allocation118_spill] sm:$0xff] }
 0x248   : > { %5136 = vmatprep.mubr.msk.f32.mxu0 %vm1597_vm11, %v1567_v25  ;;  %v1440_v20 = vsel %vm1426_vm6, %v1407_v55, %v9811_v49  ;;  %v1536_v5 = vsel %vm1525_vm9, %v1503_v3, %v6843_v62  ;;  %v1343_v61 = vsel %vm1327_vm2, %v5309_v22, %v9812_v53  ;;  %v9813_v21 = vld [vmem:[#allocation129_spill] sm:$0xff]  ;;  %v1342_v39 = vsel %vm1327_vm2, %v5310_v60, %v9815_v9  ;;  %v9816_v62 = vld [vmem:[#allocation91_spill] sm:$0xff]  ;;  %v9821_v63 = vld [vmem:[#allocation130_spill] sm:$0xff] }
 0x249   : > { %5137 = vmatmul.mubr.msk.f32.gmra.mrb[8].mxu0 %vm1597_vm11, %v1568_v45  ;;  %v1254_v56 = vpop.permute.xlu1 %1253  ;;  %v1439_v40 = vsel %vm1426_vm6, %v1406_v4, %v9813_v21  ;;  %v1473_v2 = vsel %vm1459_vm7, %v1440_v20, %v9814_v13  ;;  %v1376_v30 = vsel %vm1360_vm3, %v1343_v61, %v9816_v62  ;;  %v1375_v32 = vsel %vm1360_vm3, %v1342_v39, %v9818_v14  ;;  %v9819_v47 = vld [vmem:[#allocation39_spill] sm:$0xff]  ;;  %v9824_v15 = vld [vmem:[#allocation4_spill] sm:$0xff]  ;;  %v5312_v57 = vld [vmem:[%s5392_s26 + $0xc0] sm:$0xff] }
 0x24a   : > { %v1570_v26 = vsel %vm1558_vm10, %v1537_v38, %v1254_v56  ;;  %v1252_v11 = vpop.permute.xlu0 %1251  ;;  %v1472_v29 = vsel %vm1459_vm7, %v1439_v40, %v9817_v41  ;;  %v1506_v19 = vsel %vm1492_vm8, %v1473_v2, %v6726_v12  ;;  %v1409_v45 = vsel %vm1393_vm4, %v1376_v30, %v9819_v47  ;;  %v5311_v50 = vld [vmem:[%s5392_s26 + $0xc8] sm:$0xff]  ;;  %v9825_v46 = vld [vmem:[#allocation68_spill] sm:$0xff]  ;;  %v9827_v17 = vld [vmem:[#allocation5_spill] sm:$0xff] }
 0x24b   : > { %v1569_v43 = vsel %vm1558_vm10, %v1536_v5, %v1252_v11  ;;  %v1505_v58 = vsel %vm1492_vm8, %v1472_v29, %v6728_v48  ;;  %v1539_v52 = vsel %vm1525_vm9, %v1506_v19, %v6845_v35  ;;  %v1408_v12 = vsel %vm1393_vm4, %v1375_v32, %v9820_v8  ;;  %v9822_v48 = vld [vmem:[#allocation67_spill] sm:$0xff]  ;;  %v9828_v38 = vld [vmem:[#allocation94_spill] sm:$0xff]  ;;  %v9829_v1 = vld [vmem:[#allocation40_spill] sm:$0xff] }
 0x24c   : > { %5139 = vmatprep.mubr.msk.f32.mxu0 %vm1597_vm11, %v1569_v43  ;;  %v1442_v33 = vsel %vm1426_vm6, %v1409_v45, %v9821_v63  ;;  %v1538_v54 = vsel %vm1525_vm9, %v1505_v58, %v6847_v44  ;;  %v1345_v31 = vsel %vm1327_vm2, %v5311_v50, %v9822_v48  ;;  %v9823_v35 = vld [vmem:[#allocation131_spill] sm:$0xff]  ;;  %v1344_v37 = vsel %vm1327_vm2, %v5312_v57, %v9825_v46  ;;  %v9826_v44 = vld [vmem:[#allocation93_spill] sm:$0xff]  ;;  %v9831_v11 = vld [vmem:[#allocation132_spill] sm:$0xff] }
 0x24d   : > { %5140 = vmatmul.mubr.msk.f32.gmra.mrb[10].mxu0 %vm1597_vm11, %v1570_v26  ;;  %v1258_v6 = vpop.permute.xlu1 %1257  ;;  %v1441_v51 = vsel %vm1426_vm6, %v1408_v12, %v9823_v35  ;;  %v1475_v28 = vsel %vm1459_vm7, %v1442_v33, %v9824_v15  ;;  %v1378_v42 = vsel %vm1360_vm3, %v1345_v31, %v9826_v44  ;;  %v1377_v56 = vsel %vm1360_vm3, %v1344_v37, %v9828_v38  ;;  %v9830_v26 = vld [vmem:[#allocation119_spill] sm:$0xff]  ;;  %v5313_v40 = vld [vmem:[%s5392_s26 + $0xe0] sm:$0xff]  ;;  %v5314_v39 = vld [vmem:[%s5392_s26 + $0xd8] sm:$0xff] }
 0x24e   : > { %v1572_v27 = vsel %vm1558_vm10, %v1539_v52, %v1258_v6  ;;  %v1256_v25 = vpop.permute.xlu0 %1255  ;;  %v1474_v55 = vsel %vm1459_vm7, %v1441_v51, %v9827_v17  ;;  %v1508_v3 = vsel %vm1492_vm8, %v1475_v28, %v6734_v36  ;;  %v1411_v4 = vsel %vm1393_vm4, %v1378_v42, %v9829_v1  ;;  %v9834_v43 = vld [vmem:[#allocation6_spill] sm:$0xff]  ;;  %v9837_v29 = vld [vmem:[#allocation7_spill] sm:$0xff]  ;;  %v9838_v32 = vld [vmem:[#allocation96_spill] sm:$0xff] }
 0x24f   : > { %v1571_v10 = vsel %vm1558_vm10, %v1538_v54, %v1256_v25  ;;  %v1507_v49 = vsel %vm1492_vm8, %v1474_v55, %v6736_v59  ;;  %v1541_v20 = vsel %vm1525_vm9, %v1508_v3, %v6849_v34  ;;  %v1410_v36 = vsel %vm1393_vm4, %v1377_v56, %v9830_v26  ;;  %v9832_v59 = vld [vmem:[#allocation69_spill] sm:$0xff]  ;;  %v9835_v62 = vld [vmem:[#allocation70_spill] sm:$0xff]  ;;  %v9840_v12 = vld [vmem:[#allocation120_spill] sm:$0xff] }
 0x250   : > { %5142 = vmatprep.mubr.msk.f32.mxu0 %vm1597_vm11, %v1571_v10  ;;  %v1444_v22 = vsel %vm1426_vm6, %v1411_v4, %v9831_v11  ;;  %v1540_v53 = vsel %vm1525_vm9, %v1507_v49, %v6851_v0  ;;  %v1347_v13 = vsel %vm1327_vm2, %v5313_v40, %v9832_v59  ;;  %v9833_v34 = vld [vmem:[#allocation133_spill] sm:$0xff]  ;;  %v1346_v30 = vsel %vm1327_vm2, %v5314_v39, %v9835_v62  ;;  %v9836_v0 = vld [vmem:[#allocation95_spill] sm:$0xff]  ;;  %v9841_v63 = vld [vmem:[#allocation134_spill] sm:$0xff] }
 0x251   : > { %5143 = vmatmul.mubr.msk.f32.gmra.mrb[12].mxu0 %vm1597_vm11, %v1572_v27  ;;  %v1262_v5 = vpop.permute.xlu1 %1261  ;;  %v1443_v2 = vsel %vm1426_vm6, %v1410_v36, %v9833_v34  ;;  %v1477_v60 = vsel %vm1459_vm7, %v1444_v22, %v9834_v43  ;;  %v1380_v41 = vsel %vm1360_vm3, %v1347_v13, %v9836_v0  ;;  %v1379_v47 = vsel %vm1360_vm3, %v1346_v30, %v9838_v32  ;;  %v9839_v45 = vld [vmem:[#allocation41_spill] sm:$0xff]  ;;  %v9842_v54 = vld [vmem:[#allocation107_spill] sm:$0xff]  ;;  %v9845_v51 = vld [vmem:[#allocation8_spill] sm:$0xff] }
 0x252   : > { %v1574_v61 = vsel %vm1558_vm10, %v1541_v20, %v1262_v5  ;;  %v1260_v21 = vpop.permute.xlu0 %1259  ;;  %v1476_v19 = vsel %vm1459_vm7, %v1443_v2, %v9837_v29  ;;  %v1510_v14 = vsel %vm1492_vm8, %v1477_v60, %v6742_v7  ;;  %v1413_v58 = vsel %vm1393_vm4, %v1380_v41, %v9839_v45  ;;  %v5315_v48 = vld [vmem:[%s5392_s26 + $0xf8] sm:$0xff]  ;;  %v5316_v10 = vld [vmem:[%s5392_s26 + $0xf0] sm:$0xff]  ;;  %v9849_v55 = vld [vmem:[#allocation30_spill] sm:$0xff] }
 0x253   : > { %v1573_v9 = vsel %vm1558_vm10, %v1540_v53, %v1260_v21  ;;  %v1509_v52 = vsel %vm1492_vm8, %v1476_v19, %v6744_v18  ;;  %v1543_v6 = vsel %vm1525_vm9, %v1510_v14, %v6853_v16  ;;  %v1412_v7 = vsel %vm1393_vm4, %v1379_v47, %v9840_v12  ;;  %v9843_v18 = vld [vmem:[#allocation71_spill] sm:$0xff]  ;;  %v9846_v57 = vld [vmem:[#allocation72_spill] sm:$0xff]  ;;  %v9847_v37 = vld [vmem:[#allocation97_spill] sm:$0xff] }
 0x254   : > { %5145 = vmatprep.mubr.msk.f32.mxu0 %vm1597_vm11, %v1573_v9  ;;  %v1446_v33 = vsel %vm1426_vm6, %v1413_v58, %v9841_v63  ;;  %v1542_v27 = vsel %vm1525_vm9, %v1509_v52, %v9842_v54  ;;  %v1349_v31 = vsel %vm1327_vm2, %v5315_v48, %v9843_v18  ;;  %v9844_v16 = vld [vmem:[#allocation135_spill] sm:$0xff]  ;;  %v1348_v46 = vsel %vm1327_vm2, %v5316_v10, %v9846_v57  ;;  %v9848_v42 = vld [vmem:[#allocation9_spill] sm:$0xff]  ;;  %v9850_v38 = vld [vmem:[#allocation98_spill] sm:$0xff] }
 0x255   : > { %5146 = vmatmul.mubr.msk.f32.gmra.mrb[14].mxu0 %vm1597_vm11, %v1574_v61  ;;  %v1266_v8 = vpop.permute.xlu1 %1265  ;;  %v1445_v35 = vsel %vm1426_vm6, %v1412_v7, %v9844_v16  ;;  %v1479_v15 = vsel %vm1459_vm7, %v1446_v33, %v9845_v51  ;;  %v1382_v44 = vsel %vm1360_vm3, %v1349_v31, %v9847_v37  ;;  %v1381_v56 = vsel %vm1360_vm3, %v1348_v46, %v9850_v38  ;;  %v9851_v1 = vld [vmem:[#allocation42_spill] sm:$0xff]  ;;  %v9852_v49 = vld [vmem:[#allocation31_spill] sm:$0xff]  ;;  %v9853_v5 = vld [vmem:[#allocation109_spill] sm:$0xff] }
 0x256   : > { %v1576_v25 = vsel %vm1558_vm10, %v1543_v6, %v1266_v8  ;;  %v1264_v50 = vpop.permute.xlu0 %1263  ;;  %v1478_v17 = vsel %vm1459_vm7, %v1445_v35, %v9848_v42  ;;  %v1512_v3 = vsel %vm1492_vm8, %v1479_v15, %v9849_v55  ;;  %v1415_v4 = vsel %vm1393_vm4, %v1382_v44, %v9851_v1  ;;  %v9854_v11 = vld [vmem:[#allocation121_spill] sm:$0xff]  ;;  %v9855_v53 = vld [vmem:[#allocation136_spill] sm:$0xff]  ;;  %v9858_v43 = vld [vmem:[#allocation10_spill] sm:$0xff] }
 0x257   : > { %v1575_v28 = vsel %vm1558_vm10, %v1542_v27, %v1264_v50  ;;  %v1511_v20 = vsel %vm1492_vm8, %v1478_v17, %v9852_v49  ;;  %v1545_v26 = vsel %vm1525_vm9, %v1512_v3, %v9853_v5  ;;  %v1414_v22 = vsel %vm1393_vm4, %v1381_v56, %v9854_v11  ;;  %v9856_v21 = vld [vmem:[#allocation141_spill] sm:$0xff]  ;;  %v9859_v39 = vld [vmem:[#allocation11_spill] sm:$0xff]  ;;  %v9860_v30 = vld [vmem:[#allocation44_spill] sm:$0xff] }
 0x258   : > { %5148 = vmatprep.mubr.msk.f32.mxu0 %vm1597_vm11, %v1575_v28  ;;  %v1448_v61 = vsel %vm1426_vm6, %v1415_v4, %v9855_v53  ;;  %v1544_v40 = vsel %vm1525_vm9, %v1511_v20, %v9856_v21  ;;  %v9857_v34 = vld [vmem:[#allocation137_spill] sm:$0xff]  ;;  %v5317_v58 = vld [vmem:[%s5392_s26 + $0x110] sm:$0xff]  ;;  %v5318_v12 = vld [vmem:[%s5392_s26 + $0x108] sm:$0xff] }
 0x259   : > { %5149 = vmatmul.mubr.msk.f32.gmra.mrb[16].mxu0 %vm1597_vm11, %v1576_v25  ;;  %v1270_v36 = vpop.permute.xlu1 %1269  ;;  %v1447_v2 = vsel %vm1426_vm6, %v1414_v22, %v9857_v34  ;;  %v1481_v60 = vsel %vm1459_vm7, %v1448_v61, %v9858_v43  ;;  %v9861_v41 = vld [vmem:[#allocation45_spill] sm:$0xff]  ;;  %v9863_v7 = vld [vmem:[#allocation74_spill] sm:$0xff]  ;;  %v9865_v54 = vld [vmem:[#allocation100_spill] sm:$0xff] }
 0x25a   : > { %v1578_v59 = vsel %vm1558_vm10, %v1545_v26, %v1270_v36  ;;  %v1268_v13 = vpop.permute.xlu0 %1267  ;;  %v1480_v62 = vsel %vm1459_vm7, %v1447_v2, %v9859_v39  ;;  %v1514_v0 = vsel %vm1492_vm8, %v1481_v60, %v9860_v30  ;;  %v9862_v52 = vld [vmem:[#allocation73_spill] sm:$0xff]  ;;  %v1350_v63 = vsel %vm1327_vm2, %v5318_v12, %v9863_v7  ;;  %v9866_v27 = vld [vmem:[#allocation43_spill] sm:$0xff]  ;;  %v9867_v48 = vld [vmem:[#allocation122_spill] sm:$0xff] }
 0x25b   : > { %v1577_v9 = vsel %vm1558_vm10, %v1544_v40, %v1268_v13  ;;  %v1513_v29 = vsel %vm1492_vm8, %v1480_v62, %v9861_v41  ;;  %v1547_v19 = vsel %vm1525_vm9, %v1514_v0, %v6873_v24  ;;  %v1351_v6 = vsel %vm1327_vm2, %v5317_v58, %v9862_v52  ;;  %v9864_v24 = vld [vmem:[#allocation99_spill] sm:$0xff]  ;;  %v9868_v31 = vld [vmem:[#allocation14_spill] sm:$0xff]  ;;  %v9870_v28 = vld [vmem:[#allocation12_spill] sm:$0xff] }
 0x25c   : > { %5151 = vmatprep.mubr.msk.f32.mxu0 %vm1597_vm11, %v1577_v9  ;;  %v1546_v32 = vsel %vm1525_vm9, %v1513_v29, %v6882_v23  ;;  %v1384_v33 = vsel %vm1360_vm3, %v1351_v6, %v9864_v24  ;;  %v1383_v23 = vsel %vm1360_vm3, %v1350_v63, %v9865_v54  ;;  %v9869_v51 = vld [vmem:[#allocation15_spill] sm:$0xff]  ;;  %v9871_v57 = vld [vmem:[#allocation13_spill] sm:$0xff]  ;;  %v9872_v37 = vld [vmem:[#allocation46_spill] sm:$0xff] }
 0x25d   : > { %5152 = vmatmul.mubr.msk.f32.gmra.mrb[18].mxu0 %vm1597_vm11, %v1578_v59  ;;  %v1274_v14 = vpop.permute.xlu1 %1273  ;;  %v1417_v25 = vsel %vm1393_vm4, %v1384_v33, %v9866_v27  ;;  %v1416_v18 = vsel %vm1393_vm4, %v1383_v23, %v9867_v48  ;;  %v9873_v42 = vld [vmem:[#allocation32_spill] sm:$0xff]  ;;  %v5319_v4 = vld [vmem:[%s5392_s26 + $0x128] sm:$0xff]  ;;  %v5320_v26 = vld [vmem:[%s5392_s26 + $0x120] sm:$0xff] }
 0x25e   : > { %v1580_v47 = vsel %vm1558_vm10, %v1547_v19, %v1274_v14  ;;  %v1272_v45 = vpop.permute.xlu0 %1271  ;;  %v1450_v16 = vsel %vm1426_vm6, %v1417_v25, %v9868_v31  ;;  %v1449_v15 = vsel %vm1426_vm6, %v1416_v18, %v9869_v51  ;;  %v9874_v49 = vld [vmem:[#allocation75_spill] sm:$0xff]  ;;  %v9875_v36 = vld [vmem:[#allocation76_spill] sm:$0xff]  ;;  %v9876_v22 = vld [vmem:[#allocation101_spill] sm:$0xff] }
 0x25f   : > { %v1579_v8 = vsel %vm1558_vm10, %v1546_v32, %v1272_v45  ;;  %v1483_v10 = vsel %vm1459_vm7, %v1450_v16, %v9870_v28  ;;  %v1482_v46 = vsel %vm1459_vm7, %v1449_v15, %v9871_v57  ;;  %v1353_v20 = vsel %vm1327_vm2, %v5319_v4, %v9874_v49  ;;  %v9877_v61 = vld [vmem:[#allocation102_spill] sm:$0xff]  ;;  %v9878_v40 = vld [vmem:[#allocation123_spill] sm:$0xff]  ;;  %v9879_v34 = vld [vmem:[#allocation124_spill] sm:$0xff] }
 0x260   : > { %5154 = vmatprep.mubr.msk.f32.mxu0 %vm1597_vm11, %v1579_v8  ;;  %v1516_v44 = vsel %vm1492_vm8, %v1483_v10, %v9872_v37  ;;  %v1515_v17 = vsel %vm1492_vm8, %v1482_v46, %v9873_v42  ;;  %v1352_v11 = vsel %vm1327_vm2, %v5320_v26, %v9875_v36  ;;  %v1386_v53 = vsel %vm1360_vm3, %v1353_v20, %v9876_v22  ;;  %v9880_v43 = vld [vmem:[#allocation18_spill] sm:$0xff]  ;;  %v9881_v39 = vld [vmem:[#allocation19_spill] sm:$0xff]  ;;  %v9882_v30 = vld [vmem:[#allocation16_spill] sm:$0xff] }
 0x261   : > { %5155 = vmatmul.mubr.msk.f32.gmra.mrb[20].mxu0 %vm1597_vm11, %v1580_v47  ;;  %v1177_v50 = vpop.permute.xlu1 %1176  ;;  %v1385_v21 = vsel %vm1360_vm3, %v1352_v11, %v9877_v61  ;;  %v1419_v59 = vsel %vm1393_vm4, %v1386_v53, %v9878_v40  ;;  %v9883_v41 = vld [vmem:[#allocation17_spill] sm:$0xff]  ;;  %v9885_v32 = vld [vmem:[#allocation34_spill] sm:$0xff]  ;;  %v9886_v24 = vld [vmem:[#allocation35_spill] sm:$0xff]  ;;  %vm3300_vm2 = vcmask 523264  }
 0x262   : > { %v1175_v35 = vpop.permute.xlu0 %1174  ;;  %v1549_v55 = vsel %vm1525_vm9, %v1516_v44, %v1177_v50  ;;  %v1418_v2 = vsel %vm1393_vm4, %v1385_v21, %v9879_v34  ;;  %v1452_v60 = vsel %vm1426_vm6, %v1419_v59, %v9880_v43  ;;  %v9884_v19 = vld [vmem:[#allocation33_spill] sm:$0xff]  ;;  %v9887_v33 = vld [vmem:[#allocation20_spill] sm:$0xff]  ;;  %v9888_v23 = vld [vmem:[#allocation138_spill] sm:$0xff]  ;;  %vm3339_vm4 = vcmask 588800  }
 0x263   : > { %v1548_v38 = vsel %vm1525_vm9, %v1515_v17, %v1175_v35  ;;  %v1451_v62 = vsel %vm1426_vm6, %v1418_v2, %v9881_v39  ;;  %v1485_v0 = vsel %vm1459_vm7, %v1452_v60, %v9882_v30  ;;  %v1520_v54 = vsel %vm1492_vm8, %v9887_v33, %v9886_v24  ;;  %v9889_v27 = vld [vmem:[#allocation21_spill] sm:$0xff]  ;;  %v9890_v28 = vld [vmem:[#allocation36_spill] sm:$0xff]  ;;  %v9894_v49 = vld [vmem:[#allocation139_spill] sm:$0xff] }
 0x264   : > { %v1484_v29 = vsel %vm1459_vm7, %v1451_v62, %v9883_v41  ;;  %v1518_v14 = vsel %vm1492_vm8, %v1485_v0, %v9884_v19  ;;  %v1519_v25 = vsel %vm1492_vm8, %v9889_v27, %v9888_v23  ;;  %v9891_v10 = vld [vmem:[#allocation24_spill] sm:$0xff]  ;;  %v9892_v46 = vld [vmem:[#allocation37_spill] sm:$0xff]  ;;  %v7346_v2 = vld [vmem:[%s9280_s2] ss:$0 sm:$0xff]  ;;  %vm4709_vm7 = vcmask 1044484  }
 0x265   : > { %v1278_v3 = vpop.permute.xlu1 %1277  ;;  %v1517_v47 = vsel %vm1492_vm8, %v1484_v29, %v9885_v32  ;;  %v1522_v57 = vsel %vm1492_vm8, %v9891_v10, %v9890_v28  ;;  %v9893_v37 = vld [vmem:[#allocation25_spill] sm:$0xff]  ;;  %v9895_v20 = vld [vmem:[#allocation28_spill] sm:$0xff] }
 0x266   : > { %v1582_v56 = vsel %vm1558_vm10, %v1549_v55, %v1278_v3  ;;  %v1276_v1 = vpop.permute.xlu0 %1275  ;;  %v1521_v44 = vsel %vm1492_vm8, %v9893_v37, %v9892_v46  ;;  %v9896_v26 = vld [vmem:[#allocation140_spill] sm:$0xff]  ;;  %v9897_v36 = vld [vmem:[#allocation29_spill] sm:$0xff] }
 0x267   : > { %v1581_v5 = vsel %vm1558_vm10, %v1548_v38, %v1276_v1  ;;  %v1523_v11 = vsel %vm1492_vm8, %v9897_v36, %v9896_v26 }
 0x268   : > { %5157 = vmatprep.mubr.msk.f32.mxu0 %vm1597_vm11, %v1581_v5  ;;  %v1524_v5 = vsel %vm1492_vm8, %v9895_v20, %v9894_v49 }
 0x269   : > { %5158 = vmatmul.mubr.msk.f32.gmra.mrb[22].mxu0 %vm1597_vm11, %v1582_v56  ;;  %v1181_v13 = vpop.permute.xlu1 %1180 }
 0x26a   : > { %v1179_v9 = vpop.permute.xlu0 %1178  ;;  %v1551_v45 = vsel %vm1525_vm9, %v1518_v14, %v1181_v13  ;;  %v9370_v13 = vmov 0.0  }
 0x26b   : > { %v1550_v52 = vsel %vm1525_vm9, %v1517_v47, %v1179_v9  ;;  %v7339_v34 = vrot.slane %v9370_v13, 1 }
 0x26d   : > { %v1282_v58 = vpop.permute.xlu1 %1281  ;;  %9898 = vst [vmem:[#allocation54_spill] sm:$0xff] %v7339_v34  ;;  %2233 = vrot.lane.b32.xlu0 %v7339_v34, %s5330_s28 }
 0x26e   : > { %v1584_v6 = vsel %vm1558_vm10, %v1551_v45, %v1282_v58  ;;  %v1280_v8 = vpop.permute.xlu0 %1279 }
 0x26f   : > { %v1583_v12 = vsel %vm1558_vm10, %v1550_v52, %v1280_v8 }
 0x270   : > { %5160 = vmatprep.mubr.msk.f32.mxu0 %vm1597_vm11, %v1583_v12 }
 0x271   : > { %5161 = vmatmul.mubr.msk.f32.gmra.mrb[24].mxu0 %vm1597_vm11, %v1584_v6  ;;  %v1185_v7 = vpop.permute.xlu1 %1184 }
 0x272   : > { %v1183_v63 = vpop.permute.xlu0 %1182  ;;  %v1553_v50 = vsel %vm1525_vm9, %v1520_v54, %v1185_v7 }
 0x273   : > { %v1552_v18 = vsel %vm1525_vm9, %v1519_v25, %v1183_v63 }
 0x275   : > { %v1286_v48 = vpop.permute.xlu1 %1285 }
 0x276   : > { %v1586_v31 = vsel %vm1558_vm10, %v1553_v50, %v1286_v48  ;;  %v1284_v16 = vpop.permute.xlu0 %1283 }
 0x277   : > { %v1585_v35 = vsel %vm1558_vm10, %v1552_v18, %v1284_v16 }
 0x278   : > { %5163 = vmatprep.mubr.msk.f32.mxu0 %vm1597_vm11, %v1585_v35 }
 0x279   : > { %5164 = vmatmul.mubr.msk.f32.gmra.mrb[26].mxu0 %vm1597_vm11, %v1586_v31  ;;  %v1189_v51 = vpop.permute.xlu1 %1188 }
 0x27a   : > { %v1187_v15 = vpop.permute.xlu0 %1186  ;;  %v1555_v42 = vsel %vm1525_vm9, %v1522_v57, %v1189_v51 }
 0x27b   : > { %v1554_v55 = vsel %vm1525_vm9, %v1521_v44, %v1187_v15 }
 0x27d   : > { %v1290_v17 = vpop.permute.xlu1 %1289 }
 0x27e   : > { %v1588_v3 = vsel %vm1558_vm10, %v1555_v42, %v1290_v17  ;;  %v1288_v38 = vpop.permute.xlu0 %1287 }
 0x27f   : > { %v1587_v56 = vsel %vm1558_vm10, %v1554_v55, %v1288_v38 }
 0x280   : > { %5166 = vmatprep.mubr.msk.f32.mxu0 %vm1597_vm11, %v1587_v56 }
 0x281   : > { %5167 = vmatmul.mubr.msk.f32.gmra.mrb[28].mxu0 %vm1597_vm11, %v1588_v3  ;;  %v1193_v1 = vpop.permute.xlu1 %1192 }
 0x282   : > { %v1191_v4 = vpop.permute.xlu0 %1190  ;;  %v1557_v22 = vsel %vm1525_vm9, %v1524_v5, %v1193_v1 }
 0x283   : > { %v1556_v61 = vsel %vm1525_vm9, %v1523_v11, %v1191_v4  ;;  %vm4711_vm9 = vcmask 1045509  }
 0x285   : > { %v1294_v53 = vpop.permute.xlu1 %1293 }
 0x286   : > { %v1590_v21 = vsel %vm1558_vm10, %v1557_v22, %v1294_v53  ;;  %v1292_v40 = vpop.permute.xlu0 %1291 }
 0x287   : > { %v1589_v59 = vsel %vm1558_vm10, %v1556_v61, %v1292_v40 }
 0x288   : > { %5169 = vmatprep.mubr.msk.f32.mxu0 %vm1597_vm11, %v1589_v59 }
 0x289   : > { %5170 = vmatmul.mubr.msk.f32.gmra.mrb[30].mxu0 %vm1597_vm11, %v1590_v21  ;;  %vm4713_vm11 = vcmask 1046534  }
 0x30c   : > { %v5126_v43 = vpop.f32.mrb[0].mxu0 }
 0x30d   : > { %v1770_v60 = vadd.f32 %v5126_v43, %v7346_v2  ;;  %v1764_v9 = vpop.f32.mrb[1].mxu0 }
 0x30e   : > { %v1765_v39 = vadd.f32 %v7346_v2, %v1764_v9 }
 0x30f   : > { %v1924_v62 = vmax.f32 %v1770_v60, 0.0 }
 0x310   : > { %v1923_v30 = vmax.f32 %v1765_v39, 0.0  ;;  %v5129_v0 = vpop.f32.mrb[2].mxu0 }
 0x311   : > { %v1989_v41 = vrot.slane %v1924_v62, 7  ;;  %v1780_v29 = vadd.f32 %v5129_v0, %v7346_v2  ;;  %v1774_v19 = vpop.f32.mrb[3].mxu0 }
 0x312   : > { %v1988_v14 = vrot.slane %v1923_v30, 7  ;;  %v1775_v32 = vadd.f32 %v7346_v2, %v1774_v19 }
 0x313   : > { %v7353_v47 = vsel %vm1987_vm12, %v1989_v41, 0.0  ;;  %v1926_v45 = vmax.f32 %v1780_v29, 0.0 }
 0x314   : > { %v7356_v58 = vsel %vm1987_vm12, %v1988_v14, %v1989_v41  ;;  %v7359_v52 = vsel %vm1987_vm12, 0.0, %v1988_v14  ;;  %v5132_v6 = vpop.f32.mrb[4].mxu0  ;;  %v2161_v8 = vrot.slane %v7353_v47, 1  ;;  %v1925_v63 = vmax.f32 %v1775_v32, 0.0 }
 0x315   : > { %v2158_v12 = vrot.slane %v7359_v52, 1  ;;  %v1992_v7 = vrot.slane %v1926_v45, 7  ;;  %v1784_v24 = vpop.f32.mrb[5].mxu0  ;;  %v1790_v33 = vadd.f32 %v5132_v6, %v7346_v2  ;;  %v2159_v23 = vrot.slane %v7356_v58, 1 }
 0x316   : > { %v1785_v54 = vadd.f32 %v7346_v2, %v1784_v24  ;;  %v1991_v25 = vrot.slane %v1925_v63, 7 }
 0x317   : > { %v7367_v27 = vsel %vm1987_vm12, %v1992_v7, 0.0  ;;  %v1928_v48 = vmax.f32 %v1790_v33, 0.0  ;;  %v7377_v51 = vsel %vm371_vm0, %v2159_v23, %v2161_v8  ;;  %v7380_v15 = vsel %vm371_vm0, %v2158_v12, %v2159_v23 }
 0x318   : > { %v2166_v50 = vrot.slane %v7367_v27, 1  ;;  %v1927_v18 = vmax.f32 %v1785_v54, 0.0  ;;  %v5135_v31 = vpop.f32.mrb[6].mxu0  ;;  %v7371_v16 = vsel %vm1987_vm12, %v1991_v25, %v1992_v7  ;;  %v7374_v35 = vsel %vm1987_vm12, 0.0, %v1991_v25  ;;  %2237 = vrot.lane.b32.xlu0 %v7377_v51, %s5330_s28  ;;  %2235 = vrot.lane.b32.xlu1 %v7380_v15, %s5330_s28 }
 0x319   : > { %v1794_v28 = vpop.f32.mrb[7].mxu0  ;;  %v1995_v10 = vrot.slane %v1928_v48, 7  ;;  %v1800_v46 = vadd.f32 %v5135_v31, %v7346_v2  ;;  %v2164_v44 = vrot.slane %v7371_v16, 1  ;;  %v2163_v42 = vrot.slane %v7374_v35, 1 }
 0x31a   : > { %v1994_v57 = vrot.slane %v1927_v18, 7  ;;  %v1795_v37 = vadd.f32 %v7346_v2, %v1794_v28 }
 0x31b   : > { %v7391_v17 = vsel %vm1987_vm12, %v1995_v10, 0.0  ;;  %v1930_v38 = vmax.f32 %v1800_v46, 0.0  ;;  %v7401_v49 = vsel %vm371_vm0, %v2164_v44, %v2166_v50  ;;  %v7406_v26 = vsel %vm371_vm0, %v2163_v42, %v2164_v44 }
 0x31c   : > { %v7394_v55 = vsel %vm1987_vm12, %v1994_v57, %v1995_v10  ;;  %v7397_v3 = vsel %vm1987_vm12, 0.0, %v1994_v57  ;;  %v5138_v56 = vpop.f32.mrb[8].mxu0  ;;  %v2171_v1 = vrot.slane %v7391_v17, 1  ;;  %v1929_v4 = vmax.f32 %v1795_v37, 0.0  ;;  %9899 = vst [vmem:[#allocation52_spill] sm:$0xff] %v7401_v49  ;;  %2241 = vrot.lane.b32.xlu0 %v7401_v49, %s5330_s28  ;;  %9900 = vst [vmem:[#allocation77_spill] sm:$0xff] %v7406_v26  ;;  %2239 = vrot.lane.b32.xlu1 %v7406_v26, %s5330_s28 }
 0x31d   : > { %v1804_v20 = vpop.f32.mrb[9].mxu0  ;;  %v1998_v5 = vrot.slane %v1930_v38, 7  ;;  %v1810_v36 = vadd.f32 %v5138_v56, %v7346_v2  ;;  %v2169_v53 = vrot.slane %v7394_v55, 1  ;;  %v2168_v61 = vrot.slane %v7397_v3, 1 }
 0x31e   : > { %v1805_v11 = vadd.f32 %v7346_v2, %v1804_v20  ;;  %v1997_v22 = vrot.slane %v1929_v4, 7 }
 0x31f   : > { %v7415_v21 = vsel %vm1987_vm12, %v1998_v5, 0.0  ;;  %v1932_v40 = vmax.f32 %v1810_v36, 0.0  ;;  %v7425_v41 = vsel %vm371_vm0, %v2169_v53, %v2171_v1  ;;  %v7428_v29 = vsel %vm371_vm0, %v2168_v61, %v2169_v53 }
 0x320   : > { %v1931_v59 = vmax.f32 %v1805_v11, 0.0  ;;  %v5141_v43 = vpop.f32.mrb[10].mxu0  ;;  %v2176_v60 = vrot.slane %v7415_v21, 1  ;;  %v7419_v9 = vsel %vm1987_vm12, %v1997_v22, %v1998_v5  ;;  %v7422_v39 = vsel %vm1987_vm12, 0.0, %v1997_v22  ;;  %9901 = vst [vmem:[#allocation78_spill] sm:$0xff] %v7425_v41  ;;  %9902 = vst [vmem:[#allocation103_spill] sm:$0xff] %v7428_v29  ;;  %2245 = vrot.lane.b32.xlu0 %v7425_v41, %s5330_s28  ;;  %2243 = vrot.lane.b32.xlu1 %v7428_v29, %s5330_s28 }
 0x321   : > { %v1814_v62 = vpop.f32.mrb[11].mxu0  ;;  %v2001_v30 = vrot.slane %v1932_v40, 7  ;;  %v1820_v19 = vadd.f32 %v5141_v43, %v7346_v2  ;;  %v2174_v32 = vrot.slane %v7419_v9, 1  ;;  %v2173_v45 = vrot.slane %v7422_v39, 1 }
 0x322   : > { %v2000_v0 = vrot.slane %v1931_v59, 7  ;;  %v1815_v14 = vadd.f32 %v7346_v2, %v1814_v62 }
 0x323   : > { %v7439_v6 = vsel %vm1987_vm12, %v2001_v30, 0.0  ;;  %v1934_v24 = vmax.f32 %v1820_v19, 0.0  ;;  %v7449_v23 = vsel %vm371_vm0, %v2174_v32, %v2176_v60  ;;  %v7452_v25 = vsel %vm371_vm0, %v2173_v45, %v2174_v32 }
 0x324   : > { %v7442_v8 = vsel %vm1987_vm12, %v2000_v0, %v2001_v30  ;;  %v7445_v12 = vsel %vm1987_vm12, 0.0, %v2000_v0  ;;  %v5144_v7 = vpop.f32.mrb[12].mxu0  ;;  %v2181_v63 = vrot.slane %v7439_v6, 1  ;;  %v1933_v33 = vmax.f32 %v1815_v14, 0.0  ;;  %9903 = vst [vmem:[#allocation50_spill] sm:$0xff] %v7449_v23  ;;  %9904 = vst [vmem:[#allocation104_spill] sm:$0xff] %v7452_v25  ;;  %2249 = vrot.lane.b32.xlu0 %v7449_v23, %s5330_s28  ;;  %2247 = vrot.lane.b32.xlu1 %v7452_v25, %s5330_s28 }
 0x325   : > { %v1824_v54 = vpop.f32.mrb[13].mxu0  ;;  %v1830_v50 = vadd.f32 %v5144_v7, %v7346_v2  ;;  %v2004_v18 = vrot.slane %v1934_v24, 7  ;;  %v2179_v28 = vrot.slane %v7442_v8, 1  ;;  %v2178_v10 = vrot.slane %v7445_v12, 1 }
 0x326   : > { %v1825_v48 = vadd.f32 %v7346_v2, %v1824_v54  ;;  %v2003_v31 = vrot.slane %v1933_v33, 7 }
 0x327   : > { %v1936_v57 = vmax.f32 %v1830_v50, 0.0  ;;  %v7463_v44 = vsel %vm1987_vm12, %v2004_v18, 0.0  ;;  %v7472_v56 = vsel %vm371_vm0, %v2179_v28, %v2181_v63  ;;  %v7478_v36 = vsel %vm371_vm0, %v2178_v10, %v2179_v28 }
 0x328   : > { %v1935_v46 = vmax.f32 %v1825_v48, 0.0  ;;  %v5147_v37 = vpop.f32.mrb[14].mxu0  ;;  %v7466_v42 = vsel %vm1987_vm12, %v2003_v31, %v2004_v18  ;;  %v7469_v38 = vsel %vm1987_vm12, 0.0, %v2003_v31  ;;  %9906 = vst [vmem:[#allocation79_spill] sm:$0xff] %v7472_v56  ;;  %v2186_v4 = vrot.slane %v7463_v44, 1  ;;  %2253 = vrot.lane.b32.xlu0 %v7472_v56, %s5330_s28  ;;  %9907 = vst [vmem:[#allocation80_spill] sm:$0xff] %v7478_v36  ;;  %2251 = vrot.lane.b32.xlu1 %v7478_v36, %s5330_s28 }
 0x329   : > { %9905 = vst [vmem:[#allocation53_spill] sm:$0xff] %v7466_v42  ;;  %v1834_v1 = vpop.f32.mrb[15].mxu0  ;;  %v2007_v20 = vrot.slane %v1936_v57, 7  ;;  %v1840_v11 = vadd.f32 %v5147_v37, %v7346_v2  ;;  %v2184_v53 = vrot.slane %v7466_v42, 1  ;;  %v2183_v43 = vrot.slane %v7469_v38, 1 }
 0x32a   : > { %v2006_v5 = vrot.slane %v1935_v46, 7  ;;  %v1835_v22 = vadd.f32 %v7346_v2, %v1834_v1 }
 0x32b   : > { %v7484_v61 = vsel %vm1987_vm12, %v2007_v20, 0.0  ;;  %v1938_v30 = vmax.f32 %v1840_v11, 0.0  ;;  %v7497_v14 = vsel %vm371_vm0, %v2184_v53, %v2186_v4  ;;  %v7500_v32 = vsel %vm371_vm0, %v2183_v43, %v2184_v53 }
 0x32c   : > { %v7487_v40 = vsel %vm1987_vm12, %v2006_v5, %v2007_v20  ;;  %v7490_v59 = vsel %vm1987_vm12, 0.0, %v2006_v5  ;;  %v5150_v60 = vpop.f32.mrb[16].mxu0  ;;  %v2191_v62 = vrot.slane %v7484_v61, 1  ;;  %v1937_v0 = vmax.f32 %v1835_v22, 0.0  ;;  %9910 = vst [vmem:[#allocation47_spill] sm:$0xff] %v7497_v14  ;;  %9911 = vst [vmem:[#allocation55_spill] sm:$0xff] %v7500_v32  ;;  %2257 = vrot.lane.b32.xlu0 %v7497_v14, %s5330_s28  ;;  %2255 = vrot.lane.b32.xlu1 %v7500_v32, %s5330_s28 }
 0x32d   : > { %9908 = vst [vmem:[#allocation105_spill] sm:$0xff] %v7487_v40  ;;  %9909 = vst [vmem:[#allocation106_spill] sm:$0xff] %v7490_v59  ;;  %v1844_v19 = vpop.f32.mrb[17].mxu0  ;;  %v1850_v45 = vadd.f32 %v5150_v60, %v7346_v2  ;;  %v2010_v63 = vrot.slane %v1938_v30, 7  ;;  %v2189_v33 = vrot.slane %v7487_v40, 1  ;;  %v2188_v54 = vrot.slane %v7490_v59, 1 }
 0x32e   : > { %v1845_v7 = vadd.f32 %v7346_v2, %v1844_v19  ;;  %v2009_v24 = vrot.slane %v1937_v0, 7 }
 0x32f   : > { %v1940_v50 = vmax.f32 %v1850_v45, 0.0  ;;  %v7511_v31 = vsel %vm1987_vm12, %v2010_v63, 0.0  ;;  %v7520_v57 = vsel %vm371_vm0, %v2189_v33, %v2191_v62  ;;  %v7526_v20 = vsel %vm371_vm0, %v2188_v54, %v2189_v33 }
 0x330   : > { %v1939_v48 = vmax.f32 %v1845_v7, 0.0  ;;  %v5153_v18 = vpop.f32.mrb[18].mxu0  ;;  %v7514_v28 = vsel %vm1987_vm12, %v2009_v24, %v2010_v63  ;;  %v7517_v10 = vsel %vm1987_vm12, 0.0, %v2009_v24  ;;  %9914 = vst [vmem:[#allocation81_spill] sm:$0xff] %v7520_v57  ;;  %v2196_v37 = vrot.slane %v7511_v31, 1  ;;  %2261 = vrot.lane.b32.xlu0 %v7520_v57, %s5330_s28  ;;  %9915 = vst [vmem:[#allocation82_spill] sm:$0xff] %v7526_v20  ;;  %2259 = vrot.lane.b32.xlu1 %v7526_v20, %s5330_s28 }
 0x331   : > { %9912 = vst [vmem:[#allocation48_spill] sm:$0xff] %v7514_v28  ;;  %9913 = vst [vmem:[#allocation56_spill] sm:$0xff] %v7517_v10  ;;  %v1854_v46 = vpop.f32.mrb[19].mxu0  ;;  %v2013_v1 = vrot.slane %v1940_v50, 7  ;;  %v1860_v5 = vadd.f32 %v5153_v18, %v7346_v2  ;;  %v2194_v22 = vrot.slane %v7514_v28, 1  ;;  %v2193_v62 = vrot.slane %v7517_v10, 1 }
 0x332   : > { %v2012_v4 = vrot.slane %v1939_v48, 7  ;;  %v1855_v11 = vadd.f32 %v7346_v2, %v1854_v46 }
 0x333   : > { %v7532_v53 = vsel %vm1987_vm12, %v2013_v1, 0.0  ;;  %v1942_v19 = vmax.f32 %v1860_v5, 0.0  ;;  %v7545_v63 = vsel %vm371_vm0, %v2194_v22, %v2196_v37  ;;  %v7548_v24 = vsel %vm371_vm0, %v2193_v62, %v2194_v22 }
 0x334   : > { %v7535_v43 = vsel %vm1987_vm12, %v2012_v4, %v2013_v1  ;;  %v7538_v60 = vsel %vm1987_vm12, 0.0, %v2012_v4  ;;  %v5156_v30 = vpop.f32.mrb[20].mxu0  ;;  %v2201_v0 = vrot.slane %v7532_v53, 1  ;;  %v1941_v45 = vmax.f32 %v1855_v11, 0.0  ;;  %9918 = vst [vmem:[#allocation57_spill] sm:$0xff] %v7545_v63  ;;  %9919 = vst [vmem:[#allocation58_spill] sm:$0xff] %v7548_v24  ;;  %2265 = vrot.lane.b32.xlu0 %v7545_v63, %s5330_s28  ;;  %2263 = vrot.lane.b32.xlu1 %v7548_v24, %s5330_s28 }
 0x335   : > { %9916 = vst [vmem:[#allocation108_spill] sm:$0xff] %v7535_v43  ;;  %9917 = vst [vmem:[#allocation110_spill] sm:$0xff] %v7538_v60  ;;  %v1864_v7 = vpop.f32.mrb[21].mxu0  ;;  %v1870_v33 = vadd.f32 %v5156_v30, %v7346_v2  ;;  %v2016_v50 = vrot.slane %v1942_v19, 7  ;;  %v2199_v18 = vrot.slane %v7535_v43, 1  ;;  %v2198_v46 = vrot.slane %v7538_v60, 1 }
 0x336   : > { %v1865_v54 = vadd.f32 %v7346_v2, %v1864_v7  ;;  %v2015_v48 = vrot.slane %v1941_v45, 7 }
 0x337   : > { %v1944_v37 = vmax.f32 %v1870_v33, 0.0  ;;  %v7559_v4 = vsel %vm1987_vm12, %v2016_v50, 0.0  ;;  %v7568_v22 = vsel %vm371_vm0, %v2199_v18, %v2201_v0  ;;  %v7574_v45 = vsel %vm371_vm0, %v2198_v46, %v2199_v18 }
 0x338   : > { %v1943_v1 = vmax.f32 %v1865_v54, 0.0  ;;  %v7562_v5 = vsel %vm1987_vm12, %v2015_v48, %v2016_v50  ;;  %v7565_v11 = vsel %vm1987_vm12, 0.0, %v2015_v48  ;;  %9920 = vst [vmem:[#allocation83_spill] sm:$0xff] %v7568_v22  ;;  %v2206_v62 = vrot.slane %v7559_v4, 1  ;;  %2269 = vrot.lane.b32.xlu0 %v7568_v22, %s5330_s28  ;;  %9921 = vst [vmem:[#allocation84_spill] sm:$0xff] %v7574_v45  ;;  %2267 = vrot.lane.b32.xlu1 %v7574_v45, %s5330_s28 }
 0x339   : > { %v2019_v30 = vrot.slane %v1944_v37, 7  ;;  %v2204_v7 = vrot.slane %v7562_v5, 1  ;;  %v2203_v33 = vrot.slane %v7565_v11, 1 }
 0x33a   : > { %v2018_v19 = vrot.slane %v1943_v1, 7 }
 0x33b   : > { %v7579_v54 = vsel %vm1987_vm12, %v2019_v30, 0.0  ;;  %v7591_v46 = vsel %vm371_vm0, %v2204_v7, %v2206_v62  ;;  %v7594_v37 = vsel %vm371_vm0, %v2203_v33, %v2204_v7 }
 0x33c   : > { %v7582_v0 = vsel %vm1987_vm12, %v2018_v19, %v2019_v30  ;;  %v7585_v50 = vsel %vm1987_vm12, 0.0, %v2018_v19  ;;  %v5159_v48 = vpop.f32.mrb[22].mxu0  ;;  %v2211_v18 = vrot.slane %v7579_v54, 1  ;;  %9922 = vst [vmem:[#allocation111_spill] sm:$0xff] %v7591_v46  ;;  %9923 = vst [vmem:[#allocation112_spill] sm:$0xff] %v7594_v37  ;;  %2273 = vrot.lane.b32.xlu0 %v7591_v46, %s5330_s28  ;;  %2271 = vrot.lane.b32.xlu1 %v7594_v37, %s5330_s28 }
 0x33d   : > { %v1874_v1 = vpop.f32.mrb[23].mxu0  ;;  %v1880_v13 = vadd.f32 %v5159_v48, %v7346_v2  ;;  %v2209_v19 = vrot.slane %v7582_v0, 1  ;;  %v2208_v34 = vrot.slane %v7585_v50, 1 }
 0x33e   : > { %v1875_v30 = vadd.f32 %v7346_v2, %v1874_v1 }
 0x33f   : > { %v1946_v62 = vmax.f32 %v1880_v13, 0.0  ;;  %v7605_v7 = vsel %vm371_vm0, %v2209_v19, %v2211_v18  ;;  %v7608_v33 = vsel %vm371_vm0, %v2208_v34, %v2209_v19 }
 0x340   : > { %v1945_v22 = vmax.f32 %v1875_v30, 0.0  ;;  %9924 = vst [vmem:[#allocation59_spill] sm:$0xff] %v7605_v7  ;;  %9925 = vst [vmem:[#allocation49_spill] sm:$0xff] %v7608_v33  ;;  %2277 = vrot.lane.b32.xlu0 %v7605_v7, %s5330_s28  ;;  %2275 = vrot.lane.b32.xlu1 %v7608_v33, %s5330_s28 }
 0x341   : > { %v2022_v48 = vrot.slane %v1946_v62, 7 }
 0x342   : > { %v2021_v1 = vrot.slane %v1945_v22, 7 }
 0x343   : > { %v7613_v45 = vsel %vm1987_vm12, %v2022_v48, 0.0 }
 0x344   : > { %v7616_v46 = vsel %vm1987_vm12, %v2021_v1, %v2022_v48  ;;  %v7619_v13 = vsel %vm1987_vm12, 0.0, %v2021_v1  ;;  %v5162_v18 = vpop.f32.mrb[24].mxu0  ;;  %v2216_v34 = vrot.slane %v7613_v45, 1 }
 0x345   : > { %v1890_v22 = vadd.f32 %v5162_v18, %v7346_v2  ;;  %v1884_v30 = vpop.f32.mrb[25].mxu0  ;;  %v2214_v19 = vrot.slane %v7616_v46, 1  ;;  %v2213_v7 = vrot.slane %v7619_v13, 1 }
 0x346   : > { %v1885_v62 = vadd.f32 %v7346_v2, %v1884_v30 }
 0x347   : > { %v1948_v48 = vmax.f32 %v1890_v22, 0.0  ;;  %v7629_v37 = vsel %vm371_vm0, %v2214_v19, %v2216_v34  ;;  %v7634_v33 = vsel %vm371_vm0, %v2213_v7, %v2214_v19 }
 0x348   : > { %9926 = vst [vmem:[#allocation60_spill] sm:$0xff] %v7629_v37  ;;  %v1947_v1 = vmax.f32 %v1885_v62, 0.0  ;;  %2281 = vrot.lane.b32.xlu0 %v7629_v37, %s5330_s28  ;;  %9927 = vst [vmem:[#allocation85_spill] sm:$0xff] %v7634_v33  ;;  %2279 = vrot.lane.b32.xlu1 %v7634_v33, %s5330_s28 }
 0x349   : > { %v2025_v63 = vrot.slane %v1948_v48, 7 }
 0x34a   : > { %v2024_v18 = vrot.slane %v1947_v1, 7 }
 0x34b   : > { %v7639_v30 = vsel %vm1987_vm12, %v2025_v63, 0.0 }
 0x34c   : > { %v2221_v22 = vrot.slane %v7639_v30, 1  ;;  %v7643_v34 = vsel %vm1987_vm12, %v2024_v18, %v2025_v63  ;;  %v7646_v62 = vsel %vm1987_vm12, 0.0, %v2024_v18  ;;  %v5165_v37 = vpop.f32.mrb[26].mxu0 }
 0x34d   : > { %9928 = vst [vmem:[#allocation86_spill] sm:$0xff] %v7643_v34  ;;  %v1900_v7 = vadd.f32 %v5165_v37, %v7346_v2  ;;  %v1894_v19 = vpop.f32.mrb[27].mxu0  ;;  %v2219_v48 = vrot.slane %v7643_v34, 1  ;;  %v2218_v33 = vrot.slane %v7646_v62, 1 }
 0x34e   : > { %v1895_v1 = vadd.f32 %v7346_v2, %v1894_v19 }
 0x34f   : > { %v1950_v24 = vmax.f32 %v1900_v7, 0.0  ;;  %v7653_v57 = vsel %vm371_vm0, %v2219_v48, %v2221_v22  ;;  %v7656_v63 = vsel %vm371_vm0, %v2218_v33, %v2219_v48 }
 0x350   : > { %9929 = vst [vmem:[#allocation113_spill] sm:$0xff] %v7653_v57  ;;  %9930 = vst [vmem:[#allocation114_spill] sm:$0xff] %v7656_v63  ;;  %v1949_v20 = vmax.f32 %v1895_v1, 0.0  ;;  %2285 = vrot.lane.b32.xlu0 %v7653_v57, %s5330_s28  ;;  %2283 = vrot.lane.b32.xlu1 %v7656_v63, %s5330_s28 }
 0x351   : > { %v2028_v37 = vrot.slane %v1950_v24, 7 }
 0x352   : > { %v2027_v18 = vrot.slane %v1949_v20, 7 }
 0x353   : > { %v7663_v14 = vsel %vm1987_vm12, %v2028_v37, 0.0 }
 0x354   : > { %v2226_v7 = vrot.slane %v7663_v14, 1  ;;  %v7667_v22 = vsel %vm1987_vm12, %v2027_v18, %v2028_v37  ;;  %v7670_v33 = vsel %vm1987_vm12, 0.0, %v2027_v18  ;;  %v5168_v19 = vpop.f32.mrb[28].mxu0 }
 0x355   : > { %9931 = vst [vmem:[#allocation51_spill] sm:$0xff] %v7667_v22  ;;  %9932 = vst [vmem:[#allocation61_spill] sm:$0xff] %v7670_v33  ;;  %v1910_v48 = vadd.f32 %v5168_v19, %v7346_v2  ;;  %v1904_v1 = vpop.f32.mrb[29].mxu0  ;;  %v2224_v57 = vrot.slane %v7667_v22, 1  ;;  %v2223_v24 = vrot.slane %v7670_v33, 1 }
 0x356   : > { %v1905_v20 = vadd.f32 %v7346_v2, %v1904_v1 }
 0x357   : > { %v1952_v63 = vmax.f32 %v1910_v48, 0.0  ;;  %v7677_v32 = vsel %vm371_vm0, %v2224_v57, %v2226_v7  ;;  %v7680_v37 = vsel %vm371_vm0, %v2223_v24, %v2224_v57 }
 0x358   : > { %9933 = vst [vmem:[#allocation125_spill] sm:$0xff] %v7677_v32  ;;  %9934 = vst [vmem:[#allocation22_spill] sm:$0xff] %v7680_v37  ;;  %v1951_v56 = vmax.f32 %v1905_v20, 0.0  ;;  %2289 = vrot.lane.b32.xlu0 %v7677_v32, %s5330_s28  ;;  %2287 = vrot.lane.b32.xlu1 %v7680_v37, %s5330_s28 }
 0x359   : > { %v2031_v18 = vrot.slane %v1952_v63, 7 }
 0x35a   : > { %v2030_v19 = vrot.slane %v1951_v56, 7  ;;  %v2328_v56 = vrot.slane %v7359_v52, 2 }
 0x35b   : > { %v7687_v36 = vsel %vm1987_vm12, %v2031_v18, 0.0 }
 0x35c   : > { %v2231_v48 = vrot.slane %v7687_v36, 1  ;;  %v7691_v7 = vsel %vm1987_vm12, %v2030_v19, %v2031_v18  ;;  %v7694_v57 = vsel %vm1987_vm12, 0.0, %v2030_v19  ;;  %v5171_v1 = vpop.f32.mrb[30].mxu0  ;;  %v2329_v19 = vrot.slane %v7356_v58, 2 }
 0x35d   : > { %9935 = vst [vmem:[#allocation62_spill] sm:$0xff] %v7691_v7  ;;  %9936 = vst [vmem:[#allocation87_spill] sm:$0xff] %v7694_v57  ;;  %v1920_v24 = vadd.f32 %v5171_v1, %v7346_v2  ;;  %v1914_v20 = vpop.f32.mrb[31].mxu0  ;;  %v2229_v32 = vrot.slane %v7691_v7, 1  ;;  %v2228_v63 = vrot.slane %v7694_v57, 1  ;;  %v9939_v1 = vmov 0.0  }
 0x35e   : > { %v1915_v37 = vadd.f32 %v7346_v2, %v1914_v20  ;;  %v7713_v29 = vrot.slane %v9939_v1, 2  ;;  %v2334_v20 = vrot.slane %v7371_v16, 2  ;;  %v2339_v1 = vrot.slane %v7394_v55, 2 }
 0x35f   : > { %v1954_v23 = vmax.f32 %v1920_v24, 0.0  ;;  %v7702_v25 = vsel %vm371_vm0, %v2229_v32, %v2231_v48  ;;  %v7705_v18 = vsel %vm371_vm0, %v2228_v63, %v2229_v32  ;;  %v2331_v48 = vrot.slane %v7353_v47, 2 }
 0x360   : > { %9937 = vst [vmem:[#allocation23_spill] sm:$0xff] %v7702_v25  ;;  %9938 = vst [vmem:[#allocation88_spill] sm:$0xff] %v7705_v18  ;;  %v1953_v41 = vmax.f32 %v1915_v37, 0.0  ;;  %2293 = vrot.lane.b32.xlu0 %v7702_v25, %s5330_s28  ;;  %2291 = vrot.lane.b32.xlu1 %v7705_v18, %s5330_s28  ;;  %v7721_v32 = vsel %vm548_vm1, %v2328_v56, %v2329_v19  ;;  %v2333_v37 = vrot.slane %v7374_v35, 2  ;;  %v2336_v47 = vrot.slane %v7367_v27, 2 }
 0x361   : > { %9940 = vst [vmem:[#allocation115_spill] sm:$0xff] %v7713_v29  ;;  %v7715_v2 = vrot.slane %v1954_v23, 7  ;;  %9942 = vst [vmem:[#allocation126_spill] sm:$0xff] %v7721_v32  ;;  %v7739_v63 = vsel %vm548_vm1, %v2329_v19, %v2331_v48  ;;  %v2338_v56 = vrot.slane %v7397_v3, 2  ;;  %v2343_v19 = vrot.slane %v7422_v39, 2 }
 0x362   : > { %v7717_v24 = vrot.slane %v1953_v41, 7  ;;  %v7736_v23 = vsel %vm548_vm1, %v2333_v37, %v2334_v20  ;;  %9945 = vst [vmem:[#allocation26_spill] sm:$0xff] %v7739_v63  ;;  %v7752_v37 = vsel %vm548_vm1, %v2334_v20, %v2336_v47  ;;  %v2344_v48 = vrot.slane %v7419_v9, 2 }
 0x363   : > { %9941 = vst [vmem:[#allocation116_spill] sm:$0xff] %v7715_v2  ;;  %9944 = vst [vmem:[#allocation127_spill] sm:$0xff] %v7736_v23  ;;  %v7749_v27 = vsel %vm548_vm1, %v2338_v56, %v2339_v1  ;;  %v2348_v20 = vrot.slane %v7445_v12, 2  ;;  %v2349_v47 = vrot.slane %v7442_v8, 2  ;;  %v2351_v25 = vrot.slane %v7439_v6, 2 }
 0x364   : > { %2405 = vrot.lane.b32.xlu0 %v7721_v32, %s5332_s30  ;;  %2403 = vrot.lane.b32.xlu1 %v7713_v29, %s5332_s30  ;;  %v7732_v41 = vsel %vm1987_vm12, %v7717_v24, %v7715_v2  ;;  %v2341_v29 = vrot.slane %v7391_v17, 2  ;;  %9946 = vst [vmem:[#allocation64_spill] sm:$0xff] %v7752_v37  ;;  %v2346_v2 = vrot.slane %v7415_v21, 2  ;;  %v7762_v17 = vsel %vm548_vm1, %v2343_v19, %v2344_v48 }
 0x365   : > { %9943 = vst [vmem:[#allocation63_spill] sm:$0xff] %v7732_v41  ;;  %v7775_v21 = vsel %vm548_vm1, %v2348_v20, %v2349_v47  ;;  %v2356_v18 = vrot.slane %v7463_v44, 2  ;;  %v7791_v20 = vsel %vm548_vm1, %v2349_v47, %v2351_v25  ;;  %v2363_v25 = vrot.slane %v7517_v10, 2 }
 0x366   : > { %v7765_v56 = vsel %vm548_vm1, %v2339_v1, %v2341_v29  ;;  %v7778_v19 = vsel %vm548_vm1, %v2344_v48, %v2346_v2  ;;  %v2353_v29 = vrot.slane %v7469_v38, 2  ;;  %v2354_v1 = vrot.slane %v7466_v42, 2 }
 0x367   : > { %v2358_v2 = vrot.slane %v7490_v59, 2  ;;  %v2359_v48 = vrot.slane %v7487_v40, 2  ;;  %v2364_v47 = vrot.slane %v7514_v28, 2  ;;  %v2366_v32 = vrot.slane %v7511_v31, 2 }
 0x368   : > { %2409 = vrot.lane.b32.xlu0 %v7736_v23, %s5332_s30  ;;  %2407 = vrot.lane.b32.xlu1 %v7739_v63, %s5332_s30  ;;  %v7788_v6 = vsel %vm548_vm1, %v2353_v29, %v2354_v1  ;;  %v2361_v63 = vrot.slane %v7484_v61, 2  ;;  %v7804_v29 = vsel %vm548_vm1, %v2354_v1, %v2356_v18  ;;  %v2368_v18 = vrot.slane %v7538_v60, 2 }
 0x369   : > { %v7801_v44 = vsel %vm548_vm1, %v2358_v2, %v2359_v48  ;;  %v7814_v61 = vsel %vm548_vm1, %v2363_v25, %v2364_v47  ;;  %v2369_v1 = vrot.slane %v7535_v43, 2  ;;  %v7830_v25 = vsel %vm548_vm1, %v2364_v47, %v2366_v32 }
 0x36a   : > { %9947 = vst [vmem:[#allocation89_spill] sm:$0xff] %v7801_v44  ;;  %9948 = vst [vmem:[#allocation27_spill] sm:$0xff] %v7814_v61  ;;  %v7817_v2 = vsel %vm548_vm1, %v2359_v48, %v2361_v63  ;;  %v2373_v63 = vrot.slane %v7565_v11, 2  ;;  %v2374_v48 = vrot.slane %v7562_v5, 2  ;;  %v2378_v47 = vrot.slane %v7585_v50, 2 }
 0x36b   : > { %9949 = vst [vmem:[#allocation90_spill] sm:$0xff] %v7817_v2  ;;  %v7827_v31 = vsel %vm548_vm1, %v2368_v18, %v2369_v1  ;;  %9951 = vst [vmem:[#allocation117_spill] sm:$0xff] %v7830_v25  ;;  %v2379_v18 = vrot.slane %v7582_v0, 2 }
 0x36c   : > { %2413 = vrot.lane.b32.xlu0 %v7749_v27, %s5332_s30  ;;  %2411 = vrot.lane.b32.xlu1 %v7752_v37, %s5332_s30  ;;  %9950 = vst [vmem:[#allocation38_spill] sm:$0xff] %v7827_v31 }
 0x370   : > { %2417 = vrot.lane.b32.xlu0 %v7762_v17, %s5332_s30  ;;  %2415 = vrot.lane.b32.xlu1 %v7765_v56, %s5332_s30 }
 0x374   : > { %2421 = vrot.lane.b32.xlu0 %v7775_v21, %s5332_s30  ;;  %2419 = vrot.lane.b32.xlu1 %v7778_v19, %s5332_s30 }
 0x378   : > { %2425 = vrot.lane.b32.xlu0 %v7788_v6, %s5332_s30  ;;  %2423 = vrot.lane.b32.xlu1 %v7791_v20, %s5332_s30 }
 0x37c   : > { %2429 = vrot.lane.b32.xlu0 %v7801_v44, %s5332_s30  ;;  %2427 = vrot.lane.b32.xlu1 %v7804_v29, %s5332_s30  ;;  %v2371_v44 = vrot.slane %v7532_v53, 2  ;;  %v7842_v53 = vsel %vm548_vm1, %v2373_v63, %v2374_v48 }
 0x37d   : > { %9953 = vst [vmem:[#allocation65_spill] sm:$0xff] %v7842_v53 }
 0x37e   : > { %v7845_v32 = vsel %vm548_vm1, %v2369_v1, %v2371_v44  ;;  %v2383_v44 = vrot.slane %v7619_v13, 2  ;;  %v2384_v1 = vrot.slane %v7616_v46, 2 }
 0x37f   : > { %9954 = vst [vmem:[#allocation129_spill] sm:$0xff] %v7845_v32 }
 0x380   : > { %2433 = vrot.lane.b32.xlu0 %v7814_v61, %s5332_s30  ;;  %2431 = vrot.lane.b32.xlu1 %v7817_v2, %s5332_s30  ;;  %v2376_v61 = vrot.slane %v7559_v4, 2  ;;  %v7839_v2 = vpop.permute.xlu0 %2233  ;;  %v2381_v4 = vrot.slane %v7579_v54, 2  ;;  %v2386_v54 = vrot.slane %v7613_v45, 2  ;;  %v2391_v45 = vrot.slane %v7639_v30, 2 }
 0x381   : > { %9952 = vst [vmem:[#allocation128_spill] sm:$0xff] %v7839_v2  ;;  %v7855_v2 = vsel %vm548_vm1, %v2378_v47, %v2379_v18  ;;  %v7872_v47 = vsel %vm548_vm1, %v2383_v44, %v2384_v1 }
 0x382   : > { %9955 = vst [vmem:[#allocation2_spill] sm:$0xff] %v7855_v2  ;;  %v7858_v63 = vsel %vm548_vm1, %v2374_v48, %v2376_v61  ;;  %9957 = vst [vmem:[#allocation91_spill] sm:$0xff] %v7872_v47  ;;  %v7875_v61 = vsel %vm548_vm1, %v2379_v18, %v2381_v4  ;;  %v2388_v48 = vrot.slane %v7646_v62, 2  ;;  %v7892_v18 = vsel %vm548_vm1, %v2384_v1, %v2386_v54 }
 0x383   : > { %9956 = vst [vmem:[#allocation66_spill] sm:$0xff] %v7858_v63  ;;  %9958 = vst [vmem:[#allocation3_spill] sm:$0xff] %v7875_v61  ;;  %v2393_v4 = vrot.slane %v7670_v33, 2  ;;  %v2396_v1 = vrot.slane %v7663_v14, 2 }
 0x384   : > { %2437 = vrot.lane.b32.xlu0 %v7827_v31, %s5332_s30  ;;  %2435 = vrot.lane.b32.xlu1 %v7830_v25, %s5332_s30  ;;  %9961 = vst [vmem:[#allocation118_spill] sm:$0xff] %v7892_v18 }
 0x388   : > { %2441 = vrot.lane.b32.xlu0 %v7842_v53, %s5332_s30  ;;  %2439 = vrot.lane.b32.xlu1 %v7845_v32, %s5332_s30  ;;  %v2389_v53 = vrot.slane %v7643_v34, 2 }
 0x38a   : > { %v7862_v31 = vpop.permute.xlu1 %2235  ;;  %v7864_v25 = vpop.permute.xlu0 %2237  ;;  %v7889_v44 = vsel %vm548_vm1, %v2388_v48, %v2389_v53  ;;  %v7905_v30 = vsel %vm548_vm1, %v2389_v53, %v2391_v45  ;;  %v2398_v48 = vrot.slane %v7694_v57, 2  ;;  %v2401_v53 = vrot.slane %v7687_v36, 2 }
 0x38b   : > { %9960 = vst [vmem:[#allocation39_spill] sm:$0xff] %v7889_v44  ;;  %9962 = vst [vmem:[#allocation130_spill] sm:$0xff] %v7905_v30 }
 0x38c   : > { %2445 = vrot.lane.b32.xlu0 %v7855_v2, %s5332_s30  ;;  %2443 = vrot.lane.b32.xlu1 %v7858_v63, %s5332_s30  ;;  %v2394_v63 = vrot.slane %v7667_v22, 2 }
 0x38e   : > { %v7879_v32 = vpop.permute.xlu0 %2241  ;;  %v7885_v2 = vpop.permute.xlu1 %2239  ;;  %v7909_v54 = vsel %vm548_vm1, %v2393_v4, %v2394_v63  ;;  %v7926_v45 = vsel %vm548_vm1, %v2394_v63, %v2396_v1 }
 0x38f   : > { %9959 = vst [vmem:[#allocation92_spill] sm:$0xff] %v7879_v32  ;;  %9963 = vst [vmem:[#allocation67_spill] sm:$0xff] %v7909_v54  ;;  %v2399_v32 = vrot.slane %v7691_v7, 2 }
 0x390   : > { %2449 = vrot.lane.b32.xlu0 %v7872_v47, %s5332_s30  ;;  %2447 = vrot.lane.b32.xlu1 %v7875_v61, %s5332_s30  ;;  %9965 = vst [vmem:[#allocation4_spill] sm:$0xff] %v7926_v45 }
 0x391   : > { %v7923_v14 = vsel %vm548_vm1, %v2398_v48, %v2399_v32 }
 0x392   : > { %v7900_v47 = vpop.permute.xlu1 %2243  ;;  %v7902_v61 = vpop.permute.xlu0 %2245  ;;  %9964 = vst [vmem:[#allocation131_spill] sm:$0xff] %v7923_v14 }
 0x394   : > { %2453 = vrot.lane.b32.xlu0 %v7889_v44, %s5332_s30  ;;  %2451 = vrot.lane.b32.xlu1 %v7892_v18, %s5332_s30 }
 0x396   : > { %v7917_v44 = vpop.permute.xlu1 %2247  ;;  %v7919_v18 = vpop.permute.xlu0 %2249 }
 0x398   : > { %2457 = vrot.lane.b32.xlu0 %v7909_v54, %s5332_s30  ;;  %2455 = vrot.lane.b32.xlu1 %v7905_v30, %s5332_s30  ;;  %v7937_v30 = vsel %vm548_vm1, %v2399_v32, %v2401_v53 }
 0x399   : > { %9967 = vst [vmem:[#allocation93_spill] sm:$0xff] %v7937_v30 }
 0x39a   : > { %v7932_v4 = vpop.permute.xlu1 %2251  ;;  %v7934_v54 = vpop.permute.xlu0 %2253 }
 0x39b   : > { %9966 = vst [vmem:[#allocation68_spill] sm:$0xff] %v7934_v54  ;;  %v2121_v54 = vld [vmem:[%s9281_s3 + $0x30] sm:$0xff] }
 0x39c   : > { %2461 = vrot.lane.b32.xlu0 %v7923_v14, %s5332_s30  ;;  %2459 = vrot.lane.b32.xlu1 %v7926_v45, %s5332_s30 }
 0x39e   : > { %v7943_v36 = vpop.permute.xlu1 %2255  ;;  %v7945_v63 = vpop.permute.xlu0 %2257 }
 0x39f   : > { %9968 = vst [vmem:[#allocation5_spill] sm:$0xff] %v7943_v36  ;;  %9969 = vst [vmem:[#allocation94_spill] sm:$0xff] %v7945_v63  ;;  %v9994_v63 = vld [vmem:[#allocation104_spill] sm:$0xff]  ;;  %v2119_v36 = vld [vmem:[%s9281_s3 + $0x20] sm:$0xff] }
 0x3a0   : > { %2497 = vrot.lane.b32.xlu0 %v7359_v52, %s5334_s8  ;;  %2463 = vrot.lane.b32.xlu1 %v7937_v30, %s5332_s30  ;;  %s258_s30 = scalar_lea.vmem %s9283_s5, %s5035_s27 }
 0x3a2   : > { %v7955_v32 = vpop.permute.xlu1 %2259  ;;  %v7957_v1 = vpop.permute.xlu0 %2261 }
 0x3a3   : > { %9970 = vst [vmem:[#allocation40_spill] sm:$0xff] %v7955_v32  ;;  %9971 = vst [vmem:[#allocation119_spill] sm:$0xff] %v7957_v1 }
 0x3a4   : > { %2501 = vrot.lane.b32.xlu0 %v7374_v35, %s5334_s8  ;;  %2499 = vrot.lane.b32.xlu1 %v7356_v58, %s5334_s8 }
 0x3a6   : > { %v7963_v48 = vpop.permute.xlu1 %2263  ;;  %v7965_v53 = vpop.permute.xlu0 %2265 }
 0x3a7   : > { %9972 = vst [vmem:[#allocation132_spill] sm:$0xff] %v7963_v48  ;;  %9973 = vst [vmem:[#allocation69_spill] sm:$0xff] %v7965_v53 }
 0x3a8   : > { %2505 = vrot.lane.b32.xlu0 %v7397_v3, %s5334_s8  ;;  %2503 = vrot.lane.b32.xlu1 %v7371_v16, %s5334_s8 }
 0x3aa   : > { %v7975_v30 = vpop.permute.xlu1 %2267  ;;  %v7977_v14 = vpop.permute.xlu0 %2269 }
 0x3ab   : > { %9974 = vst [vmem:[#allocation133_spill] sm:$0xff] %v7975_v30  ;;  %9975 = vst [vmem:[#allocation6_spill] sm:$0xff] %v7977_v14 }
 0x3ac   : > { %2509 = vrot.lane.b32.xlu0 %v7422_v39, %s5334_s8  ;;  %2507 = vrot.lane.b32.xlu1 %v7394_v55, %s5334_s8 }
 0x3ae   : > { %v7983_v53 = vpop.permute.xlu1 %2271  ;;  %v7985_v48 = vpop.permute.xlu0 %2273 }
 0x3af   : > { %9976 = vst [vmem:[#allocation70_spill] sm:$0xff] %v7983_v53  ;;  %9977 = vst [vmem:[#allocation95_spill] sm:$0xff] %v7985_v48 }
 0x3b0   : > { %2513 = vrot.lane.b32.xlu0 %v7445_v12, %s5334_s8  ;;  %2511 = vrot.lane.b32.xlu1 %v7419_v9, %s5334_s8 }
 0x3b2   : > { %v7995_v14 = vpop.permute.xlu1 %2275  ;;  %v7997_v30 = vpop.permute.xlu0 %2277 }
 0x3b3   : > { %9978 = vst [vmem:[#allocation7_spill] sm:$0xff] %v7995_v14  ;;  %9979 = vst [vmem:[#allocation96_spill] sm:$0xff] %v7997_v30 }
 0x3b4   : > { %2517 = vrot.lane.b32.xlu0 %v7469_v38, %s5334_s8  ;;  %2515 = vrot.lane.b32.xlu1 %v7442_v8, %s5334_s8 }
 0x3b8   : > { %2521 = vrot.lane.b32.xlu0 %v7490_v59, %s5334_s8  ;;  %2519 = vrot.lane.b32.xlu1 %v7466_v42, %s5334_s8 }
 0x3ba   : > { %v8003_v48 = vpop.permute.xlu1 %2279  ;;  %v8005_v53 = vpop.permute.xlu0 %2281 }
 0x3bb   : > { %9980 = vst [vmem:[#allocation41_spill] sm:$0xff] %v8003_v48  ;;  %9981 = vst [vmem:[#allocation120_spill] sm:$0xff] %v8005_v53 }
 0x3bc   : > { %2525 = vrot.lane.b32.xlu0 %v7517_v10, %s5334_s8  ;;  %2523 = vrot.lane.b32.xlu1 %v7487_v40, %s5334_s8 }
 0x3c0   : > { %2529 = vrot.lane.b32.xlu0 %v7538_v60, %s5334_s8  ;;  %2527 = vrot.lane.b32.xlu1 %v7514_v28, %s5334_s8 }
 0x3c2   : > { %v8011_v45 = vpop.permute.xlu1 %2283  ;;  %v8013_v14 = vpop.permute.xlu0 %2285 }
 0x3c3   : > { %9982 = vst [vmem:[#allocation134_spill] sm:$0xff] %v8011_v45  ;;  %9983 = vst [vmem:[#allocation107_spill] sm:$0xff] %v8013_v14 }
 0x3c4   : > { %2533 = vrot.lane.b32.xlu0 %v7565_v11, %s5334_s8  ;;  %2531 = vrot.lane.b32.xlu1 %v7535_v43, %s5334_s8 }
 0x3c8   : > { %2537 = vrot.lane.b32.xlu0 %v7585_v50, %s5334_s8  ;;  %2535 = vrot.lane.b32.xlu1 %v7562_v5, %s5334_s8 }
 0x3ca   : > { %v8019_v30 = vpop.permute.xlu1 %2287  ;;  %v8021_v48 = vpop.permute.xlu0 %2289 }
 0x3cb   : > { %9984 = vst [vmem:[#allocation71_spill] sm:$0xff] %v8019_v30  ;;  %9985 = vst [vmem:[#allocation135_spill] sm:$0xff] %v8021_v48 }
 0x3cc   : > { %2541 = vrot.lane.b32.xlu0 %v7619_v13, %s5334_s8  ;;  %2539 = vrot.lane.b32.xlu1 %v7582_v0, %s5334_s8 }
 0x3d0   : > { %2545 = vrot.lane.b32.xlu0 %v7646_v62, %s5334_s8  ;;  %2543 = vrot.lane.b32.xlu1 %v7616_v46, %s5334_s8 }
 0x3d2   : > { %v8027_v53 = vpop.permute.xlu1 %2291  ;;  %v8029_v45 = vpop.permute.xlu0 %2293 }
 0x3d3   : > { %9986 = vst [vmem:[#allocation8_spill] sm:$0xff] %v8027_v53  ;;  %9987 = vst [vmem:[#allocation72_spill] sm:$0xff] %v8029_v45  ;;  %v8049_v45 = vsel %vm1987_vm12, 0.0, %v7717_v24 }
 0x3d4   : > { %2549 = vrot.lane.b32.xlu0 %v7670_v33, %s5334_s8  ;;  %2547 = vrot.lane.b32.xlu1 %v7643_v34, %s5334_s8  ;;  %9989 = vst [vmem:[#allocation9_spill] sm:$0xff] %v8049_v45  ;;  %v9998_v34 = vld [vmem:[#allocation80_spill] sm:$0xff] }
 0x3d6   : > { %v8035_v14 = vpop.permute.xlu1 %2403  ;;  %v8037_v30 = vpop.permute.xlu0 %2405 }
 0x3d7   : > { %9988 = vst [vmem:[#allocation97_spill] sm:$0xff] %v8035_v14 }
 0x3d8   : > { %2553 = vrot.lane.b32.xlu0 %v7694_v57, %s5334_s8  ;;  %2551 = vrot.lane.b32.xlu1 %v7667_v22, %s5334_s8  ;;  %v2117_v22 = vld [vmem:[%s9281_s3 + $0x10] sm:$0xff] }
 0x3da   : > { %v8043_v48 = vpop.permute.xlu1 %2407  ;;  %v8045_v53 = vpop.permute.xlu0 %2409 }
 0x3dc   : > { %2555 = vrot.lane.b32.xlu1 %v7691_v7, %s5334_s8  ;;  %2557 = vrot.lane.b32.xlu0 %v8049_v45, %s5334_s8  ;;  %v2115_v45 = vld [vmem:[%s9281_s3] sm:$0xff] }
 0x3de   : > { %v8055_v14 = vpop.permute.xlu1 %2411  ;;  %v8057_v57 = vpop.permute.xlu0 %2413 }
 0x3e0   : > { %2599 = vrot.lane.b32.xlu0 %v7380_v15, %s5336_s20  ;;  %2559 = vrot.lane.b32.xlu1 %v7732_v41, %s5334_s8  ;;  %v2116_v15 = vld [vmem:[%s9281_s3 + $0x8] sm:$0xff] }
 0x3e1   : > { %v5246_v7 = vpack.c.bf16 %v2116_v15, %v2115_v45  ;;  %v2118_v45 = vld [vmem:[%s9281_s3 + $0x18] sm:$0xff] }
 0x3e2   : > { %v8063_v1 = vpop.permute.xlu1 %2415  ;;  %v8065_v24 = vpop.permute.xlu0 %2417  ;;  %v5250_v15 = vpack.c.bf16 %v2118_v45, %v2117_v22  ;;  %v2120_v22 = vld [vmem:[%s9281_s3 + $0x28] sm:$0xff] }
 0x3e3   : > { %5262 = vmatprep.subr.bf16.mxu1 %v5246_v7  ;;  %5247 = vmatprep.subr.bf16.mxu0 %v5246_v7 }
 0x3e4   : > { %2603 = vrot.lane.b32.xlu0 %v7406_v26, %s5336_s20  ;;  %2601 = vrot.lane.b32.xlu1 %v7377_v51, %s5336_s20  ;;  %v9990_v51 = vld [vmem:[#allocation103_spill] sm:$0xff] }
 0x3e5   : > { %5267 = vmatpush3.bf16.msra.mxu1 %v5246_v7  ;;  %5249 = vmatpush3.bf16.msra.mxu0 %v5246_v7  ;;  %v5254_v7 = vpack.c.bf16 %v2120_v22, %v2119_v36  ;;  %v2122_v36 = vld [vmem:[%s9281_s3 + $0x38] sm:$0xff] }
 0x3e6   : > { %v8077_v41 = vpop.permute.xlu1 %2419  ;;  %v8079_v32 = vpop.permute.xlu0 %2421  ;;  %5263 = vmatprep.subr.bf16.mxu1 %v5250_v15  ;;  %5251 = vmatprep.subr.bf16.mxu0 %v5250_v15 }
 0x3e8   : > { %2605 = vrot.lane.b32.xlu1 %v7401_v49, %s5336_s20  ;;  %2607 = vrot.lane.b32.xlu0 %v9990_v51, %s5336_s20  ;;  %v9993_v49 = vld [vmem:[#allocation78_spill] sm:$0xff] }
 0x3e9   : > { %5268 = vmatpush3.bf16.msra.mxu1 %v5250_v15  ;;  %5253 = vmatpush3.bf16.msra.mxu0 %v5250_v15  ;;  %v5258_v15 = vpack.c.bf16 %v2122_v36, %v2121_v54 }
 0x3ea   : > { %v8091_v33 = vpop.permute.xlu1 %2423  ;;  %v8093_v26 = vpop.permute.xlu0 %2425  ;;  %5264 = vmatprep.subr.bf16.mxu1 %v5254_v7  ;;  %5255 = vmatprep.subr.bf16.mxu0 %v5254_v7 }
 0x3eb   : > { %9991 = vst [vmem:[#allocation30_spill] sm:$0xff] %v8091_v33  ;;  %9992 = vst [vmem:[#allocation98_spill] sm:$0xff] %v8093_v26  ;;  %v9997_v33 = vld [vmem:[#allocation50_spill] sm:$0xff] }
 0x3ec   : > { %2609 = vrot.lane.b32.xlu1 %v9993_v49, %s5336_s20  ;;  %2611 = vrot.lane.b32.xlu0 %v9994_v63, %s5336_s20 }
 0x3ed   : > { %5269 = vmatpush3.bf16.msra.mxu1 %v5254_v7  ;;  %5257 = vmatpush3.bf16.msra.mxu0 %v5254_v7 }
 0x3ee   : > { %v8105_v45 = vpop.permute.xlu1 %2427  ;;  %v8107_v26 = vpop.permute.xlu0 %2429  ;;  %5265 = vmatprep.subr.bf16.mxu1 %v5258_v15  ;;  %5259 = vmatprep.subr.bf16.mxu0 %v5258_v15 }
 0x3ef   : > { %9995 = vst [vmem:[#allocation42_spill] sm:$0xff] %v8105_v45  ;;  %9996 = vst [vmem:[#allocation31_spill] sm:$0xff] %v8107_v26  ;;  %v2123_v45 = vld [vmem:[%s9281_s3 + $0x40] sm:$0xff] }
 0x3f0   : > { %2613 = vrot.lane.b32.xlu1 %v9997_v33, %s5336_s20  ;;  %2615 = vrot.lane.b32.xlu0 %v9998_v34, %s5336_s20 }
 0x3f1   : > { %5270 = vmatpush3.bf16.msra.mxu1 %v5258_v15  ;;  %5261 = vmatpush3.bf16.msra.mxu0 %v5258_v15 }
 0x3f2   : > { %v8119_v22 = vpop.permute.xlu1 %2431  ;;  %v8121_v26 = vpop.permute.xlu0 %2433  ;;  %5266 = vmatprep.subr.mxu1 %v2123_v45  ;;  %5188 = vmatprep.subr.mxu0 %v2123_v45 }
 0x3f3   : > { %9999 = vst [vmem:[#allocation109_spill] sm:$0xff] %v8119_v22  ;;  %10000 = vst [vmem:[#allocation121_spill] sm:$0xff] %v8121_v26 }
 0x3f4   : > { %2704 = vrot.lane.b32.xlu1 %v7736_v23, %s5338_s17  ;;  %2706 = vrot.lane.b32.xlu0 %v7752_v37, %s5338_s17  ;;  %v3076_v23 = vsel %vm1360_vm3, %v7359_v52, %v7862_v31  ;;  %v3077_v52 = vsel %vm1360_vm3, %v7356_v58, %v7864_v25 }
 0x3f5   : > { %5271 = vmatpush3.msra.mxu1 %v2123_v45  ;;  %5189 = vmatpush3.msra.mxu0 %v2123_v45 }
 0x3f6   : > { %v8130_v54 = vpop.permute.xlu1 %2435  ;;  %v8132_v7 = vpop.permute.xlu0 %2437 }
 0x3f7   : > { %10001 = vst [vmem:[#allocation136_spill] sm:$0xff] %v8130_v54  ;;  %10002 = vst [vmem:[#allocation141_spill] sm:$0xff] %v8132_v7 }
 0x3f8   : > { %2800 = vrot.lane.b32.xlu1 %v7397_v3, %s5339_s23  ;;  %2802 = vrot.lane.b32.xlu0 %v7394_v55, %s5339_s23 }
 0x3fa   : > { %v8138_v36 = vpop.permute.xlu1 %2439  ;;  %v8140_v26 = vpop.permute.xlu0 %2441 }
 0x3fb   : > { %10003 = vst [vmem:[#allocation137_spill] sm:$0xff] %v8138_v36  ;;  %10004 = vst [vmem:[#allocation10_spill] sm:$0xff] %v8140_v26 }
 0x3fc   : > { %2893 = vrot.lane.b32.xlu1 %v9990_v51, %s5340_s24  ;;  %2895 = vrot.lane.b32.xlu0 %v9993_v49, %s5340_s24 }
 0x3fe   : > { %v8146_v15 = vpop.permute.xlu1 %2443  ;;  %v8148_v7 = vpop.permute.xlu0 %2445 }
 0x3ff   : > { %10005 = vst [vmem:[#allocation11_spill] sm:$0xff] %v8146_v15  ;;  %10006 = vst [vmem:[#allocation44_spill] sm:$0xff] %v8148_v7 }
 0x400   : > { %2986 = vrot.lane.b32.xlu1 %v7749_v27, %s5341_s25  ;;  %2708 = vrot.lane.b32.xlu0 %v7749_v27, %s5338_s17 }
 0x402   : > { %v8154_v45 = vpop.permute.xlu1 %2447  ;;  %v8156_v26 = vpop.permute.xlu0 %2449 }
 0x403   : > { %10007 = vst [vmem:[#allocation45_spill] sm:$0xff] %v8154_v45  ;;  %10008 = vst [vmem:[#allocation73_spill] sm:$0xff] %v8156_v26 }
 0x404   : > { %2988 = vrot.lane.b32.xlu1 %v7765_v56, %s5341_s25  ;;  %2710 = vrot.lane.b32.xlu0 %v7765_v56, %s5338_s17 }
 0x406   : > { %v8162_v49 = vpop.permute.xlu1 %2451  ;;  %v8164_v51 = vpop.permute.xlu0 %2453 }
 0x407   : > { %10009 = vst [vmem:[#allocation74_spill] sm:$0xff] %v8162_v49  ;;  %10010 = vst [vmem:[#allocation99_spill] sm:$0xff] %v8164_v51 }
 0x408   : > { %2804 = vrot.lane.b32.xlu1 %v7422_v39, %s5339_s23  ;;  %2806 = vrot.lane.b32.xlu0 %v7419_v9, %s5339_s23 }
 0x40a   : > { %v8170_v27 = vpop.permute.xlu1 %2455  ;;  %v8172_v45 = vpop.permute.xlu0 %2457 }
 0x40b   : > { %10011 = vst [vmem:[#allocation100_spill] sm:$0xff] %v8170_v27  ;;  %10012 = vst [vmem:[#allocation43_spill] sm:$0xff] %v8172_v45 }
 0x40c   : > { %2897 = vrot.lane.b32.xlu1 %v9994_v63, %s5340_s24  ;;  %2899 = vrot.lane.b32.xlu0 %v9997_v33, %s5340_s24 }
 0x40e   : > { %v8178_v56 = vpop.permute.xlu1 %2459  ;;  %v8180_v49 = vpop.permute.xlu0 %2461 }
 0x40f   : > { %10013 = vst [vmem:[#allocation122_spill] sm:$0xff] %v8178_v56  ;;  %10014 = vst [vmem:[#allocation14_spill] sm:$0xff] %v8180_v49 }
 0x410   : > { %2990 = vrot.lane.b32.xlu1 %v7762_v17, %s5341_s25  ;;  %2712 = vrot.lane.b32.xlu0 %v7762_v17, %s5338_s17 }
 0x412   : > { %v8186_v51 = vpop.permute.xlu1 %2463  ;;  %v8188_v27 = vpop.permute.xlu0 %2497 }
 0x413   : > { %10015 = vst [vmem:[#allocation15_spill] sm:$0xff] %v8186_v51  ;;  %10016 = vst [vmem:[#allocation12_spill] sm:$0xff] %v8188_v27  ;;  %v10018_v51 = vld [vmem:[#allocation79_spill] sm:$0xff] }
 0x414   : > { %2992 = vrot.lane.b32.xlu1 %v7778_v19, %s5341_s25  ;;  %2714 = vrot.lane.b32.xlu0 %v7778_v19, %s5338_s17 }
 0x416   : > { %v8194_v33 = vpop.permute.xlu1 %2499  ;;  %v8196_v63 = vpop.permute.xlu0 %2501 }
 0x417   : > { %10017 = vst [vmem:[#allocation13_spill] sm:$0xff] %v8194_v33 }
 0x418   : > { %2808 = vrot.lane.b32.xlu1 %v7445_v12, %s5339_s23  ;;  %2810 = vrot.lane.b32.xlu0 %v7442_v8, %s5339_s23 }
 0x41a   : > { %v8202_v17 = vpop.permute.xlu1 %2503  ;;  %v8204_v49 = vpop.permute.xlu0 %2505 }
 0x41c   : > { %2901 = vrot.lane.b32.xlu1 %v9998_v34, %s5340_s24  ;;  %2903 = vrot.lane.b32.xlu0 %v10018_v51, %s5340_s24 }
 0x41e   : > { %v8210_v19 = vpop.permute.xlu1 %2507  ;;  %v8212_v56 = vpop.permute.xlu0 %2509 }
 0x420   : > { %2994 = vrot.lane.b32.xlu1 %v7775_v21, %s5341_s25  ;;  %2617 = vrot.lane.b32.xlu0 %v10018_v51, %s5336_s20 }
 0x422   : > { %v8218_v45 = vpop.permute.xlu1 %2511  ;;  %v8220_v26 = vpop.permute.xlu0 %2513 }
 0x424   : > { %2716 = vrot.lane.b32.xlu1 %v7775_v21, %s5338_s17  ;;  %2996 = vrot.lane.b32.xlu0 %v7791_v20, %s5341_s25  ;;  %v10020_v21 = vld [vmem:[#allocation55_spill] sm:$0xff] }
 0x426   : > { %v8226_v34 = vpop.permute.xlu1 %2515  ;;  %v8228_v33 = vpop.permute.xlu0 %2517 }
 0x428   : > { %2718 = vrot.lane.b32.xlu1 %v7791_v20, %s5338_s17  ;;  %2812 = vrot.lane.b32.xlu0 %v7469_v38, %s5339_s23  ;;  %v10023_v20 = vld [vmem:[#allocation47_spill] sm:$0xff] }
 0x42a   : > { %v8234_v51 = vpop.permute.xlu1 %2519  ;;  %v8236_v27 = vpop.permute.xlu0 %2521 }
 0x42b   : > { %10019 = vst [vmem:[#allocation46_spill] sm:$0xff] %v8236_v27 }
 0x42c   : > { %2814 = vrot.lane.b32.xlu1 %v7466_v42, %s5339_s23  ;;  %2905 = vrot.lane.b32.xlu0 %v10020_v21, %s5340_s24 }
 0x42e   : > { %v8242_v7 = vpop.permute.xlu1 %2523  ;;  %v8244_v15 = vpop.permute.xlu0 %2525 }
 0x42f   : > { %10021 = vst [vmem:[#allocation32_spill] sm:$0xff] %v8242_v7  ;;  %10022 = vst [vmem:[#allocation75_spill] sm:$0xff] %v8244_v15 }
 0x430   : > { %2619 = vrot.lane.b32.xlu1 %v10020_v21, %s5336_s20  ;;  %2907 = vrot.lane.b32.xlu0 %v10023_v20, %s5340_s24 }
 0x432   : > { %v8250_v36 = vpop.permute.xlu1 %2527  ;;  %v8252_v54 = vpop.permute.xlu0 %2529 }
 0x433   : > { %10024 = vst [vmem:[#allocation76_spill] sm:$0xff] %v8250_v36  ;;  %10025 = vst [vmem:[#allocation101_spill] sm:$0xff] %v8252_v54 }
 0x434   : > { %2998 = vrot.lane.b32.xlu1 %v7788_v6, %s5341_s25  ;;  %2621 = vrot.lane.b32.xlu0 %v10023_v20, %s5336_s20 }
 0x436   : > { %v8258_v22 = vpop.permute.xlu1 %2531  ;;  %v8260_v37 = vpop.permute.xlu0 %2533 }
 0x437   : > { %10026 = vst [vmem:[#allocation102_spill] sm:$0xff] %v8258_v22  ;;  %10027 = vst [vmem:[#allocation123_spill] sm:$0xff] %v8260_v37 }
 0x438   : > { %2720 = vrot.lane.b32.xlu1 %v7788_v6, %s5338_s17  ;;  %3000 = vrot.lane.b32.xlu0 %v7804_v29, %s5341_s25  ;;  %v10032_v6 = vld [vmem:[#allocation82_spill] sm:$0xff] }
 0x43a   : > { %v8266_v21 = vpop.permute.xlu1 %2535  ;;  %v8268_v36 = vpop.permute.xlu0 %2537 }
 0x43b   : > { %10028 = vst [vmem:[#allocation124_spill] sm:$0xff] %v8266_v21  ;;  %10029 = vst [vmem:[#allocation18_spill] sm:$0xff] %v8268_v36 }
 0x43c   : > { %2722 = vrot.lane.b32.xlu1 %v7804_v29, %s5338_s17  ;;  %2816 = vrot.lane.b32.xlu0 %v7490_v59, %s5339_s23  ;;  %v10035_v29 = vld [vmem:[#allocation81_spill] sm:$0xff] }
 0x43e   : > { %v8274_v20 = vpop.permute.xlu1 %2539  ;;  %v8276_v22 = vpop.permute.xlu0 %2541 }
 0x43f   : > { %10030 = vst [vmem:[#allocation19_spill] sm:$0xff] %v8274_v20  ;;  %10031 = vst [vmem:[#allocation16_spill] sm:$0xff] %v8276_v22  ;;  %v10038_v22 = vld [vmem:[#allocation89_spill] sm:$0xff] }
 0x440   : > { %2818 = vrot.lane.b32.xlu1 %v7487_v40, %s5339_s23  ;;  %2909 = vrot.lane.b32.xlu0 %v10032_v6, %s5340_s24 }
 0x442   : > { %v8282_v37 = vpop.permute.xlu1 %2543  ;;  %v8284_v21 = vpop.permute.xlu0 %2545 }
 0x443   : > { %10033 = vst [vmem:[#allocation17_spill] sm:$0xff] %v8282_v37  ;;  %10034 = vst [vmem:[#allocation33_spill] sm:$0xff] %v8284_v21 }
 0x444   : > { %2623 = vrot.lane.b32.xlu1 %v10032_v6, %s5336_s20  ;;  %2911 = vrot.lane.b32.xlu0 %v10035_v29, %s5340_s24  ;;  %v10041_v6 = vld [vmem:[#allocation90_spill] sm:$0xff] }
 0x446   : > { %v8290_v36 = vpop.permute.xlu1 %2547  ;;  %v8292_v20 = vpop.permute.xlu0 %2549 }
 0x447   : > { %10036 = vst [vmem:[#allocation34_spill] sm:$0xff] %v8290_v36  ;;  %10037 = vst [vmem:[#allocation35_spill] sm:$0xff] %v8292_v20 }
 0x448   : > { %3002 = vrot.lane.b32.xlu1 %v10038_v22, %s5341_s25  ;;  %2625 = vrot.lane.b32.xlu0 %v10035_v29, %s5336_s20 }
 0x44a   : > { %v8298_v54 = vpop.permute.xlu1 %2551  ;;  %v8300_v37 = vpop.permute.xlu0 %2553 }
 0x44b   : > { %10039 = vst [vmem:[#allocation20_spill] sm:$0xff] %v8298_v54  ;;  %10040 = vst [vmem:[#allocation138_spill] sm:$0xff] %v8300_v37 }
 0x44c   : > { %2724 = vrot.lane.b32.xlu1 %v10038_v22, %s5338_s17  ;;  %3004 = vrot.lane.b32.xlu0 %v10041_v6, %s5341_s25  ;;  %v10046_v22 = vld [vmem:[#allocation58_spill] sm:$0xff] }
 0x44e   : > { %v8306_v21 = vpop.permute.xlu1 %2555  ;;  %v8308_v36 = vpop.permute.xlu0 %2557 }
 0x44f   : > { %10042 = vst [vmem:[#allocation21_spill] sm:$0xff] %v8306_v21  ;;  %10043 = vst [vmem:[#allocation36_spill] sm:$0xff] %v8308_v36 }
 0x450   : > { %2726 = vrot.lane.b32.xlu1 %v10041_v6, %s5338_s17  ;;  %2820 = vrot.lane.b32.xlu0 %v7517_v10, %s5339_s23  ;;  %v10048_v6 = vld [vmem:[#allocation57_spill] sm:$0xff] }
 0x452   : > { %v8314_v29 = vpop.permute.xlu1 %2559  ;;  %v8316_v54 = vpop.permute.xlu0 %2599 }
 0x453   : > { %10044 = vst [vmem:[#allocation24_spill] sm:$0xff] %v8314_v29  ;;  %10045 = vst [vmem:[#allocation37_spill] sm:$0xff] %v8316_v54  ;;  %v10049_v29 = vld [vmem:[#allocation27_spill] sm:$0xff] }
 0x454   : > { %2822 = vrot.lane.b32.xlu1 %v7514_v28, %s5339_s23  ;;  %2913 = vrot.lane.b32.xlu0 %v10046_v22, %s5340_s24 }
 0x456   : > { %v8322_v37 = vpop.permute.xlu1 %2601  ;;  %v2604_v21 = vpop.permute.xlu0 %2603 }
 0x457   : > { %10047 = vst [vmem:[#allocation25_spill] sm:$0xff] %v8322_v37 }
 0x458   : > { %2627 = vrot.lane.b32.xlu1 %v10046_v22, %s5336_s20  ;;  %2915 = vrot.lane.b32.xlu0 %v10048_v6, %s5340_s24  ;;  %v10050_v22 = vld [vmem:[#allocation117_spill] sm:$0xff] }
 0x45a   : > { %v2606_v36 = vpop.permute.xlu1 %2605  ;;  %v8328_v20 = vpop.permute.xlu0 %2607 }
 0x45c   : > { %3006 = vrot.lane.b32.xlu1 %v10049_v29, %s5341_s25  ;;  %2629 = vrot.lane.b32.xlu0 %v10048_v6, %s5336_s20 }
 0x45e   : > { %v8334_v54 = vpop.permute.xlu1 %2609  ;;  %v8336_v28 = vpop.permute.xlu0 %2611 }
 0x460   : > { %2728 = vrot.lane.b32.xlu1 %v10049_v29, %s5338_s17  ;;  %3008 = vrot.lane.b32.xlu0 %v10050_v22, %s5341_s25  ;;  %v10051_v29 = vld [vmem:[#allocation84_spill] sm:$0xff] }
 0x462   : > { %v8342_v37 = vpop.permute.xlu1 %2613  ;;  %v8344_v10 = vpop.permute.xlu0 %2615 }
 0x464   : > { %2730 = vrot.lane.b32.xlu1 %v10050_v22, %s5338_s17  ;;  %2824 = vrot.lane.b32.xlu0 %v7538_v60, %s5339_s23  ;;  %v10052_v22 = vld [vmem:[#allocation83_spill] sm:$0xff]  ;;  %v3107_v60 = vsel %vm1426_vm6, %v3076_v23, %v8037_v30 }
 0x466   : > { %v2705_v6 = vpop.permute.xlu1 %2704  ;;  %v2707_v40 = vpop.permute.xlu0 %2706 }
 0x468   : > { %2826 = vrot.lane.b32.xlu1 %v7535_v43, %s5339_s23  ;;  %2917 = vrot.lane.b32.xlu0 %v10051_v29, %s5340_s24  ;;  %v3139_v43 = vsel %vm1492_vm8, %v3107_v60, %v8196_v63  ;;  %v3108_v60 = vsel %vm1426_vm6, %v3077_v52, %v8043_v48  ;;  %v10054_v48 = vld [vmem:[#allocation129_spill] sm:$0xff] }
 0x469   : > { %v3171_v27 = vsel %vm1558_vm10, %v3139_v43, %v2604_v21  ;;  %v3140_v43 = vsel %vm1492_vm8, %v3108_v60, %v8202_v17 }
 0x46a   : > { %v2801_v15 = vpop.permute.xlu1 %2800  ;;  %v2803_v59 = vpop.permute.xlu0 %2802  ;;  %v3204_v31 = vsel %vm3201_vm13, %v3171_v27, %v2705_v6  ;;  %v3172_v27 = vsel %vm1558_vm10, %v3140_v43, %v2606_v36  ;;  %v10056_v43 = vld [vmem:[#allocation92_spill] sm:$0xff] }
 0x46b   : > { %v3237_v23 = vsel %vm3234_vm14, %v3204_v31, %v2801_v15  ;;  %v3205_v21 = vsel %vm3201_vm13, %v3172_v27, %v2707_v40 }
 0x46c   : > { %2631 = vrot.lane.b32.xlu1 %v10051_v29, %s5336_s20  ;;  %2919 = vrot.lane.b32.xlu0 %v10052_v22, %s5340_s24  ;;  %v10053_v29 = vld [vmem:[#allocation38_spill] sm:$0xff]  ;;  %v3238_v15 = vsel %vm3234_vm14, %v3205_v21, %v2803_v59  ;;  %v3078_v59 = vsel %vm1360_vm3, %v7374_v35, %v7885_v2  ;;  %v3079_v2 = vsel %vm1360_vm3, %v7371_v16, %v10056_v43 }
 0x46d   : > { %v3109_v52 = vsel %vm1426_vm6, %v3078_v59, %v8045_v53  ;;  %v3110_v53 = vsel %vm1426_vm6, %v3079_v2, %v8055_v14 }
 0x46e   : > { %v2894_v7 = vpop.permute.xlu1 %2893  ;;  %v2896_v42 = vpop.permute.xlu0 %2895  ;;  %v3141_v31 = vsel %vm1492_vm8, %v3109_v52, %v8204_v49 }
 0x46f   : > { %v3270_v30 = vsel %vm3267_vm15, %v3237_v23, %v2894_v7  ;;  %v3271_v7 = vsel %vm3267_vm15, %v3238_v15, %v2896_v42  ;;  %v10055_v42 = vld [vmem:[#allocation112_spill] sm:$0xff]  ;;  %v3173_v23 = vsel %vm1558_vm10, %v3141_v31, %v8328_v20  ;;  %v3142_v20 = vsel %vm1492_vm8, %v3110_v53, %v8210_v19 }
 0x470   : > { %3010 = vrot.lane.b32.xlu1 %v10053_v29, %s5341_s25  ;;  %2633 = vrot.lane.b32.xlu0 %v10052_v22, %s5336_s20 }
 0x472   : > { %v2987_v58 = vpop.permute.xlu1 %2986  ;;  %v2709_v25 = vpop.permute.xlu0 %2708 }
 0x473   : > { %v3303_v63 = vsel %vm3300_vm2, %v3270_v30, %v2987_v58  ;;  %v3206_v30 = vsel %vm3201_vm13, %v3173_v23, %v2709_v25  ;;  %v10057_v58 = vld [vmem:[#allocation111_spill] sm:$0xff]  ;;  %v3174_v25 = vsel %vm1558_vm10, %v3142_v20, %v8334_v54  ;;  %v10060_v23 = vld [vmem:[#allocation49_spill] sm:$0xff] }
 0x474   : > { %2732 = vrot.lane.b32.xlu1 %v10053_v29, %s5338_s17  ;;  %3012 = vrot.lane.b32.xlu0 %v10054_v48, %s5341_s25 }
 0x475   : > { %5193 = vmatprep.mubr.msk.f32.mxu1 %vm3339_vm4, %v3303_v63 }
 0x476   : > { %v2989_v17 = vpop.permute.xlu1 %2988  ;;  %v2711_v6 = vpop.permute.xlu0 %2710 }
 0x477   : > { %v3304_v36 = vsel %vm3300_vm2, %v3271_v7, %v2989_v17  ;;  %v3207_v15 = vsel %vm3201_vm13, %v3174_v25, %v2711_v6  ;;  %v10058_v7 = vld [vmem:[#allocation65_spill] sm:$0xff]  ;;  %v10059_v6 = vld [vmem:[#allocation66_spill] sm:$0xff]  ;;  %v10063_v25 = vld [vmem:[#allocation3_spill] sm:$0xff] }
 0x478   : > { %2734 = vrot.lane.b32.xlu1 %v10054_v48, %s5338_s17  ;;  %2828 = vrot.lane.b32.xlu0 %v7565_v11, %s5339_s23 }
 0x479   : > { %5194 = vmatmul.mubr.msk.f32.vlgmr.msra.gmra.mrb[0].mxu1 %vm3339_vm4, %v3304_v36 }
 0x47a   : > { %v2805_v40 = vpop.permute.xlu1 %2804  ;;  %v2807_v22 = vpop.permute.xlu0 %2806 }
 0x47b   : > { %v3239_v49 = vsel %vm3234_vm14, %v3206_v30, %v2805_v40  ;;  %v3240_v14 = vsel %vm3234_vm14, %v3207_v15, %v2807_v22  ;;  %v3080_v22 = vsel %vm1360_vm3, %v7397_v3, %v7900_v47  ;;  %v3081_v3 = vsel %vm1360_vm3, %v7394_v55, %v7902_v61 }
 0x47c   : > { %2830 = vrot.lane.b32.xlu1 %v7562_v5, %s5339_s23  ;;  %2921 = vrot.lane.b32.xlu0 %v10055_v42, %s5340_s24 }
 0x47e   : > { %v2898_v29 = vpop.permute.xlu1 %2897  ;;  %v2900_v60 = vpop.permute.xlu0 %2899 }
 0x47f   : > { %v3272_v27 = vsel %vm3267_vm15, %v3239_v49, %v2898_v29  ;;  %v3273_v19 = vsel %vm3267_vm15, %v3240_v14, %v2900_v60 }
 0x480   : > { %2635 = vrot.lane.b32.xlu1 %v10055_v42, %s5336_s20  ;;  %2923 = vrot.lane.b32.xlu0 %v10057_v58, %s5340_s24  ;;  %v3111_v42 = vsel %vm1426_vm6, %v3080_v22, %v8057_v57  ;;  %v3112_v57 = vsel %vm1426_vm6, %v3081_v3, %v8063_v1  ;;  %v10061_v1 = vld [vmem:[#allocation59_spill] sm:$0xff] }
 0x481   : > { %v3143_v52 = vsel %vm1492_vm8, %v3111_v42, %v8212_v56  ;;  %v10066_v3 = vld [vmem:[#allocation91_spill] sm:$0xff] }
 0x482   : > { %v2991_v63 = vpop.permute.xlu1 %2990  ;;  %v2713_v21 = vpop.permute.xlu0 %2712  ;;  %v3175_v60 = vsel %vm1558_vm10, %v3143_v52, %v8336_v28  ;;  %v3144_v28 = vsel %vm1492_vm8, %v3112_v57, %v8218_v45  ;;  %v10067_v57 = vld [vmem:[#allocation118_spill] sm:$0xff] }
 0x483   : > { %v3305_v48 = vsel %vm3300_vm2, %v3272_v27, %v2991_v63  ;;  %v3208_v47 = vsel %vm3201_vm13, %v3175_v60, %v2713_v21  ;;  %v3176_v61 = vsel %vm1558_vm10, %v3144_v28, %v8342_v37  ;;  %v10062_v27 = vld [vmem:[#allocation2_spill] sm:$0xff] }
 0x484   : > { %3014 = vrot.lane.b32.xlu1 %v10058_v7, %s5341_s25  ;;  %2637 = vrot.lane.b32.xlu0 %v10057_v58, %s5336_s20 }
 0x485   : > { %5196 = vmatprep.mubr.msk.f32.mxu1 %vm3339_vm4, %v3305_v48 }
 0x486   : > { %v2993_v17 = vpop.permute.xlu1 %2992  ;;  %v2715_v36 = vpop.permute.xlu0 %2714 }
 0x487   : > { %v3306_v54 = vsel %vm3300_vm2, %v3273_v19, %v2993_v17  ;;  %v3209_v58 = vsel %vm3201_vm13, %v3176_v61, %v2715_v36 }
 0x488   : > { %2736 = vrot.lane.b32.xlu1 %v10058_v7, %s5338_s17  ;;  %3016 = vrot.lane.b32.xlu0 %v10059_v6, %s5341_s25  ;;  %v3082_v7 = vsel %vm1360_vm3, %v7422_v39, %v7917_v44  ;;  %v3083_v39 = vsel %vm1360_vm3, %v7419_v9, %v7919_v18 }
 0x489   : > { %5197 = vmatmul.mubr.msk.f32.gmra.mrb[2].mxu1 %vm3339_vm4, %v3306_v54  ;;  %v3113_v14 = vsel %vm1426_vm6, %v3082_v7, %v8065_v24 }
 0x48a   : > { %v2809_v40 = vpop.permute.xlu1 %2808  ;;  %v2811_v59 = vpop.permute.xlu0 %2810  ;;  %v3145_v19 = vsel %vm1492_vm8, %v3113_v14, %v8220_v26  ;;  %v3114_v26 = vsel %vm1426_vm6, %v3083_v39, %v8077_v41  ;;  %v10065_v41 = vld [vmem:[#allocation60_spill] sm:$0xff]  ;;  %v10074_v39 = vld [vmem:[#allocation113_spill] sm:$0xff] }
 0x48b   : > { %v3241_v56 = vsel %vm3234_vm14, %v3208_v47, %v2809_v40  ;;  %v3242_v53 = vsel %vm3234_vm14, %v3209_v58, %v2811_v59  ;;  %v3177_v54 = vsel %vm1558_vm10, %v3145_v19, %v8344_v10  ;;  %v3146_v10 = vsel %vm1492_vm8, %v3114_v26, %v8226_v34 }
 0x48c   : > { %2738 = vrot.lane.b32.xlu1 %v10059_v6, %s5338_s17  ;;  %2832 = vrot.lane.b32.xlu0 %v7585_v50, %s5339_s23  ;;  %v10064_v6 = vld [vmem:[#allocation85_spill] sm:$0xff] }
 0x48e   : > { %v2902_v31 = vpop.permute.xlu1 %2901  ;;  %v2904_v29 = vpop.permute.xlu0 %2903 }
 0x48f   : > { %v3274_v43 = vsel %vm3267_vm15, %v3241_v56, %v2902_v31  ;;  %v3275_v45 = vsel %vm3267_vm15, %v3242_v53, %v2904_v29  ;;  %v10069_v53 = vld [vmem:[#allocation126_spill] sm:$0xff] }
 0x490   : > { %2834 = vrot.lane.b32.xlu1 %v7582_v0, %s5339_s23  ;;  %2925 = vrot.lane.b32.xlu0 %v10060_v23, %s5340_s24 }
 0x492   : > { %v2995_v2 = vpop.permute.xlu1 %2994  ;;  %v2618_v55 = vpop.permute.xlu0 %2617 }
 0x493   : > { %v3307_v30 = vsel %vm3300_vm2, %v3274_v43, %v2995_v2  ;;  %v3178_v18 = vsel %vm1558_vm10, %v3146_v10, %v2618_v55  ;;  %v3084_v43 = vsel %vm1360_vm3, %v7445_v12, %v7932_v4 }
 0x494   : > { %2639 = vrot.lane.b32.xlu1 %v10060_v23, %s5336_s20  ;;  %2927 = vrot.lane.b32.xlu0 %v10061_v1, %s5340_s24  ;;  %v3115_v2 = vsel %vm1426_vm6, %v3084_v43, %v8079_v32  ;;  %v10071_v32 = vld [vmem:[#allocation30_spill] sm:$0xff] }
 0x495   : > { %5199 = vmatprep.mubr.msk.f32.mxu1 %vm3339_vm4, %v3307_v30  ;;  %v3147_v55 = vsel %vm1492_vm8, %v3115_v2, %v8228_v33 }
 0x496   : > { %v2717_v49 = vpop.permute.xlu1 %2716  ;;  %v2997_v20 = vpop.permute.xlu0 %2996 }
 0x497   : > { %v3308_v37 = vsel %vm3300_vm2, %v3275_v45, %v2997_v20  ;;  %v3210_v44 = vsel %vm3201_vm13, %v3177_v54, %v2717_v49  ;;  %v10070_v45 = vld [vmem:[#allocation86_spill] sm:$0xff] }
 0x498   : > { %3018 = vrot.lane.b32.xlu1 %v10062_v27, %s5341_s25  ;;  %2641 = vrot.lane.b32.xlu0 %v10061_v1, %s5336_s20  ;;  %v10068_v1 = vld [vmem:[#allocation68_spill] sm:$0xff] }
 0x499   : > { %5200 = vmatmul.mubr.msk.f32.gmra.mrb[4].mxu1 %vm3339_vm4, %v3308_v37  ;;  %v3085_v12 = vsel %vm1360_vm3, %v7442_v8, %v10068_v1 }
 0x49a   : > { %v2719_v63 = vpop.permute.xlu1 %2718  ;;  %v2813_v21 = vpop.permute.xlu0 %2812  ;;  %v3116_v49 = vsel %vm1426_vm6, %v3085_v12, %v10071_v32 }
 0x49b   : > { %v3243_v24 = vsel %vm3234_vm14, %v3210_v44, %v2813_v21  ;;  %v3211_v42 = vsel %vm3201_vm13, %v3178_v18, %v2719_v63  ;;  %v3148_v20 = vsel %vm1492_vm8, %v3116_v49, %v8234_v51  ;;  %v10075_v44 = vld [vmem:[#allocation39_spill] sm:$0xff] }
 0x49c   : > { %2740 = vrot.lane.b32.xlu1 %v10062_v27, %s5338_s17  ;;  %3020 = vrot.lane.b32.xlu0 %v10063_v25, %s5341_s25 }
 0x49e   : > { %v2815_v48 = vpop.permute.xlu1 %2814  ;;  %v2906_v15 = vpop.permute.xlu0 %2905 }
 0x49f   : > { %v3276_v40 = vsel %vm3267_vm15, %v3243_v24, %v2906_v15  ;;  %v3244_v52 = vsel %vm3234_vm14, %v3211_v42, %v2815_v48  ;;  %v10072_v48 = vld [vmem:[#allocation114_spill] sm:$0xff]  ;;  %v10076_v24 = vld [vmem:[#allocation5_spill] sm:$0xff] }
 0x4a0   : > { %2742 = vrot.lane.b32.xlu1 %v10063_v25, %s5338_s17  ;;  %2836 = vrot.lane.b32.xlu0 %v7619_v13, %s5339_s23  ;;  %v3086_v10 = vsel %vm1360_vm3, %v7469_v38, %v10076_v24  ;;  %v10098_v24 = vld [vmem:[#allocation109_spill] sm:$0xff] }
 0x4a2   : > { %v2620_v17 = vpop.permute.xlu1 %2619  ;;  %v2908_v36 = vpop.permute.xlu0 %2907 }
 0x4a3   : > { %v3277_v34 = vsel %vm3267_vm15, %v3244_v52, %v2908_v36  ;;  %v3179_v58 = vsel %vm1558_vm10, %v3147_v55, %v2620_v17  ;;  %v10073_v17 = vld [vmem:[#allocation26_spill] sm:$0xff]  ;;  %v10080_v52 = vld [vmem:[#allocation53_spill] sm:$0xff] }
 0x4a4   : > { %2838 = vrot.lane.b32.xlu1 %v7616_v46, %s5339_s23  ;;  %2929 = vrot.lane.b32.xlu0 %v10064_v6, %s5340_s24  ;;  %v10084_v55 = vld [vmem:[#allocation130_spill] sm:$0xff] }
 0x4a6   : > { %v2999_v59 = vpop.permute.xlu1 %2998  ;;  %v2622_v9 = vpop.permute.xlu0 %2621 }
 0x4a7   : > { %v3309_v22 = vsel %vm3300_vm2, %v3276_v40, %v2999_v59  ;;  %v3180_v63 = vsel %vm1558_vm10, %v3148_v20, %v2622_v9  ;;  %v10078_v59 = vld [vmem:[#allocation46_spill] sm:$0xff]  ;;  %v10088_v20 = vld [vmem:[#allocation51_spill] sm:$0xff] }
 0x4a8   : > { %2643 = vrot.lane.b32.xlu1 %v10064_v6, %s5336_s20  ;;  %2931 = vrot.lane.b32.xlu0 %v10065_v41, %s5340_s24 }
 0x4a9   : > { %5202 = vmatprep.mubr.msk.f32.mxu1 %vm3339_vm4, %v3309_v22 }
 0x4aa   : > { %v2721_v31 = vpop.permute.xlu1 %2720  ;;  %v3001_v29 = vpop.permute.xlu0 %3000 }
 0x4ab   : > { %v3310_v60 = vsel %vm3300_vm2, %v3277_v34, %v3001_v29  ;;  %v3212_v4 = vsel %vm3201_vm13, %v3179_v58, %v2721_v31  ;;  %v10081_v31 = vld [vmem:[#allocation77_spill] sm:$0xff]  ;;  %v10082_v29 = vld [vmem:[#allocation42_spill] sm:$0xff] }
 0x4ac   : > { %3022 = vrot.lane.b32.xlu1 %v10066_v3, %s5341_s25  ;;  %2645 = vrot.lane.b32.xlu0 %v10065_v41, %s5336_s20  ;;  %v10079_v41 = vld [vmem:[#allocation94_spill] sm:$0xff] }
 0x4ad   : > { %5203 = vmatmul.mubr.msk.f32.gmra.mrb[6].mxu1 %vm3339_vm4, %v3310_v60  ;;  %v3087_v38 = vsel %vm1360_vm3, %v10080_v52, %v10079_v41 }
 0x4ae   : > { %v2723_v47 = vpop.permute.xlu1 %2722  ;;  %v2817_v23 = vpop.permute.xlu0 %2816  ;;  %v3118_v60 = vsel %vm1426_vm6, %v3087_v38, %v10082_v29  ;;  %v10100_v38 = vld [vmem:[#allocation67_spill] sm:$0xff] }
 0x4af   : > { %v3245_v33 = vsel %vm3234_vm14, %v3212_v4, %v2817_v23  ;;  %v3213_v25 = vsel %vm3201_vm13, %v3180_v63, %v2723_v47  ;;  %v10083_v47 = vld [vmem:[#allocation32_spill] sm:$0xff]  ;;  %v10085_v4 = vld [vmem:[#allocation61_spill] sm:$0xff]  ;;  %v10090_v63 = vld [vmem:[#allocation106_spill] sm:$0xff] }
 0x4b0   : > { %2744 = vrot.lane.b32.xlu1 %v10066_v3, %s5338_s17  ;;  %3024 = vrot.lane.b32.xlu0 %v10067_v57, %s5341_s25  ;;  %v3150_v23 = vsel %vm1492_vm8, %v3118_v60, %v10083_v47  ;;  %v10101_v47 = vld [vmem:[#allocation4_spill] sm:$0xff] }
 0x4b2   : > { %v2819_v56 = vpop.permute.xlu1 %2818  ;;  %v2910_v28 = vpop.permute.xlu0 %2909 }
 0x4b3   : > { %v3278_v37 = vsel %vm3267_vm15, %v3245_v33, %v2910_v28  ;;  %v3246_v15 = vsel %vm3234_vm14, %v3213_v25, %v2819_v56  ;;  %v10087_v33 = vld [vmem:[#allocation127_spill] sm:$0xff]  ;;  %v10091_v25 = vld [vmem:[#allocation22_spill] sm:$0xff] }
 0x4b4   : > { %2746 = vrot.lane.b32.xlu1 %v10067_v57, %s5338_s17  ;;  %2840 = vrot.lane.b32.xlu0 %v7646_v62, %s5339_s23 }
 0x4b6   : > { %v2624_v61 = vpop.permute.xlu1 %2623  ;;  %v2912_v30 = vpop.permute.xlu0 %2911 }
 0x4b7   : > { %v3279_v51 = vsel %vm3267_vm15, %v3246_v15, %v2912_v30  ;;  %v10093_v15 = vld [vmem:[#allocation31_spill] sm:$0xff] }
 0x4b8   : > { %2700 = vrot.lane.b32.xlu1 %v10069_v53, %s5338_s17  ;;  %2842 = vrot.lane.b32.xlu0 %v10070_v45, %s5339_s23  ;;  %v10086_v53 = vld [vmem:[#allocation52_spill] sm:$0xff] }
 0x4ba   : > { %v3003_v27 = vpop.permute.xlu1 %3002  ;;  %v2626_v8 = vpop.permute.xlu0 %2625 }
 0x4bb   : > { %v3311_v21 = vsel %vm3300_vm2, %v3278_v37, %v3003_v27  ;;  %v3182_v43 = vsel %vm1558_vm10, %v3150_v23, %v2626_v8  ;;  %v10089_v8 = vld [vmem:[#allocation40_spill] sm:$0xff] }
 0x4bc   : > { %2933 = vrot.lane.b32.xlu1 %v10072_v48, %s5340_s24  ;;  %2647 = vrot.lane.b32.xlu0 %v10072_v48, %s5336_s20  ;;  %v10092_v48 = vld [vmem:[#allocation64_spill] sm:$0xff] }
 0x4bd   : > { %5205 = vmatprep.mubr.msk.f32.mxu1 %vm3339_vm4, %v3311_v21  ;;  %v3088_v21 = vsel %vm1360_vm3, %v10090_v63, %v10089_v8 }
 0x4be   : > { %v2725_v7 = vpop.permute.xlu1 %2724  ;;  %v3005_v14 = vpop.permute.xlu0 %3004 }
 0x4bf   : > { %v3312_v19 = vsel %vm3300_vm2, %v3279_v51, %v3005_v14  ;;  %v3119_v51 = vsel %vm1426_vm6, %v3088_v21, %v10093_v15  ;;  %v10111_v21 = vld [vmem:[#allocation23_spill] sm:$0xff] }
 0x4c0   : > { %2702 = vrot.lane.b32.xlu1 %v10073_v17, %s5338_s17  ;;  %2796 = vrot.lane.b32.xlu0 %v7374_v35, %s5339_s23  ;;  %v10077_v35 = vld [vmem:[#allocation98_spill] sm:$0xff] }
 0x4c1   : > { %5206 = vmatmul.mubr.msk.f32.gmra.mrb[8].mxu1 %vm3339_vm4, %v3312_v19  ;;  %v3117_v40 = vsel %vm1426_vm6, %v3086_v10, %v10077_v35 }
 0x4c2   : > { %v2727_v36 = vpop.permute.xlu1 %2726  ;;  %v2821_v54 = vpop.permute.xlu0 %2820  ;;  %v3149_v9 = vsel %vm1492_vm8, %v3117_v40, %v10078_v59  ;;  %v10099_v40 = vld [vmem:[#allocation76_spill] sm:$0xff] }
 0x4c3   : > { %v3181_v42 = vsel %vm1558_vm10, %v3149_v9, %v2624_v61 }
 0x4c4   : > { %2935 = vrot.lane.b32.xlu1 %v10074_v39, %s5340_s24  ;;  %3026 = vrot.lane.b32.xlu0 %v10075_v44, %s5341_s25  ;;  %v3214_v34 = vsel %vm3201_vm13, %v3181_v42, %v2725_v7  ;;  %v10094_v7 = vld [vmem:[#allocation75_spill] sm:$0xff] }
 0x4c5   : > { %v3247_v3 = vsel %vm3234_vm14, %v3214_v34, %v2821_v54  ;;  %v3151_v14 = vsel %vm1492_vm8, %v3119_v51, %v10094_v7  ;;  %v10095_v54 = vld [vmem:[#allocation119_spill] sm:$0xff]  ;;  %v10113_v51 = vld [vmem:[#allocation102_spill] sm:$0xff] }
 0x4c6   : > { %v2823_v6 = vpop.permute.xlu1 %2822  ;;  %v2914_v26 = vpop.permute.xlu0 %2913 }
 0x4c7   : > { %v3280_v57 = vsel %vm3267_vm15, %v3247_v3, %v2914_v26  ;;  %v10097_v26 = vld [vmem:[#allocation125_spill] sm:$0xff] }
 0x4c8   : > { %2649 = vrot.lane.b32.xlu1 %v10074_v39, %s5336_s20  ;;  %2748 = vrot.lane.b32.xlu0 %v10075_v44, %s5338_s17  ;;  %v10096_v39 = vld [vmem:[#allocation105_spill] sm:$0xff] }
 0x4c9   : > { %v3089_v44 = vsel %vm1360_vm3, %v10096_v39, %v10095_v54 }
 0x4ca   : > { %v2628_v18 = vpop.permute.xlu1 %2627  ;;  %v2916_v22 = vpop.permute.xlu0 %2915  ;;  %v3120_v10 = vsel %vm1426_vm6, %v3089_v44, %v10098_v24  ;;  %v10114_v44 = vld [vmem:[#allocation131_spill] sm:$0xff] }
 0x4cb   : > { %v3152_v59 = vsel %vm1492_vm8, %v3120_v10, %v10099_v40  ;;  %v10115_v40 = vld [vmem:[#allocation93_spill] sm:$0xff] }
 0x4cc   : > { %2798 = vrot.lane.b32.xlu1 %v7371_v16, %s5339_s23  ;;  %2889 = vrot.lane.b32.xlu0 %v10081_v31, %s5340_s24  ;;  %v3215_v16 = vsel %vm3201_vm13, %v3182_v43, %v2727_v36  ;;  %v3183_v36 = vsel %vm1558_vm10, %v3151_v14, %v2628_v18 }
 0x4cd   : > { %v3248_v61 = vsel %vm3234_vm14, %v3215_v16, %v2823_v6  ;;  %v10104_v16 = vld [vmem:[#allocation56_spill] sm:$0xff] }
 0x4ce   : > { %v3007_v56 = vpop.permute.xlu1 %3006  ;;  %v2630_v28 = vpop.permute.xlu0 %2629  ;;  %v3281_v30 = vsel %vm3267_vm15, %v3248_v61, %v2916_v22  ;;  %v10105_v61 = vld [vmem:[#allocation62_spill] sm:$0xff] }
 0x4cf   : > { %v3313_v2 = vsel %vm3300_vm2, %v3280_v57, %v3007_v56  ;;  %v3184_v42 = vsel %vm1558_vm10, %v3152_v59, %v2630_v28  ;;  %v10102_v56 = vld [vmem:[#allocation87_spill] sm:$0xff] }
 0x4d0   : > { %3028 = vrot.lane.b32.xlu1 %v10084_v55, %s5341_s25  ;;  %2750 = vrot.lane.b32.xlu0 %v10084_v55, %s5338_s17 }
 0x4d1   : > { %5208 = vmatprep.mubr.msk.f32.mxu1 %vm3339_vm4, %v3313_v2  ;;  %v10103_v2 = vld [vmem:[#allocation132_spill] sm:$0xff] }
 0x4d2   : > { %v2729_v58 = vpop.permute.xlu1 %2728  ;;  %v3009_v1 = vpop.permute.xlu0 %3008  ;;  %v3090_v55 = vsel %vm1360_vm3, %v10104_v16, %v10103_v2 }
 0x4d3   : > { %v3314_v12 = vsel %vm3300_vm2, %v3281_v30, %v3009_v1  ;;  %v3216_v6 = vsel %vm3201_vm13, %v3183_v36, %v2729_v58  ;;  %v10106_v30 = vld [vmem:[#allocation88_spill] sm:$0xff]  ;;  %v10107_v58 = vld [vmem:[#allocation121_spill] sm:$0xff] }
 0x4d4   : > { %2844 = vrot.lane.b32.xlu1 %v10085_v4, %s5339_s23  ;;  %2891 = vrot.lane.b32.xlu0 %v10086_v53, %s5340_s24  ;;  %v3121_v1 = vsel %vm1426_vm6, %v3090_v55, %v10107_v58 }
 0x4d5   : > { %5209 = vmatmul.mubr.msk.f32.gmra.mrb[10].mxu1 %vm3339_vm4, %v3314_v12  ;;  %v10108_v12 = vld [vmem:[#allocation101_spill] sm:$0xff] }
 0x4d6   : > { %v2731_v32 = vpop.permute.xlu1 %2730  ;;  %v2825_v49 = vpop.permute.xlu0 %2824  ;;  %v3153_v53 = vsel %vm1492_vm8, %v3121_v1, %v10108_v12 }
 0x4d7   : > { %v3249_v35 = vsel %vm3234_vm14, %v3216_v6, %v2825_v49  ;;  %v3217_v52 = vsel %vm3201_vm13, %v3184_v42, %v2731_v32  ;;  %v10117_v42 = vld [vmem:[#allocation63_spill] sm:$0xff] }
 0x4d8   : > { %2982 = vrot.lane.b32.xlu1 %v10087_v33, %s5341_s25  ;;  %2846 = vrot.lane.b32.xlu0 %v10088_v20, %s5339_s23  ;;  %v2696_v58 = vrot.slane %v10117_v42, 2 }
 0x4da   : > { %v2827_v37 = vpop.permute.xlu1 %2826  ;;  %v2918_v27 = vpop.permute.xlu0 %2917 }
 0x4db   : > { %v3282_v9 = vsel %vm3267_vm15, %v3249_v35, %v2918_v27  ;;  %v3250_v34 = vsel %vm3234_vm14, %v3217_v52, %v2827_v37  ;;  %v10109_v37 = vld [vmem:[#allocation69_spill] sm:$0xff]  ;;  %v10110_v27 = vld [vmem:[#allocation48_spill] sm:$0xff] }
 0x4dc   : > { %2937 = vrot.lane.b32.xlu1 %v10091_v25, %s5340_s24  ;;  %2984 = vrot.lane.b32.xlu0 %v10092_v48, %s5341_s25  ;;  %v3091_v8 = vsel %vm1360_vm3, %v10110_v27, %v10109_v37  ;;  %v10118_v52 = vld [vmem:[#allocation116_spill] sm:$0xff]  ;;  %v10125_v27 = vld [vmem:[#allocation137_spill] sm:$0xff] }
 0x4de   : > { %v2632_v19 = vpop.permute.xlu1 %2631  ;;  %v2920_v17 = vpop.permute.xlu0 %2919 }
 0x4df   : > { %v3283_v31 = vsel %vm3267_vm15, %v3250_v34, %v2920_v17  ;;  %v3185_v33 = vsel %vm1558_vm10, %v3153_v53, %v2632_v19  ;;  %v10123_v53 = vld [vmem:[#allocation6_spill] sm:$0xff] }
 0x4e0   : > { %2651 = vrot.lane.b32.xlu1 %v10091_v25, %s5336_s20  ;;  %2939 = vrot.lane.b32.xlu0 %v10097_v26, %s5340_s24  ;;  %v10112_v25 = vld [vmem:[#allocation136_spill] sm:$0xff] }
 0x4e1   : > { %v3122_v48 = vsel %vm1426_vm6, %v3091_v8, %v10112_v25 }
 0x4e2   : > { %v3011_v18 = vpop.permute.xlu1 %3010  ;;  %v2634_v22 = vpop.permute.xlu0 %2633  ;;  %v3154_v7 = vsel %vm1492_vm8, %v3122_v48, %v10113_v51 }
 0x4e3   : > { %v3315_v41 = vsel %vm3300_vm2, %v3282_v9, %v3011_v18  ;;  %v3186_v36 = vsel %vm1558_vm10, %v3154_v7, %v2634_v22  ;;  %v10116_v18 = vld [vmem:[#allocation9_spill] sm:$0xff] }
 0x4e4   : > { %3030 = vrot.lane.b32.xlu1 %v10100_v38, %s5341_s25  ;;  %2653 = vrot.lane.b32.xlu0 %v10097_v26, %s5336_s20  ;;  %v2594_v22 = vrot.slane %v10116_v18, 1 }
 0x4e5   : > { %5211 = vmatprep.mubr.msk.f32.mxu1 %vm3339_vm4, %v3315_v41  ;;  %v2595_v41 = vrot.slane %v10117_v42, 1 }
 0x4e6   : > { %v2733_v29 = vpop.permute.xlu1 %2732  ;;  %v3013_v60 = vpop.permute.xlu0 %3012 }
 0x4e7   : > { %v3316_v3 = vsel %vm3300_vm2, %v3283_v31, %v3013_v60  ;;  %v3218_v63 = vsel %vm3201_vm13, %v3185_v33, %v2733_v29  ;;  %v2596_v60 = vsel %vm371_vm0, %v2594_v22, %v2595_v41  ;;  %v10129_v22 = vld [vmem:[#allocation54_spill] sm:$0xff] }
 0x4e8   : > { %2752 = vrot.lane.b32.xlu1 %v10100_v38, %s5338_s17  ;;  %3032 = vrot.lane.b32.xlu0 %v10101_v47, %s5341_s25  ;;  %v2114_v38 = vsel %vm1987_vm12, %v10118_v52, 0.0  ;;  %vm4715_vm12 = vcmask 1047559  }
 0x4e9   : > { %5212 = vmatmul.mubr.msk.f32.gmra.mrb[12].mxu1 %vm3339_vm4, %v3316_v3  ;;  %v2597_v29 = vrot.slane %v2114_v38, 1  ;;  %v10119_v3 = vld [vmem:[#allocation133_spill] sm:$0xff]  ;;  %v2698_v51 = vrot.slane %v2114_v38, 2  ;;  %v10132_v38 = vld [vmem:[#allocation18_spill] sm:$0xff] }
 0x4ea   : > { %v2735_v23 = vpop.permute.xlu1 %2734  ;;  %v2829_v57 = vpop.permute.xlu0 %2828 }
 0x4eb   : > { %v3251_v15 = vsel %vm3234_vm14, %v3218_v63, %v2829_v57  ;;  %v3219_v39 = vsel %vm3201_vm13, %v3186_v36, %v2735_v23  ;;  %v10121_v57 = vld [vmem:[#allocation141_spill] sm:$0xff]  ;;  %v2598_v12 = vsel %vm371_vm0, %v2595_v41, %v2597_v29  ;;  %v10131_v41 = vld [vmem:[#allocation10_spill] sm:$0xff]  ;;  %vm4703_vm0 = vcmask 1041409  }
 0x4ec   : > { %2754 = vrot.lane.b32.xlu1 %v10101_v47, %s5338_s17  ;;  %2848 = vrot.lane.b32.xlu0 %v10102_v56, %s5339_s23  ;;  %v10120_v47 = vld [vmem:[#allocation110_spill] sm:$0xff] }
 0x4ed   : > { %v3092_v23 = vsel %vm1360_vm3, %v10120_v47, %v10119_v3  ;;  %v10133_v3 = vld [vmem:[#allocation95_spill] sm:$0xff] }
 0x4ee   : > { %v2831_v28 = vpop.permute.xlu1 %2830  ;;  %v2922_v43 = vpop.permute.xlu0 %2921 }
 0x4ef   : > { %v3284_v14 = vsel %vm3267_vm15, %v3251_v15, %v2922_v43  ;;  %v3252_v6 = vsel %vm3234_vm14, %v3219_v39, %v2831_v28  ;;  %v3123_v28 = vsel %vm1426_vm6, %v3092_v23, %v10121_v57  ;;  %v10122_v43 = vld [vmem:[#allocation123_spill] sm:$0xff] }
 0x4f0   : > { %2850 = vrot.lane.b32.xlu1 %v10105_v61, %s5339_s23  ;;  %2941 = vrot.lane.b32.xlu0 %v10106_v30, %s5340_s24  ;;  %v3155_v2 = vsel %vm1492_vm8, %v3123_v28, %v10122_v43  ;;  %v10134_v23 = vld [vmem:[#allocation11_spill] sm:$0xff] }
 0x4f1   : > { %v10135_v43 = vld [vmem:[#allocation19_spill] sm:$0xff] }
 0x4f2   : > { %v2636_v32 = vpop.permute.xlu1 %2635  ;;  %v2924_v49 = vpop.permute.xlu0 %2923 }
 0x4f3   : > { %v3285_v26 = vsel %vm3267_vm15, %v3252_v6, %v2924_v49  ;;  %v3187_v1 = vsel %vm1558_vm10, %v3155_v2, %v2636_v32  ;;  %v10124_v49 = vld [vmem:[#allocation108_spill] sm:$0xff] }
 0x4f4   : > { %2655 = vrot.lane.b32.xlu1 %v10106_v30, %s5336_s20  ;;  %2943 = vrot.lane.b32.xlu0 %v10111_v21, %s5340_s24  ;;  %v2695_v30 = vrot.slane %v10116_v18, 2  ;;  %v3093_v33 = vsel %vm1360_vm3, %v10124_v49, %v10123_v53 }
 0x4f5   : > { %v3124_v8 = vsel %vm1426_vm6, %v3093_v33, %v10125_v27 }
 0x4f6   : > { %v3015_v19 = vpop.permute.xlu1 %3014  ;;  %v2638_v17 = vpop.permute.xlu0 %2637 }
 0x4f7   : > { %v3317_v54 = vsel %vm3300_vm2, %v3284_v14, %v3015_v19  ;;  %v2697_v19 = vsel %vm548_vm1, %v2695_v30, %v2696_v58 }
 0x4f8   : > { %3034 = vrot.lane.b32.xlu1 %v10114_v44, %s5341_s25  ;;  %2657 = vrot.lane.b32.xlu0 %v10111_v21, %s5336_s20  ;;  %v10126_v21 = vld [vmem:[#allocation124_spill] sm:$0xff] }
 0x4f9   : > { %5214 = vmatprep.mubr.msk.f32.mxu1 %vm3339_vm4, %v3317_v54  ;;  %v3156_v32 = vsel %vm1492_vm8, %v3124_v8, %v10126_v21 }
 0x4fa   : > { %v2737_v24 = vpop.permute.xlu1 %2736  ;;  %v3017_v10 = vpop.permute.xlu0 %3016  ;;  %v3188_v7 = vsel %vm1558_vm10, %v3156_v32, %v2638_v17 }
 0x4fb   : > { %v3318_v35 = vsel %vm3300_vm2, %v3285_v26, %v3017_v10  ;;  %v3220_v37 = vsel %vm3201_vm13, %v3187_v1, %v2737_v24  ;;  %v2699_v26 = vsel %vm548_vm1, %v2696_v58, %v2698_v51  ;;  %v10137_v51 = vld [vmem:[#allocation44_spill] sm:$0xff]  ;;  %vm4705_vm1 = vcmask 1042434  }
 0x4fc   : > { %2756 = vrot.lane.b32.xlu1 %v10114_v44, %s5338_s17  ;;  %3036 = vrot.lane.b32.xlu0 %v10115_v40, %s5341_s25 }
 0x4fd   : > { %5215 = vmatmul.mubr.msk.f32.gmra.mrb[14].mxu1 %vm3339_vm4, %v3318_v35  ;;  %v10127_v35 = vmov 0.0  }
 0x4fe   : > { %v2739_v59 = vpop.permute.xlu1 %2738  ;;  %v2833_v9 = vpop.permute.xlu0 %2832 }
 0x4ff   : > { %v3253_v63 = vsel %vm3234_vm14, %v3220_v37, %v2833_v9  ;;  %v3221_v36 = vsel %vm3201_vm13, %v3188_v7, %v2739_v59  ;;  %v10128_v9 = vld [vmem:[#allocation70_spill] sm:$0xff] }
 0x500   : > { %2758 = vrot.lane.b32.xlu1 %v10115_v40, %s5338_s17  ;;  %2852 = vrot.lane.b32.xlu0 %v10116_v18, %s5339_s23  ;;  %v3094_v18 = vsel %vm1360_vm3, %v7565_v11, %v10128_v9  ;;  %v3095_v11 = vsel %vm1360_vm3, %v7562_v5, %v10133_v3  ;;  %v10140_v9 = vld [vmem:[#allocation45_spill] sm:$0xff] }
 0x501   : > { %v3125_v52 = vsel %vm1426_vm6, %v3094_v18, %v10131_v41  ;;  %v3126_v57 = vsel %vm1426_vm6, %v3095_v11, %v10134_v23  ;;  %v10142_v11 = vld [vmem:[#allocation128_spill] sm:$0xff]  ;;  %v10143_v23 = vld [vmem:[#allocation97_spill] sm:$0xff] }
 0x502   : > { %v2835_v34 = vpop.permute.xlu1 %2834  ;;  %v2926_v31 = vpop.permute.xlu0 %2925  ;;  %v3158_v2 = vsel %vm1492_vm8, %v3126_v57, %v10135_v43 }
 0x503   : > { %v3286_v25 = vsel %vm3267_vm15, %v3253_v63, %v2926_v31  ;;  %v3254_v54 = vsel %vm3234_vm14, %v3221_v36, %v2835_v34  ;;  %v3157_v34 = vsel %vm1492_vm8, %v3125_v52, %v10132_v38 }
 0x504   : > { %2854 = vrot.lane.b32.xlu1 %v10117_v42, %s5339_s23  ;;  %2945 = vrot.lane.b32.xlu0 %v2596_v60, %s5340_s24  ;;  %v10130_v42 = vld [vmem:[#allocation115_spill] sm:$0xff] }
 0x506   : > { %v2640_v16 = vpop.permute.xlu1 %2639  ;;  %v2928_v55 = vpop.permute.xlu0 %2927 }
 0x507   : > { %v3287_v39 = vsel %vm3267_vm15, %v3254_v54, %v2928_v55 }
 0x508   : > { %2659 = vrot.lane.b32.xlu1 %v2596_v60, %s5336_s20  ;;  %2947 = vrot.lane.b32.xlu0 %v2598_v12, %s5340_s24  ;;  %v3189_v60 = vsel %vm1558_vm10, %v3157_v34, %v2640_v16 }
 0x50a   : > { %v3019_v48 = vpop.permute.xlu1 %3018  ;;  %v2642_v15 = vpop.permute.xlu0 %2641 }
 0x50b   : > { %v3319_v14 = vsel %vm3300_vm2, %v3286_v25, %v3019_v48  ;;  %v3190_v16 = vsel %vm1558_vm10, %v3158_v2, %v2642_v15  ;;  %v10136_v48 = vld [vmem:[#allocation7_spill] sm:$0xff] }
 0x50c   : > { %3038 = vrot.lane.b32.xlu1 %v2697_v19, %s5341_s25  ;;  %2661 = vrot.lane.b32.xlu0 %v2598_v12, %s5336_s20  ;;  %v3096_v15 = vsel %vm1360_vm3, %v7585_v50, %v10136_v48 }
 0x50d   : > { %5217 = vmatprep.mubr.msk.f32.mxu1 %vm3339_vm4, %v3319_v14  ;;  %v3127_v7 = vsel %vm1426_vm6, %v3096_v15, %v10137_v51  ;;  %v10138_v14 = vld [vmem:[#allocation16_spill] sm:$0xff] }
 0x50e   : > { %v2741_v44 = vpop.permute.xlu1 %2740  ;;  %v3021_v6 = vpop.permute.xlu0 %3020 }
 0x50f   : > { %v3320_v17 = vsel %vm3300_vm2, %v3287_v39, %v3021_v6  ;;  %v3222_v47 = vsel %vm3201_vm13, %v3189_v60, %v2741_v44 }
 0x510   : > { %2760 = vrot.lane.b32.xlu1 %v2697_v19, %s5338_s17  ;;  %3040 = vrot.lane.b32.xlu0 %v2699_v26, %s5341_s25  ;;  %v3159_v19 = vsel %vm1492_vm8, %v3127_v7, %v10138_v14 }
 0x511   : > { %5218 = vmatmul.mubr.msk.f32.gmra.mrb[16].mxu1 %vm3339_vm4, %v3320_v17 }
 0x512   : > { %v2743_v24 = vpop.permute.xlu1 %2742  ;;  %v2837_v10 = vpop.permute.xlu0 %2836 }
 0x513   : > { %v3255_v28 = vsel %vm3234_vm14, %v3222_v47, %v2837_v10  ;;  %v3223_v5 = vsel %vm3201_vm13, %v3190_v16, %v2743_v24  ;;  %v3075_v47 = vsel %vm1360_vm3, 0.0, %v10142_v11 }
 0x514   : > { %2762 = vrot.lane.b32.xlu1 %v2699_v26, %s5338_s17  ;;  %2856 = vrot.lane.b32.xlu0 %v10127_v35, %s5339_s23  ;;  %v3106_v57 = vsel %vm1426_vm6, %v3075_v47, %v10143_v23 }
 0x516   : > { %v2839_v40 = vpop.permute.xlu1 %2838  ;;  %v2930_v59 = vpop.permute.xlu0 %2929 }
 0x517   : > { %v3288_v55 = vsel %vm3267_vm15, %v3255_v28, %v2930_v59  ;;  %v3256_v12 = vsel %vm3234_vm14, %v3223_v5, %v2839_v40  ;;  %v10139_v40 = vld [vmem:[#allocation96_spill] sm:$0xff]  ;;  %v10146_v5 = vld [vmem:[#allocation13_spill] sm:$0xff] }
 0x518   : > { %2949 = vrot.lane.b32.xlu1 %v10129_v22, %s5340_s24  ;;  %3042 = vrot.lane.b32.xlu0 %v10130_v42, %s5341_s25  ;;  %v3097_v59 = vsel %vm1360_vm3, %v7582_v0, %v10139_v40  ;;  %v10141_v22 = vld [vmem:[#allocation17_spill] sm:$0xff]  ;;  %v10144_v28 = vld [vmem:[#allocation12_spill] sm:$0xff] }
 0x519   : > { %v3128_v18 = vsel %vm1426_vm6, %v3097_v59, %v10140_v9  ;;  %v3137_v43 = vsel %vm1492_vm8, %v3106_v57, %v10144_v28  ;;  %v10152_v9 = vld [vmem:[#allocation74_spill] sm:$0xff] }
 0x51a   : > { %v2644_v31 = vpop.permute.xlu1 %2643  ;;  %v2932_v29 = vpop.permute.xlu0 %2931  ;;  %v3160_v42 = vsel %vm1492_vm8, %v3128_v18, %v10141_v22  ;;  %v10153_v22 = vld [vmem:[#allocation34_spill] sm:$0xff] }
 0x51b   : > { %v3289_v53 = vsel %vm3267_vm15, %v3256_v12, %v2932_v29  ;;  %v3191_v39 = vsel %vm1558_vm10, %v3159_v19, %v2644_v31  ;;  %v3138_v12 = vsel %vm1492_vm8, %v3106_v57, %v10146_v5  ;;  %v10148_v19 = vld [vmem:[#allocation41_spill] sm:$0xff]  ;;  %v3795_v5 = vlaneseq }
 0x51e   : > { %v3023_v30 = vpop.permute.xlu1 %3022  ;;  %v2646_v58 = vpop.permute.xlu0 %2645 }
 0x51f   : > { %v3321_v1 = vsel %vm3300_vm2, %v3288_v55, %v3023_v30  ;;  %v3192_v38 = vsel %vm1558_vm10, %v3160_v42, %v2646_v58  ;;  %v10145_v30 = vld [vmem:[#allocation37_spill] sm:$0xff] }
 0x520   : > { %5220 = vmatprep.mubr.msk.f32.mxu1 %vm3339_vm4, %v3321_v1  ;;  %v3169_v58 = vsel %vm1558_vm10, %v3137_v43, %v10145_v30  ;;  %v10154_v43 = vld [vmem:[#allocation134_spill] sm:$0xff]  ;;  %v10156_v30 = vld [vmem:[#allocation35_spill] sm:$0xff] }
 0x522   : > { %v2745_v49 = vpop.permute.xlu1 %2744  ;;  %v3025_v33 = vpop.permute.xlu0 %3024 }
 0x523   : > { %v3322_v37 = vsel %vm3300_vm2, %v3289_v53, %v3025_v33  ;;  %v3224_v44 = vsel %vm3201_vm13, %v3191_v39, %v2745_v49 }
 0x524   : > { %5221 = vmatmul.mubr.msk.f32.gmra.mrb[18].mxu1 %vm3339_vm4, %v3322_v37  ;;  %v10147_v37 = vld [vmem:[#allocation25_spill] sm:$0xff] }
 0x526   : > { %v2747_v27 = vpop.permute.xlu1 %2746  ;;  %v2841_v8 = vpop.permute.xlu0 %2840 }
 0x527   : > { %v3257_v6 = vsel %vm3234_vm14, %v3224_v44, %v2841_v8  ;;  %v3225_v34 = vsel %vm3201_vm13, %v3192_v38, %v2747_v27  ;;  %v3170_v27 = vsel %vm1558_vm10, %v3138_v12, %v10147_v37  ;;  %v10150_v44 = vld [vmem:[#allocation33_spill] sm:$0xff] }
 0x52a   : > { %v2701_v63 = vpop.permute.xlu1 %2700  ;;  %v2843_v21 = vpop.permute.xlu0 %2842 }
 0x52b   : > { %v3258_v31 = vsel %vm3234_vm14, %v3225_v34, %v2843_v21  ;;  %v3202_v16 = vsel %vm3201_vm13, %v3169_v58, %v2701_v63 }
 0x52e   : > { %v2934_v32 = vpop.permute.xlu1 %2933  ;;  %v2648_v25 = vpop.permute.xlu0 %2647 }
 0x52f   : > { %v3290_v17 = vsel %vm3267_vm15, %v3257_v6, %v2934_v32 }
 0x532   : > { %v2703_v36 = vpop.permute.xlu1 %2702  ;;  %v2797_v54 = vpop.permute.xlu0 %2796 }
 0x533   : > { %v3235_v1 = vsel %vm3234_vm14, %v3202_v16, %v2797_v54  ;;  %v3203_v21 = vsel %vm3201_vm13, %v3170_v27, %v2703_v36  ;;  %v3098_v54 = vsel %vm1360_vm3, %v7619_v13, %v10148_v19  ;;  %v10149_v36 = vld [vmem:[#allocation73_spill] sm:$0xff]  ;;  %v10158_v27 = vld [vmem:[#allocation100_spill] sm:$0xff] }
 0x534   : > { %v3129_v39 = vsel %vm1426_vm6, %v3098_v54, %v10149_v36 }
 0x535   : > { %v3161_v6 = vsel %vm1492_vm8, %v3129_v39, %v10150_v44 }
 0x536   : > { %v2936_v26 = vpop.permute.xlu1 %2935  ;;  %v3027_v24 = vpop.permute.xlu0 %3026 }
 0x537   : > { %v3323_v50 = vsel %vm3300_vm2, %v3290_v17, %v3027_v24  ;;  %v3291_v29 = vsel %vm3267_vm15, %v3258_v31, %v2936_v26  ;;  %v3193_v24 = vsel %vm1558_vm10, %v3161_v6, %v2648_v25 }
 0x538   : > { %5223 = vmatprep.mubr.msk.f32.mxu1 %vm3339_vm4, %v3323_v50  ;;  %v10151_v50 = vld [vmem:[#allocation120_spill] sm:$0xff] }
 0x539   : > { %v3099_v40 = vsel %vm1360_vm3, %v7616_v46, %v10151_v50 }
 0x53a   : > { %v2650_v10 = vpop.permute.xlu1 %2649  ;;  %v2749_v35 = vpop.permute.xlu0 %2748  ;;  %v3130_v13 = vsel %vm1426_vm6, %v3099_v40, %v10152_v9 }
 0x53b   : > { %v3226_v59 = vsel %vm3201_vm13, %v3193_v24, %v2749_v35  ;;  %v3162_v42 = vsel %vm1492_vm8, %v3130_v13, %v10153_v22 }
 0x53c   : > { %v3194_v25 = vsel %vm1558_vm10, %v3162_v42, %v2650_v10 }
 0x53e   : > { %v2799_v41 = vpop.permute.xlu1 %2798  ;;  %v2890_v52 = vpop.permute.xlu0 %2889 }
 0x53f   : > { %v3268_v53 = vsel %vm3267_vm15, %v3235_v1, %v2890_v52  ;;  %v3236_v63 = vsel %vm3234_vm14, %v3203_v21, %v2799_v41 }
 0x542   : > { %v3029_v60 = vpop.permute.xlu1 %3028  ;;  %v2751_v3 = vpop.permute.xlu0 %2750 }
 0x543   : > { %v3324_v0 = vsel %vm3300_vm2, %v3291_v29, %v3029_v60  ;;  %v3227_v46 = vsel %vm3201_vm13, %v3194_v25, %v2751_v3  ;;  %v3100_v3 = vsel %vm1360_vm3, %v7646_v62, %v10154_v43 }
 0x544   : > { %5224 = vmatmul.mubr.msk.f32.gmra.mrb[20].mxu1 %vm3339_vm4, %v3324_v0 }
 0x546   : > { %v2845_v2 = vpop.permute.xlu1 %2844  ;;  %v2892_v55 = vpop.permute.xlu0 %2891 }
 0x547   : > { %v3269_v15 = vsel %vm3267_vm15, %v3236_v63, %v2892_v55  ;;  %v3259_v18 = vsel %vm3234_vm14, %v3226_v59, %v2845_v2  ;;  %v10155_v2 = vld [vmem:[#allocation99_spill] sm:$0xff]  ;;  %v10159_v63 = vld [vmem:[#allocation20_spill] sm:$0xff] }
 0x548   : > { %v3131_v55 = vsel %vm1426_vm6, %v3100_v3, %v10155_v2  ;;  %v10163_v3 = vld [vmem:[#allocation122_spill] sm:$0xff] }
 0x549   : > { %v3163_v58 = vsel %vm1492_vm8, %v3131_v55, %v10156_v30  ;;  %v10164_v55 = vld [vmem:[#allocation138_spill] sm:$0xff] }
 0x54a   : > { %v2983_v49 = vpop.permute.xlu1 %2982  ;;  %v2847_v33 = vpop.permute.xlu0 %2846 }
 0x54b   : > { %v3301_v8 = vsel %vm3300_vm2, %v3268_v53, %v2983_v49  ;;  %v3260_v35 = vsel %vm3234_vm14, %v3227_v46, %v2847_v33  ;;  %v5342_v53 = vmov 1983009808   ;;  %v10157_v33 = vld [vmem:[#allocation107_spill] sm:$0xff] }
 0x54c   : > { %v8840_v32 = vpop.f32.mrb[0].mxu1  ;;  %5190 = vmatprep.mubr.msk.f32.mxu0 %vm3339_vm4, %v3301_v8  ;;  %v3793_v49 = vunpack.c.l.s4 %v5342_v53  ;;  %v3101_v37 = vsel %vm1360_vm3, %v10070_v45, %v10157_v33  ;;  %v3796_v45 = vshrl.u32 %v3795_v5, 7 }
 0x54d   : > { %v8844_v48 = vpop.f32.mrb[1].mxu1  ;;  %v3132_v8 = vsel %vm1426_vm6, %v3101_v37, %v10158_v27 }
 0x54e   : > { %v2938_v51 = vpop.permute.xlu1 %2937  ;;  %v2985_v7 = vpop.permute.xlu0 %2984  ;;  %v3794_v44 = vunpack.c.0.s8 %v3793_v49  ;;  %v8954_v27 = vsub.s32 0, %v3796_v45 }
 0x54f   : > { %v3302_v14 = vsel %vm3300_vm2, %v3269_v15, %v2985_v7  ;;  %v3292_v41 = vsel %vm3267_vm15, %v3259_v18, %v2938_v51  ;;  %v3164_v15 = vsel %vm1492_vm8, %v3132_v8, %v10159_v63  ;;  %v8897_v51 = vld [vmem:[%s9282_s4] ss:$0 sm:$0xff] }
 0x550   : > { %5191 = vmatmul.mubr.msk.f32.vlgmr.msra.gmra.mrb[32].mxu0 %vm3339_vm4, %v3302_v14 }
 0x552   : > { %v2652_v17 = vpop.permute.xlu1 %2651  ;;  %v2940_v26 = vpop.permute.xlu0 %2939 }
 0x553   : > { %v3293_v31 = vsel %vm3267_vm15, %v3260_v35, %v2940_v26  ;;  %v3195_v12 = vsel %vm1558_vm10, %v3163_v58, %v2652_v17 }
 0x556   : > { %v3031_v52 = vpop.permute.xlu1 %3030  ;;  %v2654_v38 = vpop.permute.xlu0 %2653 }
 0x557   : > { %v3325_v34 = vsel %vm3300_vm2, %v3292_v41, %v3031_v52  ;;  %v3196_v54 = vsel %vm1558_vm10, %v3164_v15, %v2654_v38  ;;  %v8922_v41 = vsub.s32 %v3794_v44, %v3796_v45 }
 0x558   : > { %5226 = vmatprep.mubr.msk.f32.mxu1 %vm3339_vm4, %v3325_v34 }
 0x55a   : > { %v2753_v29 = vpop.permute.xlu1 %2752  ;;  %v3033_v60 = vpop.permute.xlu0 %3032 }
 0x55b   : > { %v3326_v0 = vsel %vm3300_vm2, %v3293_v31, %v3033_v60  ;;  %v3228_v62 = vsel %vm3201_vm13, %v3195_v12, %v2753_v29  ;;  %v10160_v29 = vld [vmem:[#allocation71_spill] sm:$0xff] }
 0x55c   : > { %v5198_v11 = vpop.f32.mrb[2].mxu1  ;;  %5227 = vmatmul.mubr.msk.f32.gmra.mrb[22].mxu1 %vm3339_vm4, %v3326_v0  ;;  %v3102_v60 = vsel %vm1360_vm3, %v10085_v4, %v10160_v29 }
 0x55d   : > { %v3522_v47 = vpop.f32.mrb[3].mxu1  ;;  %v8904_v36 = vadd.f32 %v5198_v11, %v8897_v51 }
 0x55e   : > { %v2755_v23 = vpop.permute.xlu1 %2754  ;;  %v2849_v10 = vpop.permute.xlu0 %2848  ;;  %v8908_v6 = vadd.f32 %v8897_v51, %v3522_v47  ;;  %v10161_v47 = vld [vmem:[#allocation135_spill] sm:$0xff] }
 0x55f   : > { %v3261_v21 = vsel %vm3234_vm14, %v3228_v62, %v2849_v10  ;;  %v3229_v17 = vsel %vm3201_vm13, %v3196_v54, %v2755_v23  ;;  %v3666_v22 = vmax.f32 %v8904_v36, 0.0  ;;  %v3103_v23 = vsel %vm1360_vm3, %v10088_v20, %v10161_v47  ;;  %v10162_v10 = vld [vmem:[#allocation43_spill] sm:$0xff] }
 0x560   : > { %v3665_v38 = vmax.f32 %v8908_v6, 0.0  ;;  %v3134_v2 = vsel %vm1426_vm6, %v3103_v23, %v10163_v3 }
 0x562   : > { %v2851_v57 = vpop.permute.xlu1 %2850  ;;  %v2942_v28 = vpop.permute.xlu0 %2941 }
 0x563   : > { %v3294_v7 = vsel %vm3267_vm15, %v3261_v21, %v2942_v28  ;;  %v3262_v24 = vsel %vm3234_vm14, %v3229_v17, %v2851_v57  ;;  %v3133_v57 = vsel %vm1426_vm6, %v3102_v60, %v10162_v10 }
 0x564   : > { %v3165_v30 = vsel %vm1492_vm8, %v3133_v57, %v10164_v55 }
 0x566   : > { %v8882_v16 = vpop.permute.xlu1 %2655  ;;  %v2944_v1 = vpop.permute.xlu0 %2943 }
 0x567   : > { %v3295_v59 = vsel %vm3267_vm15, %v3262_v24, %v2944_v1  ;;  %v10165_v1 = vld [vmem:[#allocation21_spill] sm:$0xff]  ;;  %v3197_v54 = vsel %vm1558_vm10, %v3165_v30, %v8882_v16 }
 0x568   : > { %v3166_v5 = vsel %vm1492_vm8, %v3134_v2, %v10165_v1 }
 0x56a   : > { %v3035_v14 = vpop.permute.xlu1 %3034  ;;  %v8900_v19 = vpop.permute.xlu0 %2657 }
 0x56b   : > { %v3327_v39 = vsel %vm3300_vm2, %v3294_v7, %v3035_v14  ;;  %v3198_v57 = vsel %vm1558_vm10, %v3166_v5, %v8900_v19 }
 0x56c   : > { %v5201_v26 = vpop.f32.mrb[4].mxu1  ;;  %5229 = vmatprep.mubr.msk.f32.mxu1 %vm3339_vm4, %v3327_v39 }
 0x56d   : > { %v8914_v50 = vadd.f32 %v5201_v26, %v8897_v51  ;;  %v3532_v40 = vpop.f32.mrb[5].mxu1 }
 0x56e   : > { %v8918_v9 = vadd.f32 %v8897_v51, %v3532_v40  ;;  %v2757_v13 = vpop.permute.xlu1 %2756  ;;  %v3037_v18 = vpop.permute.xlu0 %3036 }
 0x56f   : > { %v3668_v42 = vmax.f32 %v8914_v50, 0.0  ;;  %v3328_v52 = vsel %vm3300_vm2, %v3295_v59, %v3037_v18  ;;  %v3230_v59 = vsel %vm3201_vm13, %v3197_v54, %v2757_v13 }
 0x570   : > { %v3667_v25 = vmax.f32 %v8918_v9, 0.0  ;;  %5230 = vmatmul.mubr.msk.f32.gmra.mrb[24].mxu1 %vm3339_vm4, %v3328_v52 }
 0x571   : > { %v3762_v34 = vmax.f32 %v3666_v22, %v3668_v42 }
 0x572   : > { %v3761_v46 = vmax.f32 %v3665_v38, %v3667_v25  ;;  %v2759_v35 = vpop.permute.xlu1 %2758  ;;  %v2853_v31 = vpop.permute.xlu0 %2852 }
 0x573   : > { %v3842_v0 = vcombine.high %v3762_v34, %v3762_v34  ;;  %v3849_v11 = vrot.slane %v3762_v34, %v8922_v41  ;;  %v3263_v60 = vsel %vm3234_vm14, %v3230_v59, %v2853_v31  ;;  %v3231_v3 = vsel %vm3201_vm13, %v3198_v57, %v2759_v35 }
 0x574   : > { %v3825_v28 = vcombine.high %v3761_v46, %v3761_v46  ;;  %v3832_v43 = vrot.slane %v3761_v46, %v8922_v41 }
 0x575   : > { %v3856_v4 = vrot.slane %v3842_v0, %v8922_v41  ;;  %v3857_v58 = vcombine.high %v3849_v11, %v3849_v11  ;;  %v4981_v37 = vrot.slane %v3849_v11, 9 }
 0x576   : > { %v3839_v20 = vrot.slane %v3825_v28, %v8922_v41  ;;  %v3840_v12 = vcombine.high %v3832_v43, %v3832_v43  ;;  %v4977_v53 = vrot.slane %v3832_v43, 9  ;;  %v2855_v49 = vpop.permute.xlu1 %2854  ;;  %v2946_v33 = vpop.permute.xlu0 %2945 }
 0x577   : > { %v4982_v62 = vrot.slane %v3857_v58, 9  ;;  %v4983_v7 = vrot.slane %v3856_v4, 9  ;;  %v3858_v14 = vcombine.high %v3856_v4, %v3856_v4  ;;  %v4331_v40 = vmax.f32 %v3849_v11, %v4981_v37 }
 0x578   : > { %v3841_v8 = vcombine.high %v3839_v20, %v3839_v20  ;;  %v4978_v21 = vrot.slane %v3840_v12, 9  ;;  %v4979_v63 = vrot.slane %v3839_v20, 9  ;;  %v4327_v15 = vmax.f32 %v3832_v43, %v4977_v53 }
 0x579   : > { %v4332_v45 = vmax.f32 %v3857_v58, %v4982_v62  ;;  %v4984_v18 = vrot.slane %v3858_v14, 9  ;;  %v4333_v16 = vmax.f32 %v3856_v4, %v4983_v7  ;;  %v3296_v0 = vsel %vm3267_vm15, %v3263_v60, %v2946_v33  ;;  %v10166_v33 = vld [vmem:[#allocation72_spill] sm:$0xff] }
 0x57a   : > { %v4980_v39 = vrot.slane %v3841_v8, 9  ;;  %v4328_v44 = vmax.f32 %v3840_v12, %v4978_v21  ;;  %v4329_v17 = vmax.f32 %v3839_v20, %v4979_v63  ;;  %v2660_v26 = vpop.permute.xlu1 %2659  ;;  %v2948_v24 = vpop.permute.xlu0 %2947  ;;  %v4482_v34 = vrot.slane %v4327_v15, %v8954_v27  ;;  %v10168_v15 = vld [vmem:[#allocation8_spill] sm:$0xff] }
 0x57b   : > { %v4334_v23 = vmax.f32 %v3858_v14, %v4984_v18  ;;  %v4498_v28 = vrot.slane %v4331_v40, %v8954_v27  ;;  %v4502_v55 = vrot.slane %v4332_v45, %v8954_v27  ;;  %v3264_v4 = vsel %vm3234_vm14, %v3231_v3, %v2855_v49  ;;  %v10169_v14 = vld [vmem:[#allocation24_spill] sm:$0xff] }
 0x57c   : > { %v4330_v52 = vmax.f32 %v3841_v8, %v4980_v39  ;;  %v4486_v46 = vrot.slane %v4328_v44, %v8954_v27  ;;  %v4490_v29 = vrot.slane %v4329_v17, %v8954_v27  ;;  %v4506_v19 = vrot.slane %v4333_v16, %v8954_v27  ;;  %v10167_v8 = vld [vmem:[#allocation15_spill] sm:$0xff]  ;;  %v10171_v40 = vld [vmem:[#allocation36_spill] sm:$0xff] }
 0x57d   : > { %v3297_v5 = vsel %vm3267_vm15, %v3264_v4, %v2948_v24  ;;  %v4510_v12 = vrot.slane %v4334_v23, %v8954_v27  ;;  %v3105_v37 = vsel %vm1360_vm3, %v10105_v61, %v10166_v33  ;;  %v3104_v7 = vsel %vm1360_vm3, %v10102_v56, %v10168_v15  ;;  %v10170_v61 = vld [vmem:[#allocation14_spill] sm:$0xff] }
 0x57e   : > { %v3039_v47 = vpop.permute.xlu1 %3038  ;;  %v2662_v11 = vpop.permute.xlu0 %2661  ;;  %v4494_v13 = vrot.slane %v4330_v52, %v8954_v27  ;;  %v4717_v10 = vsel %vm4703_vm0, %v4486_v46, %v4482_v34  ;;  %v3136_v21 = vsel %vm1426_vm6, %v3105_v37, %v10167_v8  ;;  %v3135_v39 = vsel %vm1426_vm6, %v3104_v7, %v10170_v61 }
 0x57f   : > { %v3329_v43 = vsel %vm3300_vm2, %v3296_v0, %v3039_v47  ;;  %v4718_v31 = vsel %vm4705_vm1, %v4490_v29, %v4717_v10  ;;  %v3168_v54 = vsel %vm1492_vm8, %v3136_v21, %v10169_v14  ;;  %v3167_v45 = vsel %vm1492_vm8, %v3135_v39, %v10171_v40 }
 0x580   : > { %v5204_v2 = vpop.f32.mrb[6].mxu1  ;;  %5232 = vmatprep.mubr.msk.f32.mxu1 %vm3339_vm4, %v3329_v43  ;;  %v4719_v30 = vsel %vm4707_vm5, %v4494_v13, %v4718_v31  ;;  %v3200_v44 = vsel %vm1558_vm10, %v3168_v54, %v2662_v11  ;;  %v3199_v18 = vsel %vm1558_vm10, %v3167_v45, %v2660_v26 }
 0x581   : > { %v3542_v58 = vpop.f32.mrb[7].mxu1  ;;  %v4720_v1 = vsel %vm4709_vm7, %v4498_v28, %v4719_v30  ;;  %v9014_v26 = vadd.f32 %v5204_v2, %v8897_v51 }
 0x582   : > { %v2761_v20 = vpop.permute.xlu1 %2760  ;;  %v3041_v35 = vpop.permute.xlu0 %3040  ;;  %v4721_v53 = vsel %vm4711_vm9, %v4502_v55, %v4720_v1  ;;  %v9017_v11 = vadd.f32 %v8897_v51, %v3542_v58 }
 0x583   : > { %v3330_v49 = vsel %vm3300_vm2, %v3297_v5, %v3041_v35  ;;  %v4722_v62 = vsel %vm4713_vm11, %v4506_v19, %v4721_v53  ;;  %v3232_v52 = vsel %vm3201_vm13, %v3199_v18, %v2761_v20  ;;  %v3670_v28 = vmax.f32 %v9014_v26, 0.0 }
 0x584   : > { %5233 = vmatmul.mubr.msk.f32.gmra.mrb[26].mxu1 %vm3339_vm4, %v3330_v49  ;;  %v8990_v63 = vsel %vm4715_vm12, %v4510_v12, %v4722_v62  ;;  %v3669_v31 = vmax.f32 %v9017_v11, 0.0 }
 0x586   : > { %v2763_v17 = vpop.permute.xlu1 %2762  ;;  %v2857_v24 = vpop.permute.xlu0 %2856 }
 0x587   : > { %v3233_v59 = vsel %vm3201_vm13, %v3200_v44, %v2763_v17  ;;  %v3265_v56 = vsel %vm3234_vm14, %v3232_v52, %v2857_v24 }
 0x588   : > { %v3266_v34 = vsel %vm3234_vm14, %v3233_v59, %v2857_v24 }
 0x58a   : > { %v2950_v46 = vpop.permute.xlu1 %2949  ;;  %v3043_v29 = vpop.permute.xlu0 %3042 }
 0x58b   : > { %v3298_v60 = vsel %vm3267_vm15, %v3265_v56, %v2950_v46  ;;  %v3299_v16 = vsel %vm3267_vm15, %v3266_v34, %v2950_v46 }
 0x58c   : > { %v3331_v0 = vsel %vm3300_vm2, %v3298_v60, %v3043_v29  ;;  %v3332_v47 = vsel %vm3300_vm2, %v3299_v16, %v3043_v29 }
 0x58d   : > { %5235 = vmatprep.mubr.msk.f32.mxu1 %vm3339_vm4, %v3331_v0 }
 0x58e   : > { %5236 = vmatmul.mubr.msk.f32.gmra.mrb[28].mxu1 %vm3339_vm4, %v3332_v47 }
 0x594   : > { %v5207_v23 = vpop.f32.mrb[8].mxu1 }
 0x595   : > { %v9020_v13 = vadd.f32 %v5207_v23, %v8897_v51  ;;  %v3552_v10 = vpop.f32.mrb[9].mxu1 }
 0x596   : > { %v9023_v57 = vadd.f32 %v8897_v51, %v3552_v10 }
 0x597   : > { %v3672_v43 = vmax.f32 %v9020_v13, 0.0 }
 0x598   : > { %v3671_v3 = vmax.f32 %v9023_v57, 0.0 }
 0x599   : > { %v3764_v2 = vmax.f32 %v3670_v28, %v3672_v43 }
 0x59a   : > { %v3763_v55 = vmax.f32 %v3669_v31, %v3671_v3 }
 0x59b   : > { %v3876_v30 = vcombine.high %v3764_v2, %v3764_v2  ;;  %v3883_v4 = vrot.slane %v3764_v2, %v8922_v41 }
 0x59c   : > { %v3859_v58 = vcombine.high %v3763_v55, %v3763_v55  ;;  %v3866_v19 = vrot.slane %v3763_v55, %v8922_v41 }
 0x59d   : > { %v3890_v1 = vrot.slane %v3876_v30, %v8922_v41  ;;  %v3891_v5 = vcombine.high %v3883_v4, %v3883_v4  ;;  %v4989_v53 = vrot.slane %v3883_v4, 9 }
 0x59e   : > { %v3873_v20 = vrot.slane %v3859_v58, %v8922_v41  ;;  %v3874_v35 = vcombine.high %v3866_v19, %v3866_v19  ;;  %v4985_v12 = vrot.slane %v3866_v19, 9 }
 0x59f   : > { %v4990_v33 = vrot.slane %v3891_v5, 9  ;;  %v3892_v37 = vcombine.high %v3890_v1, %v3890_v1  ;;  %v4991_v15 = vrot.slane %v3890_v1, 9  ;;  %v4339_v39 = vmax.f32 %v3883_v4, %v4989_v53 }
 0x5a0   : > { %v3875_v49 = vcombine.high %v3873_v20, %v3873_v20  ;;  %v4986_v62 = vrot.slane %v3874_v35, 9  ;;  %v4987_v8 = vrot.slane %v3873_v20, 9  ;;  %v4335_v21 = vmax.f32 %v3866_v19, %v4985_v12 }
 0x5a1   : > { %v4992_v61 = vrot.slane %v3892_v37, 9  ;;  %v4340_v44 = vmax.f32 %v3891_v5, %v4990_v33  ;;  %v4341_v59 = vmax.f32 %v3890_v1, %v4991_v15  ;;  %v4530_v34 = vrot.slane %v4339_v39, %v8954_v27 }
 0x5a2   : > { %v4988_v7 = vrot.slane %v3875_v49, 9  ;;  %v4336_v14 = vmax.f32 %v3874_v35, %v4986_v62  ;;  %v4337_v54 = vmax.f32 %v3873_v20, %v4987_v8  ;;  %v4514_v24 = vrot.slane %v4335_v21, %v8954_v27 }
 0x5a3   : > { %v4342_v18 = vmax.f32 %v3892_v37, %v4992_v61  ;;  %v4534_v60 = vrot.slane %v4340_v44, %v8954_v27  ;;  %v4538_v47 = vrot.slane %v4341_v59, %v8954_v27 }
 0x5a4   : > { %v4338_v17 = vmax.f32 %v3875_v49, %v4988_v7  ;;  %v4518_v40 = vrot.slane %v4336_v14, %v8954_v27  ;;  %v4522_v45 = vrot.slane %v4337_v54, %v8954_v27 }
 0x5a5   : > { %v4542_v10 = vrot.slane %v4342_v18, %v8954_v27 }
 0x5a6   : > { %v4526_v52 = vrot.slane %v4338_v17, %v8954_v27  ;;  %v4724_v56 = vsel %vm4703_vm0, %v4518_v40, %v4514_v24 }
 0x5a7   : > { %v4725_v46 = vsel %vm4705_vm1, %v4522_v45, %v4724_v56 }
 0x5a8   : > { %v5210_v29 = vpop.f32.mrb[10].mxu1  ;;  %v4726_v16 = vsel %vm4707_vm5, %v4526_v52, %v4725_v46 }
 0x5a9   : > { %v3562_v0 = vpop.f32.mrb[11].mxu1  ;;  %v4727_v23 = vsel %vm4709_vm7, %v4530_v34, %v4726_v16  ;;  %v9059_v4 = vadd.f32 %v5210_v29, %v8897_v51 }
 0x5aa   : > { %v4728_v2 = vsel %vm4711_vm9, %v4534_v60, %v4727_v23  ;;  %v9062_v58 = vadd.f32 %v8897_v51, %v3562_v0 }
 0x5ab   : > { %v4729_v55 = vsel %vm4713_vm11, %v4538_v47, %v4728_v2  ;;  %v3674_v35 = vmax.f32 %v9059_v4, 0.0 }
 0x5ac   : > { %v9056_v30 = vsel %vm4715_vm12, %v4542_v10, %v4729_v55  ;;  %v3673_v53 = vmax.f32 %v9062_v58, 0.0 }
 0x5bc   : > { %v5213_v19 = vpop.f32.mrb[12].mxu1 }
 0x5bd   : > { %v9065_v1 = vadd.f32 %v5213_v19, %v8897_v51  ;;  %v3572_v5 = vpop.f32.mrb[13].mxu1 }
 0x5be   : > { %v9068_v20 = vadd.f32 %v8897_v51, %v3572_v5 }
 0x5bf   : > { %v9490_v12 = vmax.f32 %v9065_v1, 0.0 }
 0x5c0   : > { %v9491_v33 = vmax.f32 %v9068_v20, 0.0 }
 0x5c1   : > { %v3766_v37 = vmax.f32 %v3674_v35, %v9490_v12 }
 0x5c2   : > { %v3765_v49 = vmax.f32 %v3673_v53, %v9491_v33 }
 0x5c3   : > { %v3910_v62 = vcombine.high %v3766_v37, %v3766_v37  ;;  %v3917_v8 = vrot.slane %v3766_v37, %v8922_v41 }
 0x5c4   : > { %v3893_v21 = vcombine.high %v3765_v49, %v3765_v49  ;;  %v3900_v15 = vrot.slane %v3765_v49, %v8922_v41 }
 0x5c5   : > { %v3924_v7 = vrot.slane %v3910_v62, %v8922_v41  ;;  %v3925_v14 = vcombine.high %v3917_v8, %v3917_v8  ;;  %v4997_v44 = vrot.slane %v3917_v8, 9 }
 0x5c6   : > { %v3907_v54 = vrot.slane %v3893_v21, %v8922_v41  ;;  %v3908_v61 = vcombine.high %v3900_v15, %v3900_v15  ;;  %v4993_v39 = vrot.slane %v3900_v15, 9 }
 0x5c7   : > { %v4998_v17 = vrot.slane %v3925_v14, 9  ;;  %v3926_v24 = vcombine.high %v3924_v7, %v3924_v7  ;;  %v4999_v52 = vrot.slane %v3924_v7, 9  ;;  %v4347_v60 = vmax.f32 %v3917_v8, %v4997_v44 }
 0x5c8   : > { %v3909_v40 = vcombine.high %v3907_v54, %v3907_v54  ;;  %v4994_v45 = vrot.slane %v3908_v61, 9  ;;  %v4995_v59 = vrot.slane %v3907_v54, 9  ;;  %v4343_v18 = vmax.f32 %v3900_v15, %v4993_v39 }
 0x5c9   : > { %v5000_v29 = vrot.slane %v3926_v24, 9  ;;  %v4348_v16 = vmax.f32 %v3925_v14, %v4998_v17  ;;  %v4349_v2 = vmax.f32 %v3924_v7, %v4999_v52  ;;  %v4562_v37 = vrot.slane %v4347_v60, %v8954_v27 }
 0x5ca   : > { %v4996_v56 = vrot.slane %v3909_v40, 9  ;;  %v4344_v34 = vmax.f32 %v3908_v61, %v4994_v45  ;;  %v4345_v46 = vmax.f32 %v3907_v54, %v4995_v59  ;;  %v4546_v47 = vrot.slane %v4343_v18, %v8954_v27 }
 0x5cb   : > { %v4350_v55 = vmax.f32 %v3926_v24, %v5000_v29  ;;  %v4566_v8 = vrot.slane %v4348_v16, %v8954_v27  ;;  %v4570_v14 = vrot.slane %v4349_v2, %v8954_v27 }
 0x5cc   : > { %v4346_v0 = vmax.f32 %v3909_v40, %v4996_v56  ;;  %v4550_v23 = vrot.slane %v4344_v34, %v8954_v27  ;;  %v4554_v10 = vrot.slane %v4345_v46, %v8954_v27 }
 0x5cd   : > { %v4574_v61 = vrot.slane %v4350_v55, %v8954_v27 }
 0x5ce   : > { %v4558_v19 = vrot.slane %v4346_v0, %v8954_v27  ;;  %v4731_v5 = vsel %vm4703_vm0, %v4550_v23, %v4546_v47 }
 0x5cf   : > { %v4732_v49 = vsel %vm4705_vm1, %v4554_v10, %v4731_v5 }
 0x5d0   : > { %v5216_v62 = vpop.f32.mrb[14].mxu1  ;;  %v4733_v21 = vsel %vm4707_vm5, %v4558_v19, %v4732_v49 }
 0x5d1   : > { %v3582_v15 = vpop.f32.mrb[15].mxu1  ;;  %v4734_v54 = vsel %vm4709_vm7, %v4562_v37, %v4733_v21  ;;  %v3588_v17 = vadd.f32 %v5216_v62, %v8897_v51 }
 0x5d2   : > { %v3583_v7 = vadd.f32 %v8897_v51, %v3582_v15  ;;  %v4735_v39 = vsel %vm4711_vm9, %v4566_v8, %v4734_v54 }
 0x5d3   : > { %v4736_v44 = vsel %vm4713_vm11, %v4570_v14, %v4735_v39  ;;  %v3678_v45 = vmax.f32 %v3588_v17, 0.0 }
 0x5d4   : > { %v3677_v24 = vmax.f32 %v3583_v7, 0.0  ;;  %v9103_v40 = vsel %vm4715_vm12, %v4574_v61, %v4736_v44 }
 0x5d6   : > { %3725 = vxpose.xlu0.b32.start [1/16] (narrow) %v3677_v24, 8 }
 0x5da   : > { %3726 = vxpose.xlu0.b32.cont [2/16] (narrow) %v3678_v45, 8 }
 0x5e4   : > { %v5219_v59 = vpop.f32.mrb[16].mxu1 }
 0x5e5   : > { %v3598_v18 = vadd.f32 %v5219_v59, %v8897_v51  ;;  %v3592_v52 = vpop.f32.mrb[17].mxu1 }
 0x5e6   : > { %v3593_v56 = vadd.f32 %v8897_v51, %v3592_v52 }
 0x5e7   : > { %v3680_v34 = vmax.f32 %v3598_v18, 0.0 }
 0x5e8   : > { %v3679_v46 = vmax.f32 %v3593_v56, 0.0 }
 0x5e9   : > { %v3768_v29 = vmax.f32 %v3678_v45, %v3680_v34 }
 0x5ea   : > { %v3767_v60 = vmax.f32 %v3677_v24, %v3679_v46  ;;  %3727 = vxpose.xlu0.b32.cont [3/16] (narrow) %v3679_v46, 8 }
 0x5eb   : > { %v3944_v16 = vcombine.high %v3768_v29, %v3768_v29  ;;  %v3951_v0 = vrot.slane %v3768_v29, %v8922_v41 }
 0x5ec   : > { %v3927_v47 = vcombine.high %v3767_v60, %v3767_v60  ;;  %v3934_v23 = vrot.slane %v3767_v60, %v8922_v41 }
 0x5ed   : > { %v3958_v10 = vrot.slane %v3944_v16, %v8922_v41  ;;  %v3959_v2 = vcombine.high %v3951_v0, %v3951_v0  ;;  %v5005_v37 = vrot.slane %v3951_v0, 9 }
 0x5ee   : > { %v3941_v55 = vrot.slane %v3927_v47, %v8922_v41  ;;  %v3942_v19 = vcombine.high %v3934_v23, %v3934_v23  ;;  %v5001_v5 = vrot.slane %v3934_v23, 9  ;;  %3728 = vxpose.xlu0.b32.cont [4/16] (narrow) %v3680_v34, 8 }
 0x5ef   : > { %v5006_v49 = vrot.slane %v3959_v2, 9  ;;  %v3960_v62 = vcombine.high %v3958_v10, %v3958_v10  ;;  %v5007_v54 = vrot.slane %v3958_v10, 9  ;;  %v4355_v17 = vmax.f32 %v3951_v0, %v5005_v37 }
 0x5f0   : > { %v3943_v8 = vcombine.high %v3941_v55, %v3941_v55  ;;  %v5002_v21 = vrot.slane %v3942_v19, 9  ;;  %v5003_v15 = vrot.slane %v3941_v55, 9  ;;  %v4351_v14 = vmax.f32 %v3934_v23, %v5001_v5 }
 0x5f1   : > { %v5008_v44 = vrot.slane %v3960_v62, 9  ;;  %v4356_v24 = vmax.f32 %v3959_v2, %v5006_v49  ;;  %v4357_v56 = vmax.f32 %v3958_v10, %v5007_v54  ;;  %v4594_v60 = vrot.slane %v4355_v17, %v8954_v27 }
 0x5f2   : > { %v5004_v7 = vrot.slane %v3943_v8, 9  ;;  %v4352_v61 = vmax.f32 %v3942_v19, %v5002_v21  ;;  %v4353_v39 = vmax.f32 %v3941_v55, %v5003_v15  ;;  %v4578_v59 = vrot.slane %v4351_v14, %v8954_v27 }
 0x5f3   : > { %v4358_v34 = vmax.f32 %v3960_v62, %v5008_v44  ;;  %v4598_v23 = vrot.slane %v4356_v24, %v8954_v27  ;;  %v4602_v19 = vrot.slane %v4357_v56, %v8954_v27 }
 0x5f4   : > { %v4354_v45 = vmax.f32 %v3943_v8, %v5004_v7  ;;  %v4582_v18 = vrot.slane %v4352_v61, %v8954_v27  ;;  %v4586_v52 = vrot.slane %v4353_v39, %v8954_v27 }
 0x5f5   : > { %v4606_v5 = vrot.slane %v4358_v34, %v8954_v27 }
 0x5f6   : > { %v4590_v46 = vrot.slane %v4354_v45, %v8954_v27  ;;  %v4738_v29 = vsel %vm4703_vm0, %v4582_v18, %v4578_v59 }
 0x5f7   : > { %v5222_v16 = vpop.f32.mrb[18].mxu1  ;;  %v4739_v47 = vsel %vm4705_vm1, %v4586_v52, %v4738_v29 }
 0x5f8   : > { %v3602_v0 = vpop.f32.mrb[19].mxu1  ;;  %v4740_v2 = vsel %vm4707_vm5, %v4590_v46, %v4739_v47  ;;  %v3608_v49 = vadd.f32 %v5222_v16, %v8897_v51 }
 0x5f9   : > { %v3603_v55 = vadd.f32 %v8897_v51, %v3602_v0  ;;  %v4741_v10 = vsel %vm4709_vm7, %v4594_v60, %v4740_v2  ;;  %v9137_v60 = vadd.f32 %v8840_v32, %v8897_v51 }
 0x5fa   : > { %v4742_v37 = vsel %vm4711_vm9, %v4598_v23, %v4741_v10  ;;  %v3682_v15 = vmax.f32 %v3608_v49, 0.0 }
 0x5fb   : > { %v3681_v62 = vmax.f32 %v3603_v55, 0.0  ;;  %v4743_v8 = vsel %vm4713_vm11, %v4602_v19, %v4742_v37  ;;  %v3513_v19 = vadd.f32 %v8897_v51, %v8844_v48  ;;  %v3664_v32 = vmax.f32 %v9137_v60, 0.0 }
 0x5fc   : > { %v9128_v21 = vsel %vm4715_vm12, %v4606_v5, %v4743_v8 }
 0x5fd   : > { %3729 = vxpose.xlu0.b32.cont [5/16] (narrow) %v3681_v62, 8 }
 0x601   : > { %3730 = vxpose.xlu0.b32.cont [6/16] (narrow) %v3682_v15, 8 }
 0x617   : > { %v5225_v14 = vpop.f32.mrb[20].mxu1 }
 0x618   : > { %v3618_v54 = vadd.f32 %v5225_v14, %v8897_v51  ;;  %v3612_v7 = vpop.f32.mrb[21].mxu1 }
 0x619   : > { %v3613_v61 = vadd.f32 %v8897_v51, %v3612_v7 }
 0x61a   : > { %v3684_v39 = vmax.f32 %v3618_v54, 0.0 }
 0x61b   : > { %v3683_v44 = vmax.f32 %v3613_v61, 0.0 }
 0x61c   : > { %v3770_v17 = vmax.f32 %v3682_v15, %v3684_v39 }
 0x61d   : > { %v3769_v24 = vmax.f32 %v3681_v62, %v3683_v44  ;;  %3731 = vxpose.xlu0.b32.cont [7/16] (narrow) %v3683_v44, 8 }
 0x61e   : > { %v3985_v45 = vrot.slane %v3770_v17, %v8922_v41  ;;  %v3978_v52 = vcombine.high %v3770_v17, %v3770_v17  ;;  %v3663_v17 = vmax.f32 %v3513_v19, 0.0 }
 0x61f   : > { %v3961_v59 = vcombine.high %v3769_v24, %v3769_v24  ;;  %v3968_v18 = vrot.slane %v3769_v24, %v8922_v41 }
 0x620   : > { %v3993_v56 = vcombine.high %v3985_v45, %v3985_v45  ;;  %v5013_v16 = vrot.slane %v3985_v45, 9  ;;  %v3992_v10 = vrot.slane %v3978_v52, %v8922_v41 }
 0x621   : > { %v3975_v34 = vrot.slane %v3961_v59, %v8922_v41  ;;  %v3976_v46 = vcombine.high %v3968_v18, %v3968_v18  ;;  %v5009_v29 = vrot.slane %v3968_v18, 9  ;;  %3732 = vxpose.xlu0.b32.cont [8/16] (narrow) %v3684_v39, 8 }
 0x622   : > { %v5014_v49 = vrot.slane %v3993_v56, 9  ;;  %v4363_v14 = vmax.f32 %v3985_v45, %v5013_v16  ;;  %v5015_v52 = vrot.slane %v3992_v10, 9 }
 0x623   : > { %v3977_v47 = vcombine.high %v3975_v34, %v3975_v34  ;;  %v5010_v0 = vrot.slane %v3976_v46, 9  ;;  %v5011_v23 = vrot.slane %v3975_v34, 9  ;;  %v4359_v2 = vmax.f32 %v3968_v18, %v5009_v29  ;;  %v5192_v55 = vpop.f32.mrb[32].mxu0 }
 0x624   : > { %v3508_v5 = vadd.f32 %v5192_v55, %v8897_v51  ;;  %v3502_v37 = vpop.f32.mrb[33].mxu0  ;;  %v3994_v18 = vcombine.high %v3992_v10, %v3992_v10 }
 0x625   : > { %v5012_v62 = vrot.slane %v3977_v47, 9  ;;  %v4360_v8 = vmax.f32 %v3976_v46, %v5010_v0  ;;  %v4361_v15 = vmax.f32 %v3975_v34, %v5011_v23  ;;  %v3503_v7 = vadd.f32 %v8897_v51, %v3502_v37 }
 0x626   : > { %v3662_v54 = vmax.f32 %v3508_v5, 0.0  ;;  %v4610_v39 = vrot.slane %v4359_v2, %v8954_v27  ;;  %v4364_v34 = vmax.f32 %v3993_v56, %v5014_v49  ;;  %v4626_v23 = vrot.slane %v4363_v14, %v8954_v27 }
 0x627   : > { %v4362_v61 = vmax.f32 %v3977_v47, %v5012_v62  ;;  %v4614_v48 = vrot.slane %v4360_v8, %v8954_v27  ;;  %v4618_v44 = vrot.slane %v4361_v15, %v8954_v27  ;;  %v3661_v59 = vmax.f32 %v3503_v7, 0.0 }
 0x628   : > { %v3760_v24 = vmax.f32 %v3662_v54, %v3664_v32  ;;  %v5016_v5 = vrot.slane %v3994_v18, 9  ;;  %v4630_v49 = vrot.slane %v4364_v34, %v8954_v27  ;;  %v4365_v15 = vmax.f32 %v3992_v10, %v5015_v52 }
 0x629   : > { %v4622_v45 = vrot.slane %v4362_v61, %v8954_v27  ;;  %v4745_v46 = vsel %vm4703_vm0, %v4614_v48, %v4610_v39  ;;  %v3759_v47 = vmax.f32 %v3661_v59, %v3663_v17  ;;  %3693 = vxpose.xlu1.b32.start [1/16] (narrow) %v3661_v59, 8 }
 0x62a   : > { %v3808_v29 = vcombine.high %v3760_v24, %v3760_v24  ;;  %v3815_v16 = vrot.slane %v3760_v24, %v8922_v41  ;;  %v4746_v0 = vsel %vm4705_vm1, %v4618_v44, %v4745_v46  ;;  %v4366_v46 = vmax.f32 %v3994_v18, %v5016_v5 }
 0x62b   : > { %v4747_v2 = vsel %vm4707_vm5, %v4622_v45, %v4746_v0  ;;  %v3791_v19 = vcombine.high %v3759_v47, %v3759_v47  ;;  %v3798_v37 = vrot.slane %v3759_v47, %v8922_v41  ;;  %v4634_v10 = vrot.slane %v4365_v15, %v8954_v27 }
 0x62c   : > { %v3822_v55 = vrot.slane %v3808_v29, %v8922_v41  ;;  %v3823_v56 = vcombine.high %v3815_v16, %v3815_v16  ;;  %v4748_v62 = vsel %vm4709_vm7, %v4626_v23, %v4747_v2  ;;  %v4973_v44 = vrot.slane %v3815_v16, 9 }
 0x62d   : > { %v3805_v8 = vrot.slane %v3791_v19, %v8922_v41  ;;  %3694 = vxpose.xlu1.b32.cont [2/16] (narrow) %v3662_v54, 8  ;;  %v3806_v7 = vcombine.high %v3798_v37, %v3798_v37  ;;  %v4969_v61 = vrot.slane %v3798_v37, 9  ;;  %v4749_v48 = vsel %vm4711_vm9, %v4630_v49, %v4748_v62 }
 0x62e   : > { %v3824_v39 = vcombine.high %v3822_v55, %v3822_v55  ;;  %v4974_v29 = vrot.slane %v3823_v56, 9  ;;  %v4975_v23 = vrot.slane %v3822_v55, 9  ;;  %v4323_v12 = vmax.f32 %v3815_v16, %v4973_v44 }
 0x62f   : > { %v5228_v14 = vpop.f32.mrb[22].mxu1  ;;  %v3807_v24 = vcombine.high %v3805_v8, %v3805_v8  ;;  %v4971_v59 = vrot.slane %v3805_v8, 9  ;;  %v4970_v47 = vrot.slane %v3806_v7, 9  ;;  %v4319_v34 = vmax.f32 %v3798_v37, %v4969_v61 }
 0x630   : > { %v3622_v45 = vpop.f32.mrb[23].mxu1  ;;  %v3628_v19 = vadd.f32 %v5228_v14, %v8897_v51  ;;  %v4976_v62 = vrot.slane %v3824_v39, 9  ;;  %v4638_v5 = vrot.slane %v4366_v46, %v8954_v27  ;;  %v4324_v37 = vmax.f32 %v3823_v56, %v4974_v29 }
 0x631   : > { %v3623_v0 = vadd.f32 %v8897_v51, %v3622_v45  ;;  %v4972_v2 = vrot.slane %v3807_v24, 9  ;;  %v4321_v54 = vmax.f32 %v3805_v8, %v4971_v59  ;;  %3695 = vxpose.xlu1.b32.cont [3/16] (narrow) %v3663_v17, 8  ;;  %v4320_v52 = vmax.f32 %v3806_v7, %v4970_v47 }
 0x632   : > { %v4450_v61 = vrot.slane %v4319_v34, %v8954_v27  ;;  %v4750_v17 = vsel %vm4713_vm11, %v4634_v10, %v4749_v48  ;;  %v4325_v8 = vmax.f32 %v3822_v55, %v4975_v23  ;;  %v3686_v7 = vmax.f32 %v3628_v19, 0.0 }
 0x633   : > { %v3685_v49 = vmax.f32 %v3623_v0, 0.0  ;;  %v4322_v33 = vmax.f32 %v3807_v24, %v4972_v2  ;;  %v4458_v18 = vrot.slane %v4321_v54, %v8954_v27  ;;  %v4454_v45 = vrot.slane %v4320_v52, %v8954_v27 }
 0x634   : > { %v9174_v16 = vsel %vm4715_vm12, %v4638_v5, %v4750_v17  ;;  %v4326_v14 = vmax.f32 %v3824_v39, %v4976_v62  ;;  %v4466_v44 = vrot.slane %v4323_v12, %v8954_v27  ;;  %v4470_v48 = vrot.slane %v4324_v37, %v8954_v27 }
 0x635   : > { %3733 = vxpose.xlu0.b32.cont [9/16] (narrow) %v3685_v49, 8  ;;  %3696 = vxpose.xlu1.b32.cont [4/16] (narrow) %v3664_v32, 8  ;;  %v4462_v15 = vrot.slane %v4322_v33, %v8954_v27  ;;  %v4704_v56 = vsel %vm4703_vm0, %v4454_v45, %v4450_v61  ;;  %v4474_v33 = vrot.slane %v4325_v8, %v8954_v27 }
 0x636   : > { %v4706_v24 = vsel %vm4705_vm1, %v4458_v18, %v4704_v56  ;;  %v4478_v55 = vrot.slane %v4326_v14, %v8954_v27 }
 0x637   : > { %v4708_v60 = vsel %vm4707_vm5, %v4462_v15, %v4706_v24 }
 0x638   : > { %v4710_v32 = vsel %vm4709_vm7, %v4466_v44, %v4708_v60 }
 0x639   : > { %3734 = vxpose.xlu0.b32.cont [10/16] (narrow) %v3686_v7, 8  ;;  %3697 = vxpose.xlu1.b32.cont [5/16] (narrow) %v3665_v38, 8  ;;  %v4712_v39 = vsel %vm4711_vm9, %v4470_v48, %v4710_v32 }
 0x63a   : > { %v4714_v12 = vsel %vm4713_vm11, %v4474_v33, %v4712_v39 }
 0x63b   : > { %v9189_v59 = vsel %vm4715_vm12, %v4478_v55, %v4714_v12 }
 0x63d   : > { %3698 = vxpose.xlu1.b32.cont [6/16] (narrow) %v3666_v22, 8 }
 0x641   : > { %3699 = vxpose.xlu1.b32.cont [7/16] (narrow) %v3667_v25, 8 }
 0x643   : > { %v5231_v6 = vpop.f32.mrb[24].mxu1 }
 0x644   : > { %v3638_v38 = vadd.f32 %v5231_v6, %v8897_v51  ;;  %v3632_v46 = vpop.f32.mrb[25].mxu1 }
 0x645   : > { %v3633_v29 = vadd.f32 %v8897_v51, %v3632_v46  ;;  %3700 = vxpose.xlu1.b32.cont [8/16] (narrow) %v3668_v42, 8 }
 0x646   : > { %v3688_v47 = vmax.f32 %v3638_v38, 0.0 }
 0x647   : > { %v3687_v34 = vmax.f32 %v3633_v29, 0.0 }
 0x648   : > { %v3772_v0 = vmax.f32 %v3686_v7, %v3688_v47 }
 0x649   : > { %v3771_v23 = vmax.f32 %v3685_v49, %v3687_v34  ;;  %3735 = vxpose.xlu0.b32.cont [11/16] (narrow) %v3687_v34, 8  ;;  %3701 = vxpose.xlu1.b32.cont [9/16] (narrow) %v3669_v31, 8 }
 0x64a   : > { %v4012_v2 = vcombine.high %v3772_v0, %v3772_v0  ;;  %v4019_v36 = vrot.slane %v3772_v0, %v8922_v41 }
 0x64b   : > { %v3995_v9 = vcombine.high %v3771_v23, %v3771_v23  ;;  %v4002_v22 = vrot.slane %v3771_v23, %v8922_v41  ;;  %v10172_v23 = vmax.f32 %v9068_v20, 0.0 }
 0x64c   : > { %v4026_v25 = vrot.slane %v4012_v2, %v8922_v41  ;;  %v4027_v54 = vcombine.high %v4019_v36, %v4019_v36  ;;  %v5021_v52 = vrot.slane %v4019_v36, 9 }
 0x64d   : > { %v4009_v10 = vrot.slane %v3995_v9, %v8922_v41  ;;  %v4010_v50 = vcombine.high %v4002_v22, %v4002_v22  ;;  %v5017_v42 = vrot.slane %v4002_v22, 9  ;;  %3736 = vxpose.xlu0.b32.cont [12/16] (narrow) %v3688_v47, 8  ;;  %3702 = vxpose.xlu1.b32.cont [10/16] (narrow) %v3670_v28, 8 }
 0x64e   : > { %v5022_v19 = vrot.slane %v4027_v54, 9  ;;  %v4028_v49 = vcombine.high %v4026_v25, %v4026_v25  ;;  %v5023_v5 = vrot.slane %v4026_v25, 9  ;;  %v4371_v8 = vmax.f32 %v4019_v36, %v5021_v52 }
 0x64f   : > { %v4011_v62 = vcombine.high %v4009_v10, %v4009_v10  ;;  %v5018_v11 = vrot.slane %v4010_v50, 9  ;;  %v5019_v31 = vrot.slane %v4009_v10, 9  ;;  %v4367_v18 = vmax.f32 %v4002_v22, %v5017_v42 }
 0x650   : > { %v5024_v17 = vrot.slane %v4028_v49, 9  ;;  %v4372_v15 = vmax.f32 %v4027_v54, %v5022_v19  ;;  %v4373_v56 = vmax.f32 %v4026_v25, %v5023_v5  ;;  %v4658_v60 = vrot.slane %v4371_v8, %v8954_v27 }
 0x651   : > { %v5020_v37 = vrot.slane %v4011_v62, 9  ;;  %v4368_v61 = vmax.f32 %v4010_v50, %v5018_v11  ;;  %v4369_v45 = vmax.f32 %v4009_v10, %v5019_v31  ;;  %3703 = vxpose.xlu1.b32.cont [11/16] (narrow) %v3671_v3, 8  ;;  %v4642_v14 = vrot.slane %v4367_v18, %v8954_v27 }
 0x652   : > { %v4374_v44 = vmax.f32 %v4028_v49, %v5024_v17  ;;  %v4662_v33 = vrot.slane %v4372_v15, %v8954_v27  ;;  %v4666_v39 = vrot.slane %v4373_v56, %v8954_v27  ;;  %v10173_v25 = vmax.f32 %v9065_v1, 0.0 }
 0x653   : > { %v4370_v7 = vmax.f32 %v4011_v62, %v5020_v37  ;;  %v4646_v26 = vrot.slane %v4368_v61, %v8954_v27  ;;  %v4650_v28 = vrot.slane %v4369_v45, %v8954_v27 }
 0x654   : > { %v4670_v38 = vrot.slane %v4374_v44, %v8954_v27 }
 0x655   : > { %v4654_v24 = vrot.slane %v4370_v7, %v8954_v27  ;;  %v4752_v48 = vsel %vm4703_vm0, %v4646_v26, %v4642_v14  ;;  %3704 = vxpose.xlu1.b32.cont [12/16] (narrow) %v3672_v43, 8 }
 0x656   : > { %v4753_v57 = vsel %vm4705_vm1, %v4650_v28, %v4752_v48 }
 0x657   : > { %v5234_v3 = vpop.f32.mrb[26].mxu1  ;;  %v4754_v32 = vsel %vm4707_vm5, %v4654_v24, %v4753_v57 }
 0x658   : > { %v3642_v55 = vpop.f32.mrb[27].mxu1  ;;  %v4755_v12 = vsel %vm4709_vm7, %v4658_v60, %v4754_v32  ;;  %v3648_v43 = vadd.f32 %v5234_v3, %v8897_v51 }
 0x659   : > { %v3643_v6 = vadd.f32 %v8897_v51, %v3642_v55  ;;  %v4756_v46 = vsel %vm4711_vm9, %v4662_v33, %v4755_v12  ;;  %3705 = vxpose.xlu1.b32.cont [13/16] (narrow) %v3673_v53, 8 }
 0x65a   : > { %v4757_v13 = vsel %vm4713_vm11, %v4666_v39, %v4756_v46  ;;  %v3690_v34 = vmax.f32 %v3648_v43, 0.0 }
 0x65b   : > { %v3689_v29 = vmax.f32 %v3643_v6, 0.0  ;;  %v9230_v47 = vsel %vm4715_vm12, %v4670_v38, %v4757_v13 }
 0x65d   : > { %3737 = vxpose.xlu0.b32.cont [13/16] (narrow) %v3689_v29, 8  ;;  %3706 = vxpose.xlu1.b32.cont [14/16] (narrow) %v3674_v35, 8 }
 0x661   : > { %3738 = vxpose.xlu0.b32.cont [14/16] (narrow) %v3690_v34, 8  ;;  %v5237_v0 = vpop.f32.mrb[28].mxu1  ;;  %3707 = vxpose.xlu1.b32.cont [15/16] (narrow) %v10172_v23, 8 }
 0x662   : > { %v3658_v58 = vadd.f32 %v5237_v0, %v8897_v51  ;;  %v3652_v53 = vpop.f32.mrb[29].mxu1 }
 0x663   : > { %v3653_v2 = vadd.f32 %v8897_v51, %v3652_v53 }
 0x664   : > { %v3692_v36 = vmax.f32 %v3658_v58, 0.0 }
 0x665   : > { %v3691_v9 = vmax.f32 %v3653_v2, 0.0  ;;  %3708 = vxpose.xlu1.b32.end [16/16] (narrow) %v10173_v25, 8 }
 0x666   : > { %v3774_v22 = vmax.f32 %v3690_v34, %v3692_v36 }
 0x667   : > { %v3773_v54 = vmax.f32 %v3689_v29, %v3691_v9  ;;  %3739 = vxpose.xlu0.b32.cont [15/16] (narrow) %v3691_v9, 8 }
 0x668   : > { %v4046_v4 = vcombine.high %v3774_v22, %v3774_v22  ;;  %v4053_v35 = vrot.slane %v3774_v22, %v8922_v41 }
 0x669   : > { %v4029_v10 = vcombine.high %v3773_v54, %v3773_v54  ;;  %v4036_v20 = vrot.slane %v3773_v54, %v8922_v41 }
 0x66a   : > { %v4060_v50 = vrot.slane %v4046_v4, %v8922_v41  ;;  %v4061_v42 = vcombine.high %v4053_v35, %v4053_v35  ;;  %v5029_v49 = vrot.slane %v4053_v35, 9 }
 0x66b   : > { %v4043_v52 = vrot.slane %v4029_v10, %v8922_v41  ;;  %v4044_v51 = vcombine.high %v4036_v20, %v4036_v20  ;;  %v5025_v19 = vrot.slane %v4036_v20, 9  ;;  %3740 = vxpose.xlu0.b32.end [16/16] (narrow) %v3692_v36, 8 }
 0x66c   : > { %v5030_v62 = vrot.slane %v4061_v42, 9  ;;  %v4062_v1 = vcombine.high %v4060_v50, %v4060_v50  ;;  %v5031_v37 = vrot.slane %v4060_v50, 9  ;;  %v4379_v15 = vmax.f32 %v4053_v35, %v5029_v49 }
 0x66d   : > { %v4045_v11 = vcombine.high %v4043_v52, %v4043_v52  ;;  %v5026_v31 = vrot.slane %v4044_v51, 9  ;;  %v5027_v18 = vrot.slane %v4043_v52, 9  ;;  %v4375_v5 = vmax.f32 %v4036_v20, %v5025_v19 }
 0x66e   : > { %v5032_v8 = vrot.slane %v4062_v1, 9  ;;  %v4380_v7 = vmax.f32 %v4061_v42, %v5030_v62  ;;  %v4381_v56 = vmax.f32 %v4060_v50, %v5031_v37 }
 0x66f   : > { %v5028_v61 = vrot.slane %v4045_v11, 9  ;;  %v4376_v45 = vmax.f32 %v4044_v51, %v5026_v31  ;;  %v4377_v17 = vmax.f32 %v4043_v52, %v5027_v18  ;;  %4774 = vxpose.xlu0.b32.start [1/8] (short) (narrow) %v9189_v59, 8  ;;  %v4674_v14 = vrot.slane %v4375_v5, %v8954_v27 }
 0x670   : > { %v4382_v44 = vmax.f32 %v4062_v1, %v5032_v8  ;;  %v4690_v59 = vrot.slane %v4379_v15, %v8954_v27  ;;  %v4694_v57 = vrot.slane %v4380_v7, %v8954_v27  ;;  %v4698_v33 = vrot.slane %v4381_v56, %v8954_v27 }
 0x671   : > { %v4378_v41 = vmax.f32 %v4045_v11, %v5028_v61  ;;  %v4678_v26 = vrot.slane %v4376_v45, %v8954_v27  ;;  %v4682_v28 = vrot.slane %v4377_v17, %v8954_v27 }
 0x673   : > { %4775 = vxpose.xlu0.b32.cont [2/8] (short) (narrow) %v8990_v63, 8  ;;  %v4686_v24 = vrot.slane %v4378_v41, %v8954_v27  ;;  %v4759_v48 = vsel %vm4703_vm0, %v4678_v26, %v4674_v14  ;;  %v4702_v63 = vrot.slane %v4382_v44, %v8954_v27 }
 0x674   : > { %v4760_v60 = vsel %vm4705_vm1, %v4682_v28, %v4759_v48 }
 0x675   : > { %v4761_v3 = vsel %vm4707_vm5, %v4686_v24, %v4760_v60 }
 0x676   : > { %v4762_v32 = vsel %vm4709_vm7, %v4690_v59, %v4761_v3 }
 0x677   : > { %4776 = vxpose.xlu0.b32.cont [3/8] (short) (narrow) %v9056_v30, 8  ;;  %v4763_v55 = vsel %vm4711_vm9, %v4694_v57, %v4762_v32 }
 0x678   : > { %v4764_v39 = vsel %vm4713_vm11, %v4698_v33, %v4763_v55 }
 0x679   : > { %v4765_v12 = vsel %vm4715_vm12, %v4702_v63, %v4764_v39 }
 0x67b   : > { %4777 = vxpose.xlu0.b32.cont [4/8] (short) (narrow) %v9103_v40, 8 }
 0x67f   : > { %4778 = vxpose.xlu0.b32.cont [5/8] (short) (narrow) %v9128_v21, 8 }
 0x683   : > { %4779 = vxpose.xlu0.b32.cont [6/8] (short) (narrow) %v9174_v16, 8 }
 0x687   : > { %4780 = vxpose.xlu0.b32.cont [7/8] (short) (narrow) %v9230_v47, 8 }
 0x68b   : > { %4781 = vxpose.xlu0.b32.end [8/8] (short) (narrow) %v4765_v12, 8 }
 0x6a9   : > { %v3709_v27 = vpop.trf.xlu1 }
 0x6aa   : > { %3757 = vst [vmem:[%s258_s30] sm:$0xff] %v3709_v27 }
 0x6af   : > { %v3741_v30 = vpop.trf.xlu0 }
 0x6b0   : > { %3758 = vst [vmem:[%s258_s30 + $0x8] sm:$0xff] %v3741_v30 }
 0x6ef   : > { %v4790_v40 = vpop.trf.xlu0 }
 0x6f0   : > { %4806 = vst.msk [vmem:[%s262_s10] sm:$0xff] %vm3300_vm2, %v4790_v40 }
 0x6f1 PF: > { %s17_s21 = sadd.s32 1, %s5327_s21  }
 0x6f2   : > { %p14_p4 = scmp.ge.s32.totalorder %s17_s21, 4  }
 0x6f4   :  { %16 = sbr.rel (!%p14_p4) target bundleno = 1 (0x1), region = 82 }

</bundles_post_ra>
